<compile_context>
chip_gen: v7x
topology: tpu7x:2x2x1
jax: 0.10.0
libtpu: 0.0.40
codegen_flags: <defaults>
</compile_context>

<pallas_src>
import jax
import jax.numpy as jnp
import numpy as np
from jax.experimental import pallas as pl
from jax.experimental.pallas import tpu as pltpu

EPS = 1e-5          # nn.BatchNorm2d default
NEG_SLOPE = 0.01    # F.leaky_relu default


# ---------------------------------------------------------------------------
# Fused Pallas kernel: conv1/bn1 -> conv2/bn2 -> conv3/bn3 -> head -> softmax
# ---------------------------------------------------------------------------
def fused_policy_kernel(x_ref, t1_ref, t2_ref, t3_ref,
                        p1_ref, p2_ref, p3_ref,
                        gb1_ref, gb2_ref, gb3_ref,
                        wh_ref, bh_ref, o_ref):

    def conv_bn_lrelu(x, t_ref, p_ref, gb_ref):
        # Conv as a single MXU matmul against the block-Toeplitz weight.
        y = jnp.dot(x, t_ref[...], preferred_element_type=jnp.float32)  # (B, HW*C)
        inv_b = 1.0 / y.shape[0]

        # One-pass train-mode BN stats (biased var, PyTorch semantics).
        # p_ref pools same-channel columns and divides by HW, so `mean`/`msq`
        # come back already broadcast over all (h, w) columns.
        pool = p_ref[...]
        s1 = jnp.sum(y, axis=0, keepdims=True)          # (1, HW*C)
        s2 = jnp.sum(y * y, axis=0, keepdims=True)      # (1, HW*C)
        mean = jnp.dot(s1, pool, preferred_element_type=jnp.float32) * inv_b
        msq = jnp.dot(s2, pool, preferred_element_type=jnp.float32) * inv_b
        var = msq - mean * mean

        gamma = gb_ref[0:1, :]                          # (1, HW*C), pre-tiled
        beta = gb_ref[1:2, :]
        scale = gamma * jax.lax.rsqrt(var + EPS)
        shift = beta - scale * mean
        z = y * scale + shift                           # single FMA per element
        return jnp.where(z >= 0, z, NEG_SLOPE * z)      # leaky_relu

    h = conv_bn_lrelu(x_ref[...], t1_ref, p1_ref, gb1_ref)
    h = conv_bn_lrelu(h, t2_ref, p2_ref, gb2_ref)
    h = conv_bn_lrelu(h, t3_ref, p3_ref, gb3_ref)

    # Head: weight pre-permuted to (h, w, c) flatten order -> no transpose.
    z = jnp.dot(h, wh_ref[...], preferred_element_type=jnp.float32) + bh_ref[...]
    z = jnp.where(z >= 0, z, NEG_SLOPE * z)

    # softmax(dim=1)
    m = jnp.max(z, axis=1, keepdims=True)
    e = jnp.exp(z - m)
    denom = jnp.sum(e, axis=1, keepdims=True)
    o_ref[...] = e * pl.reciprocal(denom, approx=False)


# ---------------------------------------------------------------------------
# pallas_call wrapper (everything resident in VMEM, no grid needed)
# ---------------------------------------------------------------------------
def _vmem():
    return pl.BlockSpec(memory_space=pltpu.MemorySpace.VMEM)


def fused_policy_call(x2d, kp):
    B = x2d.shape[0]
    A = kp["wh"].shape[1]
    return pl.pallas_call(
        fused_policy_kernel,
        out_shape=jax.ShapeDtypeStruct((B, A), jnp.float32),
        in_specs=[_vmem() for _ in range(12)],
        out_specs=_vmem(),
    )(x2d, kp["t1"], kp["t2"], kp["t3"],
      kp["p1"], kp["p2"], kp["p3"],
      kp["gb1"], kp["gb2"], kp["gb3"],
      kp["wh"], kp["bh"])


@jax.jit
def policy_forward(x_nchw, kp):
    """x_nchw: (B, 1, H, W) like PyTorch.  kp: prepared kernel params."""
    B, C, H, W = x_nchw.shape
    # kernel activation layout: rows = batch, columns = (h, w, c), c fastest.
    x2d = jnp.transpose(x_nchw, (0, 2, 3, 1)).reshape(B, H * W * C)
    return fused_policy_call(x2d, kp)


# ---------------------------------------------------------------------------
# One-time host-side parameter preparation
# ---------------------------------------------------------------------------
def prepare_kernel_params(p, H, W, num_actions):
    def toeplitz(w, Hin, Win):
        """Block-Toeplitz matrix for VALID stride-1 conv in (h, w, c) layout."""
        w = np.asarray(w, np.float32)
        Cout, Cin, kh, kw = w.shape
        Ho, Wo = Hin - kh + 1, Win - kw + 1
        T = np.zeros((Hin * Win * Cin, Ho * Wo * Cout), np.float32)
        for oh in range(Ho):
            for ow in range(Wo):
                for di in range(kh):
                    for dj in range(kw):
                        r0 = ((oh + di) * Win + (ow + dj)) * Cin
                        c0 = (oh * Wo + ow) * Cout
                        T[r0:r0 + Cin, c0:c0 + Cout] = w[:, :, di, dj].T
        return T, Ho, Wo, Cout

    def pool_mat(hw, cout):
        """P[i, j] = 1/hw if columns i, j belong to the same channel."""
        idx = np.arange(hw * cout)
        return ((idx[:, None] % cout) == (idx[None, :] % cout)) \
            .astype(np.float32) / np.float32(hw)

    def gb_cols(g, b, hw):
        g = np.asarray(g, np.float32)
        b = np.asarray(b, np.float32)
        return np.stack([np.tile(g, hw), np.tile(b, hw)])   # (2, hw*cout)

    t1, H1, W1, C1 = toeplitz(p["w1"], H, W)     # conv1: 1 -> 5, k=2
    t2, H2, W2, C2 = toeplitz(p["w2"], H1, W1)   # conv2: 5 -> 10, k=3
    t3, H3, W3, C3 = toeplitz(p["w3"], H2, W2)   # conv3: 10 -> 10, k=3

    # Head weight: PyTorch flattens NCHW as (c, h, w); permute its columns to
    # the kernel's (h, w, c) order and transpose for `x @ W`.
    wh = np.asarray(p["wh"], np.float32)                         # (A, C*H*W)
    whp = wh.reshape(num_actions, C3, H3, W3) \
            .transpose(2, 3, 1, 0).reshape(H3 * W3 * C3, num_actions)

    # NOTE: conv biases b1/b2/b3 are intentionally NOT passed to the kernel --
    # batch-stat BatchNorm cancels a per-channel constant exactly.
    f = jnp.asarray
    return {
        "t1": f(t1), "t2": f(t2), "t3": f(t3),
        "p1": f(pool_mat(H1 * W1, C1)),
        "p2": f(pool_mat(H2 * W2, C2)),
        "p3": f(pool_mat(H3 * W3, C3)),
        "gb1": f(gb_cols(p["g1"], p["bt1"], H1 * W1)),
        "gb2": f(gb_cols(p["g2"], p["bt2"], H2 * W2)),
        "gb3": f(gb_cols(p["g3"], p["bt3"], H3 * W3)),
        "wh": f(whp),
        "bh": f(np.asarray(p["bh"], np.float32).reshape(1, -1)),
    }


# ---------------------------------------------------------------------------
# Pure-JAX reference (verification only; keeps the conv biases)
# ---------------------------------------------------------------------------
def reference_forward(x, p):
    def conv(x, w, b):
        y = jax.lax.conv_general_dilated(
            x, w, (1, 1), "VALID", dimension_numbers=("NCHW", "OIHW", "NCHW"))
        return y + b.reshape(1, -1, 1, 1)

    def bn(y, g, bt):
        mu = jnp.mean(y, axis=(0, 2, 3), keepdims=True)
        var = jnp.mean((y - mu) ** 2, axis=(0, 2, 3), keepdims=True)
        return g.reshape(1, -1, 1, 1) * (y - mu) / jnp.sqrt(var + EPS) \
            + bt.reshape(1, -1, 1, 1)

    def lrelu(z):
        return jnp.where(z >= 0, z, NEG_SLOPE * z)

    y = lrelu(bn(conv(x, p["w1"], p["b1"]), p["g1"], p["bt1"]))
    y = lrelu(bn(conv(y, p["w2"], p["b2"]), p["g2"], p["bt2"]))
    y = lrelu(bn(conv(y, p["w3"], p["b3"]), p["g3"], p["bt3"]))
    h = lrelu(y.reshape(y.shape[0], -1) @ p["wh"].T + p["bh"])
    m = jnp.max(h, axis=1, keepdims=True)
    e = jnp.exp(h - m)
    return e / jnp.sum(e, axis=1, keepdims=True)


# ---------------------------------------------------------------------------
def init_params(key, num_actions):
    ks = jax.random.split(key, 8)
    f32 = jnp.float32
    return {
        "w1": 0.1 * jax.random.normal(ks[0], (5, 1, 2, 2), f32),
        "b1": 0.1 * jax.random.normal(ks[1], (5,), f32),
        "g1": jnp.ones((5,), f32), "bt1": jnp.zeros((5,), f32),
        "w2": 0.1 * jax.random.normal(ks[2], (10, 5, 3, 3), f32),
        "b2": 0.1 * jax.random.normal(ks[3], (10,), f32),
        "g2": jnp.ones((10,), f32), "bt2": jnp.zeros((10,), f32),
        "w3": 0.1 * jax.random.normal(ks[4], (10, 10, 3, 3), f32),
        "b3": 0.1 * jax.random.normal(ks[5], (10,), f32),
        "g3": jnp.ones((10,), f32), "bt3": jnp.zeros((10,), f32),
        "wh": 0.1 * jax.random.normal(ks[6], (num_actions, 200), f32),
        "bh": 0.1 * jax.random.normal(ks[7], (num_actions,), f32),
    }


if __name__ == "__main__":
    num_actions = 4
    key = jax.random.PRNGKey(0)
    kx, kp_key = jax.random.split(key)

    # head expects 200 = 10 * (H-5) * (W-5)  ->  (H, W) = (10, 9) gives 5*4=20
    H, W = 10, 9
    x = jax.random.normal(kx, (2, 1, H, W), jnp.float32)   # NCHW, like PyTorch
    params = init_params(kp_key, num_actions)
    kparams = prepare_kernel_params(params, H, W, num_actions)

    out = jax.block_until_ready(policy_forward(x, kparams))
    ref = jax.block_until_ready(reference_forward(x, params))

    np.testing.assert_allclose(np.asarray(out), np.asarray(ref),
                               rtol=1e-4, atol=1e-5)
    assert out.shape == (2, num_actions)
    print("KERNEL_OK")
</pallas_src>

<mosaic_0001>
module attributes {stable_mosaic.version = 11 : i64} {
  func.func @fused_policy_kernel(%arg0: memref<2x90xf32, #tpu.memory_space<vmem>>, %arg1: memref<90x360xf32, #tpu.memory_space<vmem>>, %arg2: memref<360x420xf32, #tpu.memory_space<vmem>>, %arg3: memref<420x200xf32, #tpu.memory_space<vmem>>, %arg4: memref<360x360xf32, #tpu.memory_space<vmem>>, %arg5: memref<420x420xf32, #tpu.memory_space<vmem>>, %arg6: memref<200x200xf32, #tpu.memory_space<vmem>>, %arg7: memref<2x360xf32, #tpu.memory_space<vmem>>, %arg8: memref<2x420xf32, #tpu.memory_space<vmem>>, %arg9: memref<2x200xf32, #tpu.memory_space<vmem>>, %arg10: memref<200x4xf32, #tpu.memory_space<vmem>>, %arg11: memref<1x4xf32, #tpu.memory_space<vmem>>, %arg12: memref<2x4xf32, #tpu.memory_space<vmem>>) attributes {dimension_semantics = [], scalar_prefetch = 0 : i64, scratch_operands = 0 : i64, tpu.core_type = #tpu.core_type<tc>} {
    %c0 = arith.constant 0 : index
    %c0_0 = arith.constant 0 : index
    %0 = vector.load %arg0[%c0, %c0_0] : memref<2x90xf32, #tpu.memory_space<vmem>>, vector<2x90xf32>
    %c0_1 = arith.constant 0 : index
    %c0_2 = arith.constant 0 : index
    %1 = vector.load %arg1[%c0_1, %c0_2] : memref<90x360xf32, #tpu.memory_space<vmem>>, vector<90x360xf32>
    %cst = arith.constant dense<0.000000e+00> : vector<2x360xf32>
    %2 = tpu.matmul %0, %1, %cst {dimension_numbers = #tpu.dot_dimension_numbers<[1], [0], [0], [1], [0, 0, 1, 1], [], []>} : vector<2x90xf32>, vector<90x360xf32>, vector<2x360xf32> -> vector<2x360xf32>
    %c0_3 = arith.constant 0 : index
    %c0_4 = arith.constant 0 : index
    %3 = vector.load %arg4[%c0_3, %c0_4] : memref<360x360xf32, #tpu.memory_space<vmem>>, vector<360x360xf32>
    %cst_5 = arith.constant dense<0.000000e+00> : vector<360xf32>
    %4 = vector.multi_reduction <add>, %2, %cst_5 [0] : vector<2x360xf32> to vector<360xf32>
    %5 = vector.shape_cast %4 : vector<360xf32> to vector<1x360xf32>
    %6 = arith.mulf %2, %2 : vector<2x360xf32>
    %cst_6 = arith.constant dense<0.000000e+00> : vector<360xf32>
    %7 = vector.multi_reduction <add>, %6, %cst_6 [0] : vector<2x360xf32> to vector<360xf32>
    %8 = vector.shape_cast %7 : vector<360xf32> to vector<1x360xf32>
    %cst_7 = arith.constant dense<0.000000e+00> : vector<1x360xf32>
    %9 = tpu.matmul %5, %3, %cst_7 {dimension_numbers = #tpu.dot_dimension_numbers<[1], [0], [0], [1], [0, 0, 1, 1], [], []>} : vector<1x360xf32>, vector<360x360xf32>, vector<1x360xf32> -> vector<1x360xf32>
    %cst_8 = arith.constant 5.000000e-01 : f32
    %10 = vector.broadcast %cst_8 : f32 to vector<1x360xf32>
    %11 = arith.mulf %9, %10 : vector<1x360xf32>
    %cst_9 = arith.constant dense<0.000000e+00> : vector<1x360xf32>
    %12 = tpu.matmul %8, %3, %cst_9 {dimension_numbers = #tpu.dot_dimension_numbers<[1], [0], [0], [1], [0, 0, 1, 1], [], []>} : vector<1x360xf32>, vector<360x360xf32>, vector<1x360xf32> -> vector<1x360xf32>
    %cst_10 = arith.constant 5.000000e-01 : f32
    %13 = vector.broadcast %cst_10 : f32 to vector<1x360xf32>
    %14 = arith.mulf %12, %13 : vector<1x360xf32>
    %15 = arith.mulf %11, %11 : vector<1x360xf32>
    %16 = arith.subf %14, %15 : vector<1x360xf32>
    %c0_11 = arith.constant 0 : index
    %c0_12 = arith.constant 0 : index
    %17 = vector.load %arg7[%c0_11, %c0_12] : memref<2x360xf32, #tpu.memory_space<vmem>>, vector<1x360xf32>
    %c1 = arith.constant 1 : index
    %c0_13 = arith.constant 0 : index
    %18 = vector.load %arg7[%c1, %c0_13] : memref<2x360xf32, #tpu.memory_space<vmem>>, vector<1x360xf32>
    %cst_14 = arith.constant 9.99999974E-6 : f32
    %19 = vector.broadcast %cst_14 : f32 to vector<1x360xf32>
    %20 = arith.addf %16, %19 : vector<1x360xf32>
    %21 = math.rsqrt %20 : vector<1x360xf32>
    %22 = arith.mulf %17, %21 : vector<1x360xf32>
    %23 = arith.mulf %22, %11 : vector<1x360xf32>
    %24 = arith.subf %18, %23 : vector<1x360xf32>
    %25 = vector.broadcast %22 : vector<1x360xf32> to vector<2x360xf32>
    %26 = arith.mulf %2, %25 : vector<2x360xf32>
    %27 = vector.broadcast %24 : vector<1x360xf32> to vector<2x360xf32>
    %28 = arith.addf %26, %27 : vector<2x360xf32>
    %cst_15 = arith.constant 0.000000e+00 : f32
    %29 = vector.broadcast %cst_15 : f32 to vector<2x360xf32>
    %30 = arith.cmpf oge, %28, %29 : vector<2x360xf32>
    %cst_16 = arith.constant 0.00999999977 : f32
    %31 = vector.broadcast %cst_16 : f32 to vector<2x360xf32>
    %32 = arith.mulf %31, %28 : vector<2x360xf32>
    %33 = arith.select %30, %28, %32 : vector<2x360xi1>, vector<2x360xf32>
    %c0_17 = arith.constant 0 : index
    %c0_18 = arith.constant 0 : index
    %34 = vector.load %arg2[%c0_17, %c0_18] : memref<360x420xf32, #tpu.memory_space<vmem>>, vector<360x420xf32>
    %cst_19 = arith.constant dense<0.000000e+00> : vector<2x420xf32>
    %35 = tpu.matmul %33, %34, %cst_19 {dimension_numbers = #tpu.dot_dimension_numbers<[1], [0], [0], [1], [0, 0, 1, 1], [], []>} : vector<2x360xf32>, vector<360x420xf32>, vector<2x420xf32> -> vector<2x420xf32>
    %c0_20 = arith.constant 0 : index
    %c0_21 = arith.constant 0 : index
    %36 = vector.load %arg5[%c0_20, %c0_21] : memref<420x420xf32, #tpu.memory_space<vmem>>, vector<420x420xf32>
    %cst_22 = arith.constant dense<0.000000e+00> : vector<420xf32>
    %37 = vector.multi_reduction <add>, %35, %cst_22 [0] : vector<2x420xf32> to vector<420xf32>
    %38 = vector.shape_cast %37 : vector<420xf32> to vector<1x420xf32>
    %39 = arith.mulf %35, %35 : vector<2x420xf32>
    %cst_23 = arith.constant dense<0.000000e+00> : vector<420xf32>
    %40 = vector.multi_reduction <add>, %39, %cst_23 [0] : vector<2x420xf32> to vector<420xf32>
    %41 = vector.shape_cast %40 : vector<420xf32> to vector<1x420xf32>
    %cst_24 = arith.constant dense<0.000000e+00> : vector<1x420xf32>
    %42 = tpu.matmul %38, %36, %cst_24 {dimension_numbers = #tpu.dot_dimension_numbers<[1], [0], [0], [1], [0, 0, 1, 1], [], []>} : vector<1x420xf32>, vector<420x420xf32>, vector<1x420xf32> -> vector<1x420xf32>
    %cst_25 = arith.constant 5.000000e-01 : f32
    %43 = vector.broadcast %cst_25 : f32 to vector<1x420xf32>
    %44 = arith.mulf %42, %43 : vector<1x420xf32>
    %cst_26 = arith.constant dense<0.000000e+00> : vector<1x420xf32>
    %45 = tpu.matmul %41, %36, %cst_26 {dimension_numbers = #tpu.dot_dimension_numbers<[1], [0], [0], [1], [0, 0, 1, 1], [], []>} : vector<1x420xf32>, vector<420x420xf32>, vector<1x420xf32> -> vector<1x420xf32>
    %cst_27 = arith.constant 5.000000e-01 : f32
    %46 = vector.broadcast %cst_27 : f32 to vector<1x420xf32>
    %47 = arith.mulf %45, %46 : vector<1x420xf32>
    %48 = arith.mulf %44, %44 : vector<1x420xf32>
    %49 = arith.subf %47, %48 : vector<1x420xf32>
    %c0_28 = arith.constant 0 : index
    %c0_29 = arith.constant 0 : index
    %50 = vector.load %arg8[%c0_28, %c0_29] : memref<2x420xf32, #tpu.memory_space<vmem>>, vector<1x420xf32>
    %c1_30 = arith.constant 1 : index
    %c0_31 = arith.constant 0 : index
    %51 = vector.load %arg8[%c1_30, %c0_31] : memref<2x420xf32, #tpu.memory_space<vmem>>, vector<1x420xf32>
    %cst_32 = arith.constant 9.99999974E-6 : f32
    %52 = vector.broadcast %cst_32 : f32 to vector<1x420xf32>
    %53 = arith.addf %49, %52 : vector<1x420xf32>
    %54 = math.rsqrt %53 : vector<1x420xf32>
    %55 = arith.mulf %50, %54 : vector<1x420xf32>
    %56 = arith.mulf %55, %44 : vector<1x420xf32>
    %57 = arith.subf %51, %56 : vector<1x420xf32>
    %58 = vector.broadcast %55 : vector<1x420xf32> to vector<2x420xf32>
    %59 = arith.mulf %35, %58 : vector<2x420xf32>
    %60 = vector.broadcast %57 : vector<1x420xf32> to vector<2x420xf32>
    %61 = arith.addf %59, %60 : vector<2x420xf32>
    %cst_33 = arith.constant 0.000000e+00 : f32
    %62 = vector.broadcast %cst_33 : f32 to vector<2x420xf32>
    %63 = arith.cmpf oge, %61, %62 : vector<2x420xf32>
    %cst_34 = arith.constant 0.00999999977 : f32
    %64 = vector.broadcast %cst_34 : f32 to vector<2x420xf32>
    %65 = arith.mulf %64, %61 : vector<2x420xf32>
    %66 = arith.select %63, %61, %65 : vector<2x420xi1>, vector<2x420xf32>
    %c0_35 = arith.constant 0 : index
    %c0_36 = arith.constant 0 : index
    %67 = vector.load %arg3[%c0_35, %c0_36] : memref<420x200xf32, #tpu.memory_space<vmem>>, vector<420x200xf32>
    %cst_37 = arith.constant dense<0.000000e+00> : vector<2x200xf32>
    %68 = tpu.matmul %66, %67, %cst_37 {dimension_numbers = #tpu.dot_dimension_numbers<[1], [0], [0], [1], [0, 0, 1, 1], [], []>} : vector<2x420xf32>, vector<420x200xf32>, vector<2x200xf32> -> vector<2x200xf32>
    %c0_38 = arith.constant 0 : index
    %c0_39 = arith.constant 0 : index
    %69 = vector.load %arg6[%c0_38, %c0_39] : memref<200x200xf32, #tpu.memory_space<vmem>>, vector<200x200xf32>
    %cst_40 = arith.constant dense<0.000000e+00> : vector<200xf32>
    %70 = vector.multi_reduction <add>, %68, %cst_40 [0] : vector<2x200xf32> to vector<200xf32>
    %71 = vector.shape_cast %70 : vector<200xf32> to vector<1x200xf32>
    %72 = arith.mulf %68, %68 : vector<2x200xf32>
    %cst_41 = arith.constant dense<0.000000e+00> : vector<200xf32>
    %73 = vector.multi_reduction <add>, %72, %cst_41 [0] : vector<2x200xf32> to vector<200xf32>
    %74 = vector.shape_cast %73 : vector<200xf32> to vector<1x200xf32>
    %cst_42 = arith.constant dense<0.000000e+00> : vector<1x200xf32>
    %75 = tpu.matmul %71, %69, %cst_42 {dimension_numbers = #tpu.dot_dimension_numbers<[1], [0], [0], [1], [0, 0, 1, 1], [], []>} : vector<1x200xf32>, vector<200x200xf32>, vector<1x200xf32> -> vector<1x200xf32>
    %cst_43 = arith.constant 5.000000e-01 : f32
    %76 = vector.broadcast %cst_43 : f32 to vector<1x200xf32>
    %77 = arith.mulf %75, %76 : vector<1x200xf32>
    %cst_44 = arith.constant dense<0.000000e+00> : vector<1x200xf32>
    %78 = tpu.matmul %74, %69, %cst_44 {dimension_numbers = #tpu.dot_dimension_numbers<[1], [0], [0], [1], [0, 0, 1, 1], [], []>} : vector<1x200xf32>, vector<200x200xf32>, vector<1x200xf32> -> vector<1x200xf32>
    %cst_45 = arith.constant 5.000000e-01 : f32
    %79 = vector.broadcast %cst_45 : f32 to vector<1x200xf32>
    %80 = arith.mulf %78, %79 : vector<1x200xf32>
    %81 = arith.mulf %77, %77 : vector<1x200xf32>
    %82 = arith.subf %80, %81 : vector<1x200xf32>
    %c0_46 = arith.constant 0 : index
    %c0_47 = arith.constant 0 : index
    %83 = vector.load %arg9[%c0_46, %c0_47] : memref<2x200xf32, #tpu.memory_space<vmem>>, vector<1x200xf32>
    %c1_48 = arith.constant 1 : index
    %c0_49 = arith.constant 0 : index
    %84 = vector.load %arg9[%c1_48, %c0_49] : memref<2x200xf32, #tpu.memory_space<vmem>>, vector<1x200xf32>
    %cst_50 = arith.constant 9.99999974E-6 : f32
    %85 = vector.broadcast %cst_50 : f32 to vector<1x200xf32>
    %86 = arith.addf %82, %85 : vector<1x200xf32>
    %87 = math.rsqrt %86 : vector<1x200xf32>
    %88 = arith.mulf %83, %87 : vector<1x200xf32>
    %89 = arith.mulf %88, %77 : vector<1x200xf32>
    %90 = arith.subf %84, %89 : vector<1x200xf32>
    %91 = vector.broadcast %88 : vector<1x200xf32> to vector<2x200xf32>
    %92 = arith.mulf %68, %91 : vector<2x200xf32>
    %93 = vector.broadcast %90 : vector<1x200xf32> to vector<2x200xf32>
    %94 = arith.addf %92, %93 : vector<2x200xf32>
    %cst_51 = arith.constant 0.000000e+00 : f32
    %95 = vector.broadcast %cst_51 : f32 to vector<2x200xf32>
    %96 = arith.cmpf oge, %94, %95 : vector<2x200xf32>
    %cst_52 = arith.constant 0.00999999977 : f32
    %97 = vector.broadcast %cst_52 : f32 to vector<2x200xf32>
    %98 = arith.mulf %97, %94 : vector<2x200xf32>
    %99 = arith.select %96, %94, %98 : vector<2x200xi1>, vector<2x200xf32>
    %c0_53 = arith.constant 0 : index
    %c0_54 = arith.constant 0 : index
    %100 = vector.load %arg10[%c0_53, %c0_54] : memref<200x4xf32, #tpu.memory_space<vmem>>, vector<200x4xf32>
    %cst_55 = arith.constant dense<0.000000e+00> : vector<2x4xf32>
    %101 = tpu.matmul %99, %100, %cst_55 {dimension_numbers = #tpu.dot_dimension_numbers<[1], [0], [0], [1], [0, 0, 1, 1], [], []>} : vector<2x200xf32>, vector<200x4xf32>, vector<2x4xf32> -> vector<2x4xf32>
    %c0_56 = arith.constant 0 : index
    %c0_57 = arith.constant 0 : index
    %102 = vector.load %arg11[%c0_56, %c0_57] : memref<1x4xf32, #tpu.memory_space<vmem>>, vector<1x4xf32>
    %103 = vector.broadcast %102 : vector<1x4xf32> to vector<2x4xf32>
    %104 = arith.addf %101, %103 : vector<2x4xf32>
    %cst_58 = arith.constant 0.000000e+00 : f32
    %105 = vector.broadcast %cst_58 : f32 to vector<2x4xf32>
    %106 = arith.cmpf oge, %104, %105 : vector<2x4xf32>
    %cst_59 = arith.constant 0.00999999977 : f32
    %107 = vector.broadcast %cst_59 : f32 to vector<2x4xf32>
    %108 = arith.mulf %107, %104 : vector<2x4xf32>
    %109 = arith.select %106, %104, %108 : vector<2x4xi1>, vector<2x4xf32>
    %cst_60 = arith.constant dense<0xFF800000> : vector<2xf32>
    %110 = vector.multi_reduction <maximumf>, %109, %cst_60 [1] : vector<2x4xf32> to vector<2xf32>
    %111 = vector.shape_cast %110 : vector<2xf32> to vector<2x1xf32>
    %112 = vector.broadcast %111 : vector<2x1xf32> to vector<2x4xf32>
    %113 = arith.subf %109, %112 : vector<2x4xf32>
    %114 = math.exp %113 : vector<2x4xf32>
    %cst_61 = arith.constant dense<0.000000e+00> : vector<2xf32>
    %115 = vector.multi_reduction <add>, %114, %cst_61 [1] : vector<2x4xf32> to vector<2xf32>
    %116 = vector.shape_cast %115 : vector<2xf32> to vector<2x1xf32>
    %117 = tpu.reciprocal %116 : vector<2x1xf32> -> vector<2x1xf32>
    %118 = vector.broadcast %117 : vector<2x1xf32> to vector<2x4xf32>
    %119 = arith.mulf %114, %118 : vector<2x4xf32>
    %c0_62 = arith.constant 0 : index
    %c0_63 = arith.constant 0 : index
    %120 = vector.load %arg12[%c0_62, %c0_63] : memref<2x4xf32, #tpu.memory_space<vmem>>, vector<2x4xf32>
    tpu.vector_store %arg12[%c0_62, %c0_63], %119 {strides = array<i32>} : memref<2x4xf32, #tpu.memory_space<vmem>>, vector<2x4xf32>,
    return
  }
}

</mosaic_0001>

<bundles_post_ra>
// kernel: policy_forward.1
= control target key start
LH: loop header
LB: loop body
LE: loop exit
PB: predicated region body
PF: predicated region fallthrough
CT: control target
= control target key end

     0   :  { %17 = vsyncpa [#allocation3], 0  ;;  %s8094_s0 = inlined_call_operand.vmem [shape: f32[2,90], index: 0, kind: input, shape index: {}]   ;;  %s8095_s1 = inlined_call_operand.hbm [shape: f32[90,360], index: 1, kind: input, shape index: {}]   ;;  %s8096_s2 = inlined_call_operand.vmem [shape: f32[360,420], index: 2, kind: input, shape index: {}]   ;;  %s8097_s3 = inlined_call_operand.vmem [shape: f32[420,200], index: 3, kind: input, shape index: {}]   ;;  %s8098_s4 = inlined_call_operand.vmem [shape: f32[360,360], index: 4, kind: input, shape index: {}]   ;;  %s8099_s5 = inlined_call_operand.vmem [shape: f32[420,420], index: 5, kind: input, shape index: {}]   ;;  %s8100_s6 = inlined_call_operand.vmem [shape: f32[200,200], index: 6, kind: input, shape index: {}]   ;;  %s8101_s7 = inlined_call_operand.vmem [shape: f32[2,360], index: 7, kind: input, shape index: {}]   ;;  %s8102_s8 = inlined_call_operand.vmem [shape: f32[2,420], index: 8, kind: input, shape index: {}]   ;;  %s8103_s9 = inlined_call_operand.vmem [shape: f32[2,200], index: 9, kind: input, shape index: {}]   ;;  %s8104_s10 = inlined_call_operand.vmem [shape: f32[200,4], index: 10, kind: input, shape index: {}]   ;;  %s8105_s11 = inlined_call_operand.vmem [shape: f32[1,4], index: 11, kind: input, shape index: {}]   ;;  %s8106_s12 = inlined_call_operand.hbm [shape: f32[2,4], index: 12, kind: output, shape index: {}]  }
   0x1   :  { %18 = vsyncpa [#allocation4], 0  ;;  %s4787_s21 = smov [#allocation2]   ;;  %s4739_s25 = scalar_lea.hbm %s8095_s1, 4608 }
   0x2   :  { %s26_s22 = sshll.u32 %s4787_s21, 4  ;;  %p4740_p0 = scmp.ne.s32.totalorder %s8095_s1, %s4739_s25  ;;  %s27_s22 = int_to_ptr.vmem [resolvable:$true] %s26_s22 }
   0x3   :  { %p4743_p1 = scmp.lt.u32.totalorder %s4739_s25, %s8095_s1 }
   0x5   :  { %p4745_p2 = pnand %p4743_p1, %p4740_p0 }
   0x7   :  { %4748 = shalt.err (!%p4745_p2)
}
   0x8   :  { %s4749_s30 = scalar_lea.vmem %s27_s22, 4608  ;;  %p4754_p4 = scmp.lt.s32.totalorder %s27_s22, %s27_s22 }
   0x9   :  { %p4750_p3 = scmp.ne.s32.totalorder %s27_s22, %s4749_s30  ;;  %p4755_p5 = scmp.lt.s32.totalorder %s4749_s30, %s4749_s30 }
   0xb   :  { %p4756_p6 = por %p4755_p5, %p4754_p4 }
   0xd   :  { %p4757_p7 = pnand %p4756_p6, %p4750_p3 }
   0xf   :  { %4760 = shalt.err (!%p4757_p7)
}
  0x10   :  { %s4788_s13 = smov 384   ;;  %s4789_s14 = smov 24  }
  0x11   :  { %32 = dma.hbm_to_vmem [thread:$0]  %s8095_s1, 4608, %s27_s22, [#allocation3], %s4788_s13, %s4788_s13, %s4789_s14  }
  0x12   :  { %4783 = dma.done.wait [#allocation3], 4608  }
  0x13   :  { %4784 = vsyncadd [#allocation3], 4294962688  ;;  %v8107_v0 = vmov 0.0   ;;  %v58_v1 = vld [vmem:[#allocation2 + $0x8] sm:$0xff]  ;;  %v61_v2 = vld [vmem:[#allocation2 + $0x20] sm:$0xff]  ;;  %vm97_vm0 = vcmask 1041408  }
  0x14   :  { %171 = vmatprep.mubr.f32.mxu0 %v8107_v0  ;;  %v57_v3 = vld [vmem:[#allocation2] sm:$0xff]  ;;  %v3541_v4 = vpack.c.bf16 %v61_v2, %v58_v1  ;;  %v60_v5 = vld [vmem:[#allocation2 + $0x18] sm:$0xff]  ;;  %v67_v7 = vld [vmem:[#allocation2 + $0x50] sm:$0xff]  ;;  %vm4791_vm1 = vmmov 1   ;;  %vm93_vm3 = vcmask 736256   ;;  %v8109_v45 = vmov 0.0|0.0  }
  0x15   :  { %v64_v6 = vld [vmem:[#allocation2 + $0x38] sm:$0xff]  ;;  %v3543_v8 = vpack.c.bf16 %v60_v5, %v57_v3  ;;  %v63_v10 = vld [vmem:[#allocation2 + $0x30] sm:$0xff]  ;;  %v66_v11 = vld [vmem:[#allocation2 + $0x48] sm:$0xff]  ;;  %vm4793_vm4 = vmmov 0   ;;  %vm397_vm5 = vcmask 844800   ;;  %vm429_vm6 = vcmask 850944  }
  0x16   :  { %v3545_v9 = vpack.c.bf16 %v67_v7, %v64_v6  ;;  %v70_v12 = vld [vmem:[#allocation2 + $0x68] sm:$0xff]  ;;  %3542 = vmatprep.subr.bf16.mxu0 %v3541_v4  ;;  %v73_v13 = vld [vmem:[#allocation2 + $0x80] sm:$0xff]  ;;  %v3547_v14 = vpack.c.bf16 %v66_v11, %v63_v10  ;;  %v72_v17 = vld [vmem:[#allocation2 + $0x78] sm:$0xff]  ;;  %vm1825_vm10 = vcmask 287744   ;;  %vm1865_vm11 = vcmask 293888  }
  0x17   :  { %3544 = vmatpush1.bf16.msra.mxu0 %v3543_v8  ;;  %v3549_v15 = vpack.c.bf16 %v73_v13, %v70_v12  ;;  %v69_v16 = vld [vmem:[#allocation2 + $0x60] sm:$0xff]  ;;  %v76_v18 = vld [vmem:[#allocation2 + $0x98] sm:$0xff]  ;;  %v79_v19 = vld [vmem:[#allocation2 + $0xb0] sm:$0xff]  ;;  %vm1869_vm12 = vcmask 1043456  }
  0x18   :  { %3546 = vmatprep.subr.bf16.mxu0 %v3545_v9  ;;  %v3551_v20 = vpack.c.bf16 %v72_v17, %v69_v16  ;;  %v3553_v21 = vpack.c.bf16 %v79_v19, %v76_v18  ;;  %v75_v22 = vld [vmem:[#allocation2 + $0x90] sm:$0xff]  ;;  %v78_v23 = vld [vmem:[#allocation2 + $0xa8] sm:$0xff]  ;;  %v85_v25 = vld [vmem:[#allocation2 + $0xe0] sm:$0xff] }
  0x19   :  { %v82_v24 = vld [vmem:[#allocation2 + $0xc8] sm:$0xff]  ;;  %v3555_v26 = vpack.c.bf16 %v78_v23, %v75_v22  ;;  %v81_v28 = vld [vmem:[#allocation2 + $0xc0] sm:$0xff]  ;;  %v84_v29 = vld [vmem:[#allocation2 + $0xd8] sm:$0xff] }
  0x1a   :  { %v3557_v27 = vpack.c.bf16 %v85_v25, %v82_v24  ;;  %v88_v30 = vld [vmem:[#allocation2 + $0xf8] sm:$0xff]  ;;  %v91_v31 = vld [vmem:[#allocation2 + $0x110] sm:$0x3]  ;;  %v3559_v32 = vpack.c.bf16 %v84_v29, %v81_v28  ;;  %v90_v35 = vld [vmem:[#allocation2 + $0x108] sm:$0x3] }
  0x1b   :  { %3548 = vmatpush1.bf16.msra.mxu0 %v3547_v14  ;;  %v3561_v33 = vpack.c.bf16 %v91_v31, %v88_v30  ;;  %v87_v34 = vld [vmem:[#allocation2 + $0xf0] sm:$0xff]  ;;  %vm4875_vm2 = vmpackc.low %vm97_vm0, %vm4791_vm1  ;;  %v62_v39 = vld [vmem:[#allocation2 + $0x28] sm:$0xff] }
  0x1c   :  { %3550 = vmatprep.subr.bf16.mxu0 %v3549_v15  ;;  %v3564_v37 = vpack.c.bf16 %v90_v35, %v87_v34  ;;  %v59_v38 = vld [vmem:[#allocation2 + $0x10] sm:$0xff]  ;;  %v298_v40 = vld [vmem:[%s8098_s4 + $0x190] sm:$0xff]  ;;  %v4889_v41 = vld [vmem:[%s8094_s0] sm:$0x3] }
  0x1d   :  { %v3568_v42 = vpack.c.bf16 %v62_v39, %v59_v38  ;;  %v65_v43 = vld [vmem:[#allocation2 + $0x40] sm:$0xff]  ;;  %v301_v44 = vld [vmem:[%s8098_s4 + $0x1a8] sm:$0xff]  ;;  %v68_v46 = vld [vmem:[#allocation2 + $0x58] sm:$0xff] }
  0x1e   :  { %v4895_v47 = vpack.c.bf16 %v301_v44, %v298_v40  ;;  %v250_v48 = vld [vmem:[%s8098_s4 + $0x10] sm:$0xff]  ;;  %v253_v49 = vld [vmem:[%s8098_s4 + $0x28] sm:$0xff]  ;;  %v304_v51 = vld [vmem:[%s8098_s4 + $0x1c0] sm:$0xff]  ;;  %v3571_v55 = vpack.c.bf16 %v68_v46, %v65_v43 }
  0x1f   :  { %3552 = vmatpush1.bf16.msra.mxu0 %v3551_v20  ;;  %v4903_v50 = vpack.c.bf16 %v253_v49, %v250_v48  ;;  %v307_v52 = vld [vmem:[%s8098_s4 + $0x1d8] sm:$0xff]  ;;  %v256_v54 = vld [vmem:[%s8098_s4 + $0x40] sm:$0xff]  ;;  %v71_v56 = vld [vmem:[#allocation2 + $0x70] sm:$0xff] }
  0x20   :  { %3554 = vmatprep.subr.bf16.mxu0 %v3553_v21  ;;  %3675 = vmatprep.subr.bf16.mxu1 %v4895_v47  ;;  %v4914_v53 = vpack.c.bf16 %v307_v52, %v304_v51  ;;  %v259_v57 = vld [vmem:[%s8098_s4 + $0x58] sm:$0xff]  ;;  %v74_v58 = vld [vmem:[#allocation2 + $0x88] sm:$0xff]  ;;  %v310_v60 = vld [vmem:[%s8098_s4 + $0x1f0] sm:$0xff] }
  0x21   :  { %3677 = vmatpush3.bf16.msra.mxu1 %v4903_v50  ;;  %v4926_v59 = vpack.c.bf16 %v259_v57, %v256_v54  ;;  %v313_v61 = vld [vmem:[%s8098_s4 + $0x208] sm:$0xff]  ;;  %v262_v63 = vld [vmem:[%s8098_s4 + $0x70] sm:$0xff]  ;;  %v316_v2 = vld [vmem:[%s8098_s4 + $0x220] sm:$0xff]  ;;  %v3574_v3 = vpack.c.bf16 %v74_v58, %v71_v56 }
  0x22   :  { %3679 = vmatprep.subr.bf16.mxu1 %v4914_v53  ;;  %v4935_v62 = vpack.c.bf16 %v313_v61, %v310_v60  ;;  %v265_v1 = vld [vmem:[%s8098_s4 + $0x88] sm:$0xff]  ;;  %v319_v4 = vld [vmem:[%s8098_s4 + $0x238] sm:$0xff]  ;;  %v80_v6 = vld [vmem:[#allocation2 + $0xb8] sm:$0xff] }
  0x23   :  { %3556 = vmatpush1.bf16.msra.mxu0 %v3555_v26  ;;  %v77_v5 = vld [vmem:[#allocation2 + $0xa0] sm:$0xff]  ;;  %v4951_v7 = vpack.c.bf16 %v265_v1, %v262_v63  ;;  %v4954_v8 = vpack.c.bf16 %v319_v4, %v316_v2  ;;  %v268_v9 = vld [vmem:[%s8098_s4 + $0xa0] sm:$0xff]  ;;  %v322_v11 = vld [vmem:[%s8098_s4 + $0x250] sm:$0xff] }
  0x24   :  { %3558 = vmatprep.subr.bf16.mxu0 %v3557_v27  ;;  %v271_v10 = vld [vmem:[%s8098_s4 + $0xb8] sm:$0xff]  ;;  %v325_v12 = vld [vmem:[%s8098_s4 + $0x268] sm:$0xff]  ;;  %v3577_v13 = vpack.c.bf16 %v80_v6, %v77_v5  ;;  %v86_v15 = vld [vmem:[#allocation2 + $0xe8] sm:$0xff] }
  0x25   :  { %3681 = vmatpush3.bf16.msra.mxu1 %v4926_v59  ;;  %v83_v14 = vld [vmem:[#allocation2 + $0xd0] sm:$0xff]  ;;  %v4970_v16 = vpack.c.bf16 %v271_v10, %v268_v9  ;;  %v4973_v17 = vpack.c.bf16 %v325_v12, %v322_v11  ;;  %v89_v19 = vld [vmem:[#allocation2 + $0x100] sm:$0xff]  ;;  %v92_v20 = vld [vmem:[#allocation2 + $0x118] sm:$0x3] }
  0x26   :  { %3683 = vmatprep.subr.bf16.mxu1 %v4935_v62  ;;  %v3580_v18 = vpack.c.bf16 %v86_v15, %v83_v14  ;;  %v249_v21 = vld [vmem:[%s8098_s4 + $0x8] sm:$0xff]  ;;  %v252_v22 = vld [vmem:[%s8098_s4 + $0x20] sm:$0xff]  ;;  %v3583_v23 = vpack.c.bf16 %v92_v20, %v89_v19  ;;  %v251_v26 = vld [vmem:[%s8098_s4 + $0x18] sm:$0xff] }
  0x27   :  { %3560 = vmatpush1.bf16.msra.mxu0 %v3559_v32  ;;  %v4985_v24 = vpack.c.bf16 %v252_v22, %v249_v21  ;;  %v248_v25 = vld [vmem:[%s8098_s4] sm:$0xff]  ;;  %v255_v27 = vld [vmem:[%s8098_s4 + $0x38] sm:$0xff]  ;;  %v258_v28 = vld [vmem:[%s8098_s4 + $0x50] sm:$0xff] }
  0x28   :  { %3563 = vmatprep.subr.msk.bf16.mxu0 %vm4875_vm2, %v3561_v33  ;;  %v5001_v29 = vpack.c.bf16 %v251_v26, %v248_v25  ;;  %v5004_v30 = vpack.c.bf16 %v258_v28, %v255_v27  ;;  %v254_v31 = vld [vmem:[%s8098_s4 + $0x30] sm:$0xff]  ;;  %v257_v32 = vld [vmem:[%s8098_s4 + $0x48] sm:$0xff]  ;;  %v264_v34 = vld [vmem:[%s8098_s4 + $0x80] sm:$0xff] }
  0x29   :  { %3685 = vmatpush3.bf16.msra.mxu1 %v4951_v7  ;;  %v261_v33 = vld [vmem:[%s8098_s4 + $0x68] sm:$0xff]  ;;  %v5021_v35 = vpack.c.bf16 %v257_v32, %v254_v31  ;;  %v263_v38 = vld [vmem:[%s8098_s4 + $0x78] sm:$0xff]  ;;  %v270_v40 = vld [vmem:[%s8098_s4 + $0xb0] sm:$0xff] }
  0x2a   :  { %3687 = vmatprep.subr.bf16.mxu1 %v4954_v8  ;;  %v5024_v36 = vpack.c.bf16 %v264_v34, %v261_v33  ;;  %v267_v39 = vld [vmem:[%s8098_s4 + $0x98] sm:$0xff]  ;;  %v266_v43 = vld [vmem:[%s8098_s4 + $0x90] sm:$0xff]  ;;  %v269_v44 = vld [vmem:[%s8098_s4 + $0xa8] sm:$0xff] }
  0x2b   :  { %3566 = vmatpush1.bf16.msk.msra.mxu0 %vm4875_vm2, %v3564_v37  ;;  %v260_v37 = vld [vmem:[%s8098_s4 + $0x60] sm:$0xff]  ;;  %v273_v46 = vld [vmem:[%s8098_s4 + $0xc8] sm:$0xff]  ;;  %v5057_v49 = vpack.c.bf16 %v269_v44, %v266_v43  ;;  %v275_v54 = vld [vmem:[%s8098_s4 + $0xd8] sm:$0xff] }
  0x2c   :  { %3567 = vmatprep.subr.bf16.mxu0 %v8109_v45  ;;  %v276_v48 = vld [vmem:[%s8098_s4 + $0xe0] sm:$0xff]  ;;  %v282_v56 = vld [vmem:[%s8098_s4 + $0x110] sm:$0xff]  ;;  %v281_v61 = vld [vmem:[%s8098_s4 + $0x108] sm:$0xff] }
  0x2d   :  { %3689 = vmatpush3.bf16.msra.mxu1 %v4970_v16  ;;  %v5060_v51 = vpack.c.bf16 %v276_v48, %v273_v46  ;;  %v272_v52 = vld [vmem:[%s8098_s4 + $0xc0] sm:$0xff]  ;;  %v278_v60 = vld [vmem:[%s8098_s4 + $0xf0] sm:$0xff]  ;;  %v285_v63 = vld [vmem:[%s8098_s4 + $0x128] sm:$0xff] }
  0x2e   :  { %3314 = vmatmul.mubr.msk.f32.vlgmr.msra.gmra.mrb[0].mxu0 %vm93_vm3, %v4889_v41  ;;  %3691 = vmatprep.subr.bf16.mxu1 %v4973_v17  ;;  %v5075_v57 = vpack.c.bf16 %v275_v54, %v272_v52  ;;  %v288_v1 = vld [vmem:[%s8098_s4 + $0x140] sm:$0xff]  ;;  %v5093_v2 = vpack.c.bf16 %v281_v61, %v278_v60  ;;  %v287_v5 = vld [vmem:[%s8098_s4 + $0x138] sm:$0xff]  ;;  %v294_v9 = vld [vmem:[%s8098_s4 + $0x170] sm:$0xff] }
  0x2f   :  { %3569 = vmatpush3.bf16.msra.mxu0 %v3568_v42  ;;  %3480 = vmatprep.mubr.msk.f32.mxu0 %vm4793_vm4, %v8107_v0  ;;  %v5042_v42 = vpack.c.bf16 %v270_v40, %v267_v39  ;;  %v284_v4 = vld [vmem:[%s8098_s4 + $0x120] sm:$0xff]  ;;  %v291_v6 = vld [vmem:[%s8098_s4 + $0x158] sm:$0xff]  ;;  %v290_v12 = vld [vmem:[%s8098_s4 + $0x150] sm:$0xff] }
  0x30   :  { %3570 = vmatprep.subr.bf16.mxu0 %v8109_v45  ;;  %v5111_v10 = vpack.c.bf16 %v287_v5, %v284_v4  ;;  %v5114_v11 = vpack.c.bf16 %v294_v9, %v291_v6  ;;  %v297_v14 = vld [vmem:[%s8098_s4 + $0x188] sm:$0xff]  ;;  %v300_v15 = vld [vmem:[%s8098_s4 + $0x1a0] sm:$0xff]  ;;  %v299_v21 = vld [vmem:[%s8098_s4 + $0x198] sm:$0xff] }
  0x31   :  { %v5132_v19 = vpack.c.bf16 %v300_v15, %v297_v14  ;;  %v296_v20 = vld [vmem:[%s8098_s4 + $0x180] sm:$0xff]  ;;  %v303_v22 = vld [vmem:[%s8098_s4 + $0x1b8] sm:$0xff]  ;;  %v302_v27 = vld [vmem:[%s8098_s4 + $0x1b0] sm:$0xff] }
  0x32   :  { %v5147_v25 = vpack.c.bf16 %v299_v21, %v296_v20  ;;  %v305_v28 = vld [vmem:[%s8098_s4 + $0x1c8] sm:$0xff]  ;;  %v312_v32 = vld [vmem:[%s8098_s4 + $0x200] sm:$0xff]  ;;  %v315_v39 = vld [vmem:[%s8098_s4 + $0x218] sm:$0xff] }
  0x33   :  { %3572 = vmatpush3.bf16.msra.mxu0 %v3571_v55  ;;  %v279_v55 = vld [vmem:[%s8098_s4 + $0xf8] sm:$0xff]  ;;  %v309_v31 = vld [vmem:[%s8098_s4 + $0x1e8] sm:$0xff]  ;;  %v5165_v33 = vpack.c.bf16 %v305_v28, %v302_v27  ;;  %v318_v40 = vld [vmem:[%s8098_s4 + $0x230] sm:$0xff] }
  0x34   :  { %3573 = vmatprep.subr.bf16.mxu0 %v8109_v45  ;;  %v5078_v58 = vpack.c.bf16 %v282_v56, %v279_v55  ;;  %v5168_v34 = vpack.c.bf16 %v312_v32, %v309_v31  ;;  %v5186_v44 = vpack.c.bf16 %v318_v40, %v315_v39  ;;  %v314_v46 = vld [vmem:[%s8098_s4 + $0x210] sm:$0xff]  ;;  %v317_v48 = vld [vmem:[%s8098_s4 + $0x228] sm:$0xff]  ;;  %v324_v54 = vld [vmem:[%s8098_s4 + $0x260] sm:$0xff] }
  0x35   :  { %v321_v52 = vld [vmem:[%s8098_s4 + $0x248] sm:$0xff]  ;;  %v5201_v55 = vpack.c.bf16 %v317_v48, %v314_v46  ;;  %v320_v60 = vld [vmem:[%s8098_s4 + $0x240] sm:$0xff]  ;;  %v323_v61 = vld [vmem:[%s8098_s4 + $0x258] sm:$0xff] }
  0x36   :  { %v5204_v56 = vpack.c.bf16 %v324_v54, %v321_v52  ;;  %v277_v4 = vld [vmem:[%s8098_s4 + $0xe8] sm:$0xff]  ;;  %v327_v6 = vld [vmem:[%s8098_s4 + $0x278] sm:$0xff]  ;;  %v330_v9 = vld [vmem:[%s8098_s4 + $0x290] sm:$0xff] }
  0x37   :  { %3575 = vmatpush3.bf16.msra.mxu0 %v3574_v3  ;;  %v5096_v3 = vpack.c.bf16 %v288_v1, %v285_v63  ;;  %8200 = vst [vmem:[#allocation8_spill] sm:$0xff] %v5201_v55  ;;  %v274_v63 = vld [vmem:[%s8098_s4 + $0xd0] sm:$0xff]  ;;  %v5217_v1 = vpack.c.bf16 %v323_v61, %v320_v60  ;;  %v331_v14 = vld [vmem:[%s8098_s4 + $0x298] sm:$0xff]  ;;  %v329_v20 = vld [vmem:[%s8098_s4 + $0x288] sm:$0xff] }
  0x38   :  { %3576 = vmatprep.subr.bf16.mxu0 %v8109_v45  ;;  %8201 = vst [vmem:[#allocation9_spill] sm:$0xff] %v5204_v56  ;;  %v5222_v5 = vpack.c.bf16 %v277_v4, %v274_v63  ;;  %v326_v15 = vld [vmem:[%s8098_s4 + $0x270] sm:$0xff]  ;;  %v283_v27 = vld [vmem:[%s8098_s4 + $0x118] sm:$0xff]  ;;  %v333_v31 = vld [vmem:[%s8098_s4 + $0x2a8] sm:$0xff] }
  0x39   :  { %8202 = vst [vmem:[#allocation10_spill] sm:$0xff] %v5217_v1  ;;  %v336_v32 = vld [vmem:[%s8098_s4 + $0x2c0] sm:$0xff]  ;;  %v337_v39 = vld [vmem:[%s8098_s4 + $0x2c8] sm:$0xff]  ;;  %v335_v46 = vld [vmem:[%s8098_s4 + $0x2b8] sm:$0xff] }
  0x3a   :  { %3693 = vmatpush3.bf16.msra.mxu1 %v5222_v5  ;;  %v332_v40 = vld [vmem:[%s8098_s4 + $0x2a0] sm:$0xff]  ;;  %v286_v54 = vld [vmem:[%s8098_s4 + $0x130] sm:$0xff]  ;;  %v289_v60 = vld [vmem:[%s8098_s4 + $0x148] sm:$0xff] }
  0x3b   :  { %3578 = vmatpush3.bf16.msra.mxu0 %v3577_v13  ;;  %v293_v13 = vld [vmem:[%s8098_s4 + $0x168] sm:$0xff]  ;;  %v5284_v52 = vpack.c.bf16 %v335_v46, %v332_v40  ;;  %v5293_v61 = vpack.c.bf16 %v289_v60, %v286_v54  ;;  %v339_v63 = vld [vmem:[%s8098_s4 + $0x2d8] sm:$0xff]  ;;  %v342_v4 = vld [vmem:[%s8098_s4 + $0x2f0] sm:$0xff] }
  0x3c   :  { %3579 = vmatprep.subr.bf16.mxu0 %v8109_v45 }
  0x3d   :  { %8206 = vst [vmem:[#allocation14_spill] sm:$0xff] %v5284_v52 }
  0x3f   :  { %3581 = vmatpush3.bf16.msra.mxu0 %v3580_v18  ;;  %v5129_v18 = vpack.c.bf16 %v293_v13, %v290_v12  ;;  %v328_v12 = vld [vmem:[%s8098_s4 + $0x280] sm:$0xff]  ;;  %v5235_v13 = vpack.c.bf16 %v330_v9, %v327_v6  ;;  %v5307_v9 = vpack.c.bf16 %v342_v4, %v339_v63 }
  0x40   :  { %3582 = vmatprep.subr.bf16.mxu0 %v8109_v45  ;;  %v5246_v21 = vpack.c.bf16 %v331_v14, %v328_v12  ;;  %v340_v6 = vld [vmem:[%s8098_s4 + $0x2e0] sm:$0xff]  ;;  %v343_v12 = vld [vmem:[%s8098_s4 + $0x2f8] sm:$0xff]  ;;  %v338_v14 = vld [vmem:[%s8098_s4 + $0x2d0] sm:$0xff] }
  0x41   :  { %8203 = vst [vmem:[#allocation11_spill] sm:$0xff] %v5235_v13  ;;  %8207 = vst [vmem:[#allocation15_spill] sm:$0xff] %v5307_v9 }
  0x42   :  { %3695 = vmatprep.subr.bf16.mxu1 %v5246_v21 }
  0x43   :  { %3585 = vmatpush3.bf16.msk.msra.mxu0 %vm4875_vm2, %v3583_v23  ;;  %v306_v23 = vld [vmem:[%s8098_s4 + $0x1d0] sm:$0xff]  ;;  %vm2917_vm2 = vcmask 582656  }
  0x44   :  { %3587 = vmatprep.subr.bf16.mxu0 %v4985_v24  ;;  %v5150_v26 = vpack.c.bf16 %v306_v23, %v303_v22  ;;  %v5248_v22 = vpack.c.bf16 %v329_v20, %v326_v15  ;;  %v280_v23 = vld [vmem:[%s8098_s4 + $0x100] sm:$0xff]  ;;  %v341_v15 = vld [vmem:[%s8098_s4 + $0x2e8] sm:$0xff]  ;;  %v5318_v20 = vpack.c.bf16 %v343_v12, %v340_v6 }
  0x45   :  { %v5257_v28 = vpack.c.bf16 %v283_v27, %v280_v23  ;;  %v5320_v23 = vpack.c.bf16 %v341_v15, %v338_v14  ;;  %v292_v27 = vld [vmem:[%s8098_s4 + $0x160] sm:$0xff] }
  0x46   :  { %3481 = vmatmul.mubr.msk.f32.vlgmr.msra.gmra.mrb[2].mxu0 %vm93_vm3, %v4889_v41  ;;  %v5039_v41 = vpack.c.bf16 %v263_v38, %v260_v37  ;;  %v308_v37 = vld [vmem:[%s8098_s4 + $0x1e0] sm:$0xff]  ;;  %v311_v38 = vld [vmem:[%s8098_s4 + $0x1f8] sm:$0xff]  ;;  %8204 = vst [vmem:[#allocation12_spill] sm:$0xff] %v5248_v22  ;;  %vm2941_vm3 = vcmask 588800  }
  0x47   :  { %3589 = vmatpush1.bf16.msra.mxu0 %v5001_v29  ;;  %v5183_v43 = vpack.c.bf16 %v311_v38, %v308_v37  ;;  %v334_v37 = vld [vmem:[%s8098_s4 + $0x2b0] sm:$0xff]  ;;  %3697 = vmatpush3.bf16.msra.mxu1 %v5257_v28  ;;  %v5271_v38 = vpack.c.bf16 %v336_v32, %v333_v31  ;;  %8208 = vst [vmem:[#allocation16_spill] sm:$0xff] %v5320_v23  ;;  %v295_v31 = vld [vmem:[%s8098_s4 + $0x178] sm:$0xff] }
  0x48   :  { %3591 = vmatprep.subr.bf16.mxu0 %v5004_v30  ;;  %v5282_v48 = vpack.c.bf16 %v337_v39, %v334_v37  ;;  %v5329_v32 = vpack.c.bf16 %v295_v31, %v292_v27  ;;  %v345_v37 = vld [vmem:[%s8098_s4 + $0x308] sm:$0xff]  ;;  %v348_v39 = vld [vmem:[%s8098_s4 + $0x320] sm:$0xff] }
  0x49   :  { %8205 = vst [vmem:[#allocation13_spill] sm:$0xff] %v5271_v38  ;;  %v5340_v40 = vpack.c.bf16 %v348_v39, %v345_v37  ;;  %v344_v39 = vld [vmem:[%s8098_s4 + $0x300] sm:$0xff] }
  0x4a   :  { %3699 = vmatprep.subr.bf16.mxu1 %v5282_v48 }
  0x4b   :  { %3593 = vmatpush1.bf16.msra.mxu0 %v5021_v35  ;;  %3701 = vmatpush3.bf16.msra.mxu1 %v5293_v61  ;;  %8209 = vst [vmem:[#allocation17_spill] sm:$0xff] %v5340_v40 }
  0x4c   :  { %3595 = vmatprep.subr.bf16.mxu0 %v5024_v36  ;;  %3703 = vmatprep.subr.bf16.mxu1 %v5318_v20 }
  0x4f   :  { %3597 = vmatpush1.bf16.msra.mxu0 %v5039_v41  ;;  %3705 = vmatpush3.bf16.msra.mxu1 %v5329_v32 }
  0x50   :  { %3599 = vmatprep.subr.bf16.mxu0 %v5042_v42  ;;  %3706 = vmatprep.subr.bf16.mxu1 %v8109_v45  ;;  %v347_v45 = vld [vmem:[%s8098_s4 + $0x318] sm:$0xff] }
  0x53   :  { %3601 = vmatpush1.bf16.msra.mxu0 %v5057_v49 }
  0x54   :  { %3603 = vmatprep.subr.bf16.mxu0 %v5060_v51 }
  0x57   :  { %3605 = vmatpush1.bf16.msra.mxu0 %v5075_v57 }
  0x58   :  { %3607 = vmatprep.subr.bf16.mxu0 %v5078_v58 }
  0x5b   :  { %3609 = vmatpush1.bf16.msra.mxu0 %v5093_v2 }
  0x5c   :  { %3611 = vmatprep.subr.bf16.mxu0 %v5096_v3 }
  0x5f   :  { %3613 = vmatpush1.bf16.msra.mxu0 %v5111_v10 }
  0x60   :  { %3615 = vmatprep.subr.bf16.mxu0 %v5114_v11 }
  0x63   :  { %3617 = vmatpush1.bf16.msra.mxu0 %v5129_v18 }
  0x64   :  { %3619 = vmatprep.subr.bf16.mxu0 %v5132_v19 }
  0x67   :  { %3621 = vmatpush1.bf16.msra.mxu0 %v5147_v25 }
  0x68   :  { %3623 = vmatprep.subr.bf16.mxu0 %v5150_v26 }
  0x6b   :  { %3625 = vmatpush1.bf16.msra.mxu0 %v5165_v33 }
  0x6c   :  { %3627 = vmatprep.subr.bf16.mxu0 %v5168_v34 }
  0x6f   :  { %3629 = vmatpush1.bf16.msra.mxu0 %v5183_v43 }
  0x70   :  { %3631 = vmatprep.subr.bf16.mxu0 %v5186_v44 }
  0x73   :  { %3633 = vmatpush1.bf16.msra.mxu0 %v5201_v55 }
  0x74   :  { %3635 = vmatprep.subr.bf16.mxu0 %v5204_v56 }
  0x77   :  { %3637 = vmatpush1.bf16.msra.mxu0 %v5217_v1 }
  0x78   :  { %3639 = vmatprep.subr.bf16.mxu0 %v5235_v13  ;;  %v368_v13 = vld [vmem:[%s8098_s4 + $0x3c0] sm:$0xff] }
  0x7b   :  { %3641 = vmatpush1.bf16.msra.mxu0 %v5248_v22 }
  0x7c   :  { %3643 = vmatprep.subr.bf16.mxu0 %v5271_v38  ;;  %v352_v38 = vld [vmem:[%s8098_s4 + $0x340] sm:$0xff] }
  0x7f   :  { %3645 = vmatpush1.bf16.msra.mxu0 %v5284_v52  ;;  %v353_v52 = vld [vmem:[%s8098_s4 + $0x348] sm:$0xff] }
  0x80   :  { %3647 = vmatprep.subr.bf16.mxu0 %v5307_v9 }
  0x83   :  { %3649 = vmatpush1.bf16.msra.mxu0 %v5320_v23 }
  0x84   :  { %3651 = vmatprep.subr.bf16.mxu0 %v5340_v40  ;;  %v346_v40 = vld [vmem:[%s8098_s4 + $0x310] sm:$0xff] }
 0x101   :  { %v5344_v46 = vpop.f32.mrb[0].mxu0 }
 0x102   :  { %v383_v54 = vsel %vm97_vm0, %v5344_v46, 0.0  ;;  %v5348_v60 = vpop.f32.mrb[1].mxu0 }
 0x103   :  { %8210 = vst [vmem:[#allocation18_spill] sm:$0xff] %v5348_v60  ;;  %v384_v63 = vrot.slane %v383_v54, 4  ;;  %v390_v4 = vsel %vm97_vm0, %v5348_v60, 0.0 }
 0x104   :  { %v391_v6 = vrot.slane %v390_v4, 4 }
 0x105   :  { %v385_v12 = vadd.f32 %v384_v63, %v383_v54  ;;  %v349_v54 = vld [vmem:[%s8098_s4 + $0x328] sm:$0xff] }
 0x106   :  { %v392_v14 = vadd.f32 %v391_v6, %v390_v4  ;;  %v351_v4 = vld [vmem:[%s8098_s4 + $0x338] sm:$0xff]  ;;  %v354_v6 = vld [vmem:[%s8098_s4 + $0x350] sm:$0xff] }
 0x107   :  { %v386_v15 = vrot.slane %v385_v12, 2  ;;  %v5377_v9 = vpack.c.bf16 %v354_v6, %v351_v4 }
 0x108   :  { %v393_v27 = vrot.slane %v392_v14, 2 }
 0x109   :  { %v387_v31 = vadd.f32 %v386_v15, %v385_v12  ;;  %v5372_v15 = vpack.c.bf16 %v349_v54, %v346_v40  ;;  %8212 = vst [vmem:[#allocation20_spill] sm:$0xff] %v5377_v9  ;;  %v406_v40 = vmul.f32 %v5348_v60, %v5348_v60  ;;  %v356_v54 = vld [vmem:[%s8098_s4 + $0x360] sm:$0xff] }
 0x10a   :  { %v394_v37 = vadd.f32 %v393_v27, %v392_v14  ;;  %v5370_v14 = vpack.c.bf16 %v347_v45, %v344_v39  ;;  %v350_v27 = vld [vmem:[%s8098_s4 + $0x330] sm:$0xff]  ;;  %v355_v45 = vld [vmem:[%s8098_s4 + $0x358] sm:$0xff] }
 0x10b   :  { %v388_v0 = vrot.slane %v387_v31, 1  ;;  %v5400_v39 = vpack.c.bf16 %v355_v45, %v352_v38  ;;  %v361_v38 = vld [vmem:[%s8098_s4 + $0x388] sm:$0xff]  ;;  %v415_v6 = vsel %vm97_vm0, %v406_v40, 0.0  ;;  %v8216_v45 = vmov 0.0  }
 0x10c   :  { %v395_v63 = vrot.slane %v394_v37, 1  ;;  %8211 = vst [vmem:[#allocation19_spill] sm:$0xff] %v5370_v14  ;;  %v416_v60 = vrot.slane %v415_v6, 4 }
 0x10d   :  { %v389_v23 = vadd.f32 %v388_v0, %v387_v31  ;;  %v357_v0 = vld [vmem:[%s8098_s4 + $0x368] sm:$0xff]  ;;  %v360_v31 = vld [vmem:[%s8098_s4 + $0x380] sm:$0xff] }
 0x10e   :  { %v396_v12 = vadd.f32 %v395_v63, %v394_v37  ;;  %v5398_v37 = vpack.c.bf16 %v353_v52, %v350_v27  ;;  %v8214_v63 = vmov 0.0|0.0   ;;  %v5407_v4 = vpack.c.bf16 %v360_v31, %v357_v0  ;;  %v358_v52 = vld [vmem:[%s8098_s4 + $0x370] sm:$0xff] }
 0x10f   :  { %v366_v27 = vld [vmem:[%s8098_s4 + $0x3b0] sm:$0xff]  ;;  %v5432_v40 = vpack.c.bf16 %v361_v38, %v358_v52  ;;  %v369_v52 = vld [vmem:[%s8098_s4 + $0x3c8] sm:$0xff]  ;;  %v372_v38 = vld [vmem:[%s8098_s4 + $0x3e0] sm:$0xff]  ;;  %v417_v1 = vadd.f32 %v416_v60, %v415_v6 }
 0x110   :  { %497 = vmatprep.mubr.f32.mxu0 %v396_v12  ;;  %639 = vmatprep.mubr.f32.mxu1 %v396_v12  ;;  %8213 = vst [vmem:[#allocation21_spill] sm:$0xff] %v5398_v37  ;;  %8215 = vst [vmem:[#allocation22_spill] sm:$0xff] %v5407_v4  ;;  %v363_v12 = vld [vmem:[%s8098_s4 + $0x398] sm:$0xff]  ;;  %v362_v31 = vld [vmem:[%s8098_s4 + $0x390] sm:$0xff]  ;;  %v5471_v55 = vpack.c.bf16 %v372_v38, %v369_v52 }
 0x111   :  { %498 = vmatmul.mubr.f32.vlgmr.msra.gmra.mrb[4].mxu0 %v389_v23  ;;  %640 = vmatmul.mubr.f32.vlgmr.msra.gmra.mrb[0].mxu1 %v389_v23  ;;  %v359_v23 = vld [vmem:[%s8098_s4 + $0x378] sm:$0xff]  ;;  %v378_v6 = vld [vmem:[%s8098_s4 + $0x410] sm:$0xff] }
 0x112   :  { %3653 = vmatpush1.bf16.msra.mxu0 %v5370_v14  ;;  %3708 = vmatpush3.bf16.msra.mxu1 %v5372_v15  ;;  %v5430_v0 = vpack.c.bf16 %v359_v23, %v356_v54  ;;  %v364_v54 = vld [vmem:[%s8098_s4 + $0x3a0] sm:$0xff]  ;;  %v367_v23 = vld [vmem:[%s8098_s4 + $0x3b8] sm:$0xff]  ;;  %8220 = vst [vmem:[#allocation26_spill] sm:$0xff] %v5471_v55  ;;  %v374_v38 = vld [vmem:[%s8098_s4 + $0x3f0] sm:$0xff] }
 0x113   :  { %3655 = vmatprep.subr.bf16.mxu0 %v5377_v9  ;;  %3709 = vmatprep.subr.bf16.mxu1 %v8214_v63  ;;  %v5439_v9 = vpack.c.bf16 %v366_v27, %v363_v12  ;;  %v5464_v22 = vpack.c.bf16 %v367_v23, %v364_v54  ;;  %v375_v60 = vld [vmem:[%s8098_s4 + $0x3f8] sm:$0xff] }
 0x114   :  { %568 = vmatprep.mubr.f32.mxu0 %v8216_v45  ;;  %3509 = vmatprep.mubr.msk.f32.mxu1 %vm4793_vm4, %v8216_v45  ;;  %8217 = vst [vmem:[#allocation23_spill] sm:$0xff] %v5430_v0 }
 0x115   :  { %8218 = vst [vmem:[#allocation24_spill] sm:$0xff] %v5439_v9 }
 0x116   :  { %3657 = vmatpush1.bf16.msra.mxu0 %v5398_v37  ;;  %3711 = vmatpush3.bf16.msra.mxu1 %v5400_v39  ;;  %v365_v37 = vld [vmem:[%s8098_s4 + $0x3a8] sm:$0xff] }
 0x117   :  { %3659 = vmatprep.subr.bf16.mxu0 %v5407_v4  ;;  %3712 = vmatprep.subr.bf16.mxu1 %v8214_v63  ;;  %v5462_v14 = vpack.c.bf16 %v365_v37, %v362_v31  ;;  %v370_v37 = vld [vmem:[%s8098_s4 + $0x3d0] sm:$0xff]  ;;  %v373_v31 = vld [vmem:[%s8098_s4 + $0x3e8] sm:$0xff] }
 0x118   :  { %v5492_v52 = vpack.c.bf16 %v373_v31, %v370_v37 }
 0x119   :  { %v5456_v12 = vpop.f32.mrb[2].mxu0  ;;  %8219 = vst [vmem:[#allocation25_spill] sm:$0xff] %v5462_v14 }
 0x11a   :  { %v398_v27 = vsel %vm397_vm5, %v5456_v12, 0.0  ;;  %3661 = vmatpush1.bf16.msra.mxu0 %v5430_v0  ;;  %3714 = vmatpush3.bf16.msra.mxu1 %v5432_v40  ;;  %v3482_v4 = vpop.f32.mrb[3].mxu0  ;;  %v5499_v0 = vpack.c.bf16 %v378_v6, %v375_v60 }
 0x11b   :  { %v399_v56 = vrot.slane %v398_v27, 4  ;;  %3663 = vmatprep.subr.bf16.mxu0 %v5439_v9  ;;  %3715 = vmatprep.subr.bf16.mxu1 %v8214_v63  ;;  %v371_v4 = vld [vmem:[%s8098_s4 + $0x3d8] sm:$0xff] }
 0x11c   :  { %v5490_v23 = vpack.c.bf16 %v371_v4, %v368_v13  ;;  %v376_v13 = vld [vmem:[%s8098_s4 + $0x400] sm:$0xff]  ;;  %v418_v4 = vrot.slane %v417_v1, 2 }
 0x11d   :  { %v400_v54 = vadd.f32 %v399_v56, %v398_v27  ;;  %v377_v56 = vld [vmem:[%s8098_s4 + $0x408] sm:$0xff]  ;;  %v379_v27 = vld [vmem:[%s8098_s4 + $0x418] sm:$0xff] }
 0x11e   :  { %3665 = vmatpush1.bf16.msra.mxu0 %v5462_v14  ;;  %3717 = vmatpush3.bf16.msra.mxu1 %v5464_v22  ;;  %v5512_v31 = vpack.c.bf16 %v377_v56, %v374_v38  ;;  %v5514_v60 = vpack.c.bf16 %v379_v27, %v376_v13  ;;  %v419_v6 = vadd.f32 %v418_v4, %v417_v1  ;;  %v5535_v1 = vld [vmem:[%s8098_s4 + $0x430] sm:$0xff]  ;;  %v1136_v13 = vld [vmem:[%s8096_s2 + $0x58] sm:$0xff] }
 0x11f   :  { %v401_v9 = vrot.slane %v400_v54, 2  ;;  %3667 = vmatprep.subr.bf16.mxu0 %v5471_v55  ;;  %3718 = vmatprep.subr.bf16.mxu1 %v8214_v63  ;;  %v5521_v55 = vld [vmem:[%s8098_s4 + $0x428] sm:$0xff]  ;;  %v1140_v4 = vld [vmem:[%s8096_s2 + $0x78] sm:$0xff] }
 0x121   :  { %v402_v37 = vadd.f32 %v401_v9, %v400_v54  ;;  %v5530_v9 = vld [vmem:[%s8098_s4 + $0x420] sm:$0xff]  ;;  %v420_v54 = vrot.slane %v419_v6, 1 }
 0x122   :  { %3669 = vmatpush1.bf16.msra.mxu0 %v5490_v23  ;;  %3720 = vmatpush3.bf16.msra.mxu1 %v5492_v52 }
 0x123   :  { %3671 = vmatprep.subr.bf16.mxu0 %v5499_v0  ;;  %3721 = vmatprep.subr.bf16.mxu1 %v8214_v63  ;;  %v403_v14 = vrot.slane %v402_v37, 1  ;;  %v421_v56 = vadd.f32 %v420_v54, %v419_v6 }
 0x125   :  { %v404_v38 = vadd.f32 %v403_v14, %v402_v37  ;;  %v405_v14 = vmul.f32 %v5344_v46, %v5344_v46  ;;  %v1133_v37 = vld [vmem:[%s8096_s2 + $0x40] sm:$0xff] }
 0x126   :  { %3673 = vmatpush1.bf16.msra.mxu0 %v5512_v31  ;;  %3723 = vmatpush3.bf16.msra.mxu1 %v5514_v60 }
 0x127   :  { %528 = vmatprep.subr.mxu0 %v5521_v55  ;;  %3507 = vmatprep.subr.mxu1 %v8216_v45 }
 0x12a   :  { %529 = vmatpush1.msra.mxu0 %v5530_v9  ;;  %3508 = vmatpush3.msra.mxu1 %v5535_v1 }
 0x12b   :  { %3317 = vmatmul.mubr.msk.f32.vlgmr.msra.gmra.mrb[4].mxu0 %vm429_vm6, %v404_v38  ;;  %3510 = vmatmul.mubr.msk.f32.vlgmr.msra.gmra.mrb[2].mxu1 %vm429_vm6, %v404_v38  ;;  %v1142_v38 = vld [vmem:[%s8096_s2 + $0x88] sm:$0xff] }
 0x12c   :  { %3725 = vmatprep.subr.bf16.mxu1 %v4985_v24  ;;  %3813 = vmatprep.subr.bf16.mxu0 %v4895_v47  ;;  %v408_v47 = vsel %vm97_vm0, %v405_v14, 0.0  ;;  %v1144_v14 = vld [vmem:[%s8096_s2 + $0x98] sm:$0xff] }
 0x12d   :  { %3727 = vmatpush1.bf16.msra.mxu1 %v5001_v29  ;;  %785 = vmatprep.mubr.f32.mxu1 %v421_v56 }
 0x12e   :  { %3815 = vmatpush3.bf16.msra.mxu0 %v4903_v50  ;;  %927 = vmatprep.mubr.f32.mxu0 %v421_v56  ;;  %v409_v50 = vrot.slane %v408_v47, 4  ;;  %v1146_v56 = vld [vmem:[%s8096_s2 + $0xa8] sm:$0xff] }
 0x12f   :  { %3729 = vmatprep.subr.bf16.mxu1 %v5004_v30  ;;  %3817 = vmatprep.subr.bf16.mxu0 %v4914_v53 }
 0x130   :  { %v410_v53 = vadd.f32 %v409_v50, %v408_v47  ;;  %v3870_v47 = vpack.c.bf16 %v1146_v56, %v1142_v38  ;;  %v1148_v50 = vld [vmem:[%s8096_s2 + $0xb8] sm:$0xff]  ;;  %v1182_v38 = vld [vmem:[%s8096_s2 + $0x1c8] sm:$0xff] }
 0x131   :  { %3731 = vmatpush1.bf16.msra.mxu1 %v5021_v35  ;;  %v8221_v35 = vld [vmem:[#allocation8_spill] sm:$0xff]  ;;  %v1186_v56 = vld [vmem:[%s8096_s2 + $0x1e8] sm:$0xff] }
 0x132   :  { %3819 = vmatpush3.bf16.msra.mxu0 %v4926_v59  ;;  %3733 = vmatprep.subr.bf16.mxu1 %v5024_v36  ;;  %v411_v59 = vrot.slane %v410_v53, 2  ;;  %v8222_v36 = vld [vmem:[#allocation9_spill] sm:$0xff] }
 0x133   :  { %3821 = vmatprep.subr.bf16.mxu0 %v4935_v62 }
 0x134   :  { %v412_v62 = vadd.f32 %v411_v59, %v410_v53  ;;  %v1141_v53 = vld [vmem:[%s8096_s2 + $0x80] sm:$0xff] }
 0x135   :  { %3735 = vmatpush1.bf16.msra.mxu1 %v5039_v41  ;;  %v1145_v59 = vld [vmem:[%s8096_s2 + $0xa0] sm:$0xff] }
 0x136   :  { %3823 = vmatpush3.bf16.msra.mxu0 %v4951_v7  ;;  %3737 = vmatprep.subr.bf16.mxu1 %v5042_v42  ;;  %v413_v7 = vrot.slane %v412_v62, 1  ;;  %v8223_v42 = vld [vmem:[#allocation10_spill] sm:$0xff] }
 0x137   :  { %3825 = vmatprep.subr.bf16.mxu0 %v4954_v8  ;;  %v407_v8 = vmul.f32 %v5456_v12, %v5456_v12 }
 0x139   :  { %3739 = vmatpush1.bf16.msra.mxu1 %v5057_v49  ;;  %v8224_v49 = vld [vmem:[#allocation11_spill] sm:$0xff] }
 0x13a   :  { %3827 = vmatpush3.bf16.msra.mxu0 %v4970_v16  ;;  %3741 = vmatprep.subr.bf16.mxu1 %v5060_v51  ;;  %v414_v16 = vadd.f32 %v413_v7, %v412_v62  ;;  %v3958_v62 = vpack.c.bf16 %v1148_v50, %v1144_v14  ;;  %v3872_v7 = vpack.c.bf16 %v1145_v59, %v1141_v53  ;;  %v1184_v14 = vld [vmem:[%s8096_s2 + $0x1d8] sm:$0xff]  ;;  %v1181_v53 = vld [vmem:[%s8096_s2 + $0x1c0] sm:$0xff] }
 0x13b   :  { %3829 = vmatprep.subr.bf16.mxu0 %v4973_v17  ;;  %v422_v17 = vsel %vm397_vm5, %v407_v8, 0.0  ;;  %v1143_v8 = vld [vmem:[%s8096_s2 + $0x90] sm:$0xff]  ;;  %v1188_v50 = vld [vmem:[%s8096_s2 + $0x1f8] sm:$0xff]  ;;  %v1185_v59 = vld [vmem:[%s8096_s2 + $0x1e0] sm:$0xff] }
 0x13c   :  { %v423_v24 = vrot.slane %v422_v17, 4 }
 0x13d   :  { %3743 = vmatpush1.bf16.msra.mxu1 %v5075_v57  ;;  %v8225_v57 = vld [vmem:[#allocation12_spill] sm:$0xff] }
 0x13e   :  { %3831 = vmatpush3.bf16.msra.mxu0 %v5222_v5  ;;  %3745 = vmatprep.subr.bf16.mxu1 %v5078_v58  ;;  %v424_v29 = vadd.f32 %v423_v24, %v422_v17  ;;  %v8226_v58 = vld [vmem:[#allocation13_spill] sm:$0xff]  ;;  %v8238_v5 = vld [vmem:[#allocation26_spill] sm:$0xff] }
 0x13f   :  { %3833 = vmatprep.subr.bf16.mxu0 %v5246_v21  ;;  %v1126_v21 = vld [vmem:[%s8096_s2 + $0x8] sm:$0xff] }
 0x140   :  { %v425_v30 = vrot.slane %v424_v29, 2  ;;  %v1150_v24 = vld [vmem:[%s8096_s2 + $0xc8] sm:$0xff] }
 0x141   :  { %3747 = vmatpush1.bf16.msra.mxu1 %v5093_v2 }
 0x142   :  { %3835 = vmatpush3.bf16.msra.mxu0 %v5257_v28  ;;  %3749 = vmatprep.subr.bf16.mxu1 %v5096_v3  ;;  %v426_v41 = vadd.f32 %v425_v30, %v424_v29  ;;  %v8227_v3 = vld [vmem:[#allocation14_spill] sm:$0xff]  ;;  %v1128_v28 = vld [vmem:[%s8096_s2 + $0x18] sm:$0xff] }
 0x143   :  { %3837 = vmatprep.subr.bf16.mxu0 %v5282_v48  ;;  %v1154_v29 = vld [vmem:[%s8096_s2 + $0xe8] sm:$0xff]  ;;  %v1152_v30 = vld [vmem:[%s8096_s2 + $0xd8] sm:$0xff] }
 0x144   :  { %v427_v51 = vrot.slane %v426_v41, 1 }
 0x145   :  { %3751 = vmatpush1.bf16.msra.mxu1 %v5111_v10  ;;  %v8228_v10 = vld [vmem:[#allocation15_spill] sm:$0xff] }
 0x146   :  { %3839 = vmatpush3.bf16.msra.mxu0 %v5293_v61  ;;  %3753 = vmatprep.subr.bf16.mxu1 %v5114_v11  ;;  %v428_v2 = vadd.f32 %v427_v51, %v426_v41  ;;  %v8229_v11 = vld [vmem:[#allocation16_spill] sm:$0xff] }
 0x147   :  { %3841 = vmatprep.subr.bf16.mxu0 %v5318_v20  ;;  %v1125_v61 = vld [vmem:[%s8096_s2] sm:$0xff] }
 0x148   :  { %v1129_v20 = vld [vmem:[%s8096_s2 + $0x20] sm:$0xff] }
 0x149   :  { %3755 = vmatpush1.bf16.msra.mxu1 %v5129_v18  ;;  %v8230_v18 = vld [vmem:[#allocation17_spill] sm:$0xff] }
 0x14a   :  { %3843 = vmatpush3.bf16.msra.mxu0 %v5329_v32  ;;  %3757 = vmatprep.subr.bf16.mxu1 %v5132_v19  ;;  %v8231_v19 = vld [vmem:[#allocation19_spill] sm:$0xff]  ;;  %v1149_v41 = vld [vmem:[%s8096_s2 + $0xc0] sm:$0xff] }
 0x14b   :  { %3844 = vmatprep.subr.bf16.mxu0 %v8214_v63 }
 0x14d   :  { %928 = vmatmul.mubr.f32.vlgmr.msra.gmra.mrb[6].mxu0 %v414_v16  ;;  %3759 = vmatpush1.bf16.msra.mxu1 %v5147_v25  ;;  %v8232_v25 = vld [vmem:[#allocation20_spill] sm:$0xff] }
 0x14e   :  { %3846 = vmatpush3.bf16.msra.mxu0 %v5372_v15  ;;  %3761 = vmatprep.subr.bf16.mxu1 %v5150_v26  ;;  %v8233_v26 = vld [vmem:[#allocation21_spill] sm:$0xff]  ;;  %v3864_v15 = vpack.c.bf16 %v1129_v20, %v1125_v61 }
 0x14f   :  { %3847 = vmatprep.subr.bf16.mxu0 %v8214_v63  ;;  %3538 = vmatprep.mubr.msk.f32.mxu0 %vm4793_vm4, %v8216_v45  ;;  %v1165_v20 = vld [vmem:[%s8096_s2 + $0x140] sm:$0xff] }
 0x151   :  { %3763 = vmatpush1.bf16.msra.mxu1 %v5165_v33  ;;  %v8234_v33 = vld [vmem:[#allocation22_spill] sm:$0xff] }
 0x152   :  { %3849 = vmatpush3.bf16.msra.mxu0 %v5400_v39  ;;  %3765 = vmatprep.subr.bf16.mxu1 %v5168_v34  ;;  %v8235_v34 = vld [vmem:[#allocation23_spill] sm:$0xff] }
 0x153   :  { %3850 = vmatprep.subr.bf16.mxu0 %v8214_v63  ;;  %v1127_v39 = vld [vmem:[%s8096_s2 + $0x10] sm:$0xff] }
 0x155   :  { %3767 = vmatpush1.bf16.msra.mxu1 %v5183_v43  ;;  %v8236_v43 = vld [vmem:[#allocation24_spill] sm:$0xff] }
 0x156   :  { %3852 = vmatpush3.bf16.msra.mxu0 %v5432_v40  ;;  %3769 = vmatprep.subr.bf16.mxu1 %v5186_v44  ;;  %v8237_v44 = vld [vmem:[#allocation25_spill] sm:$0xff] }
 0x157   :  { %3853 = vmatprep.subr.bf16.mxu0 %v8214_v63 }
 0x159   :  { %3771 = vmatpush1.bf16.msra.mxu1 %v8221_v35  ;;  %v3874_v35 = vpack.c.bf16 %v1154_v29, %v1150_v24  ;;  %v1190_v24 = vld [vmem:[%s8096_s2 + $0x208] sm:$0xff] }
 0x15a   :  { %3855 = vmatpush3.bf16.msra.mxu0 %v5464_v22  ;;  %3773 = vmatprep.subr.bf16.mxu1 %v8222_v36  ;;  %v1130_v22 = vld [vmem:[%s8096_s2 + $0x28] sm:$0xff]  ;;  %v1156_v36 = vld [vmem:[%s8096_s2 + $0xf8] sm:$0xff] }
 0x15b   :  { %3856 = vmatprep.subr.bf16.mxu0 %v8214_v63  ;;  %v3862_v48 = vpack.c.bf16 %v1130_v22, %v1126_v21  ;;  %v1170_v22 = vld [vmem:[%s8096_s2 + $0x168] sm:$0xff] }
 0x15c   :  { %v1194_v29 = vld [vmem:[%s8096_s2 + $0x228] sm:$0xff] }
 0x15d   :  { %3775 = vmatpush1.bf16.msra.mxu1 %v8223_v42  ;;  %v1153_v42 = vld [vmem:[%s8096_s2 + $0xe0] sm:$0xff] }
 0x15e   :  { %3858 = vmatpush3.bf16.msra.mxu0 %v5492_v52  ;;  %3777 = vmatprep.subr.bf16.mxu1 %v8224_v49  ;;  %v1138_v52 = vld [vmem:[%s8096_s2 + $0x68] sm:$0xff]  ;;  %v3962_v49 = vpack.c.bf16 %v1156_v36, %v1152_v30  ;;  %v3876_v51 = vpack.c.bf16 %v1153_v42, %v1149_v41  ;;  %v1192_v30 = vld [vmem:[%s8096_s2 + $0x218] sm:$0xff]  ;;  %v1189_v41 = vld [vmem:[%s8096_s2 + $0x200] sm:$0xff] }
 0x15f   :  { %3859 = vmatprep.subr.bf16.mxu0 %v8214_v63  ;;  %v1196_v36 = vld [vmem:[%s8096_s2 + $0x238] sm:$0xff]  ;;  %v1193_v42 = vld [vmem:[%s8096_s2 + $0x220] sm:$0xff] }
 0x160   :  { %v1700_v63 = vld [vmem:[%s8099_s5 + $0x360] sm:$0xff] }
 0x161   :  { %3779 = vmatpush1.bf16.msra.mxu1 %v8225_v57  ;;  %v1151_v57 = vld [vmem:[%s8096_s2 + $0xd0] sm:$0xff] }
 0x162   :  { %3861 = vmatpush3.bf16.msra.mxu0 %v5514_v60  ;;  %3781 = vmatprep.subr.bf16.mxu1 %v8226_v58  ;;  %v3954_v60 = vpack.c.bf16 %v1140_v4, %v1136_v13  ;;  %v1155_v58 = vld [vmem:[%s8096_s2 + $0xf0] sm:$0xff]  ;;  %v1176_v13 = vld [vmem:[%s8096_s2 + $0x198] sm:$0xff] }
 0x163   :  { %3536 = vmatprep.subr.mxu0 %v8216_v45  ;;  %v1180_v4 = vld [vmem:[%s8096_s2 + $0x1b8] sm:$0xff] }
 0x165   :  { %3783 = vmatpush1.bf16.msra.mxu1 %v8227_v3  ;;  %v1158_v3 = vld [vmem:[%s8096_s2 + $0x108] sm:$0xff] }
 0x166   :  { %3537 = vmatpush3.msra.mxu0 %v5535_v1  ;;  %3785 = vmatprep.subr.bf16.mxu1 %v8228_v10  ;;  %v1139_v1 = vld [vmem:[%s8096_s2 + $0x70] sm:$0xff]  ;;  %v1162_v10 = vld [vmem:[%s8096_s2 + $0x128] sm:$0xff] }
 0x167   :  { %3539 = vmatmul.mubr.msk.f32.vlgmr.msra.gmra.mrb[8].mxu0 %vm429_vm6, %v428_v2  ;;  %3863 = vmatprep.subr.bf16.mxu0 %v3862_v48  ;;  %v1172_v48 = vld [vmem:[%s8096_s2 + $0x178] sm:$0xff] }
 0x168   :  { %3865 = vmatpush1.bf16.msra.mxu0 %v3864_v15  ;;  %v1167_v15 = vld [vmem:[%s8096_s2 + $0x150] sm:$0xff] }
 0x169   :  { %3787 = vmatpush1.bf16.msra.mxu1 %v8229_v11  ;;  %v1160_v11 = vld [vmem:[%s8096_s2 + $0x118] sm:$0xff] }
 0x16a   :  { %3789 = vmatprep.subr.bf16.mxu1 %v8230_v18  ;;  %v3878_v18 = vpack.c.bf16 %v1162_v10, %v1158_v3  ;;  %v1198_v3 = vld [vmem:[%s8096_s2 + $0x248] sm:$0xff] }
 0x16b   :  { %v1202_v10 = vld [vmem:[%s8096_s2 + $0x268] sm:$0xff] }
 0x16c   :  { %786 = vmatmul.mubr.f32.vlgmr.msra.gmra.mrb[4].mxu1 %v414_v16  ;;  %v1147_v16 = vld [vmem:[%s8096_s2 + $0xb0] sm:$0xff] }
 0x16d   :  { %3791 = vmatpush1.bf16.msra.mxu1 %v8231_v19  ;;  %856 = vmatprep.mubr.f32.mxu1 %v8216_v45  ;;  %v3960_v17 = vpack.c.bf16 %v1147_v16, %v1143_v8  ;;  %v1164_v19 = vld [vmem:[%s8096_s2 + $0x138] sm:$0xff]  ;;  %v1183_v8 = vld [vmem:[%s8096_s2 + $0x1d0] sm:$0xff] }
 0x16e   :  { %3793 = vmatprep.subr.bf16.mxu1 %v8232_v25  ;;  %v1157_v25 = vld [vmem:[%s8096_s2 + $0x100] sm:$0xff]  ;;  %v1187_v16 = vld [vmem:[%s8096_s2 + $0x1f0] sm:$0xff] }
 0x171   :  { %3795 = vmatpush1.bf16.msra.mxu1 %v8233_v26  ;;  %v1161_v26 = vld [vmem:[%s8096_s2 + $0x120] sm:$0xff] }
 0x172   :  { %3797 = vmatprep.subr.bf16.mxu1 %v8234_v33  ;;  %v3966_v33 = vpack.c.bf16 %v1164_v19, %v1160_v11  ;;  %v1200_v11 = vld [vmem:[%s8096_s2 + $0x258] sm:$0xff]  ;;  %v3898_v19 = vpack.c.bf16 %v1202_v10, %v1198_v3  ;;  %v1235_v10 = vld [vmem:[%s8096_s2 + $0x370] sm:$0xff] }
 0x175   :  { %3799 = vmatpush1.bf16.msra.mxu1 %v8235_v34  ;;  %v3880_v34 = vpack.c.bf16 %v1161_v26, %v1157_v25  ;;  %v1204_v25 = vld [vmem:[%s8096_s2 + $0x278] sm:$0xff]  ;;  %v1197_v26 = vld [vmem:[%s8096_s2 + $0x240] sm:$0xff] }
 0x176   :  { %3801 = vmatprep.subr.bf16.mxu1 %v8236_v43  ;;  %v1159_v43 = vld [vmem:[%s8096_s2 + $0x110] sm:$0xff] }
 0x179   :  { %3803 = vmatpush1.bf16.msra.mxu1 %v8237_v44  ;;  %v1163_v44 = vld [vmem:[%s8096_s2 + $0x130] sm:$0xff] }
 0x17a   :  { %3805 = vmatprep.subr.bf16.mxu1 %v8238_v5  ;;  %v1166_v5 = vld [vmem:[%s8096_s2 + $0x148] sm:$0xff]  ;;  %v3968_v21 = vpack.c.bf16 %v1163_v44, %v1159_v43  ;;  %v3986_v43 = vpack.c.bf16 %v1204_v25, %v1200_v11 }
 0x17b   :  { %v1238_v11 = vld [vmem:[%s8096_s2 + $0x388] sm:$0xff] }
 0x17d   :  { %3807 = vmatpush1.bf16.msra.mxu1 %v5490_v23  ;;  %v1134_v23 = vld [vmem:[%s8096_s2 + $0x48] sm:$0xff] }
 0x17e   :  { %3809 = vmatprep.subr.bf16.mxu1 %v5499_v0  ;;  %v1131_v0 = vld [vmem:[%s8096_s2 + $0x30] sm:$0xff]  ;;  %v3866_v27 = vpack.c.bf16 %v1138_v52, %v1134_v23  ;;  %v1174_v23 = vld [vmem:[%s8096_s2 + $0x188] sm:$0xff] }
 0x17f   :  { %v3952_v40 = vpack.c.bf16 %v1131_v0, %v1127_v39  ;;  %v1171_v0 = vld [vmem:[%s8096_s2 + $0x170] sm:$0xff]  ;;  %v1178_v52 = vld [vmem:[%s8096_s2 + $0x1a8] sm:$0xff] }
 0x180   :  { %3867 = vmatprep.subr.bf16.mxu0 %v3866_v27  ;;  %v3886_v27 = vpack.c.bf16 %v1178_v52, %v1174_v23  ;;  %v1207_v23 = vld [vmem:[%s8096_s2 + $0x290] sm:$0xff] }
 0x181   :  { %3811 = vmatpush1.bf16.msra.mxu1 %v5512_v31  ;;  %v1137_v31 = vld [vmem:[%s8096_s2 + $0x60] sm:$0xff]  ;;  %v1211_v52 = vld [vmem:[%s8096_s2 + $0x2b0] sm:$0xff] }
 0x182   :  { %816 = vmatprep.subr.mxu1 %v5521_v55  ;;  %v1132_v55 = vld [vmem:[%s8096_s2 + $0x38] sm:$0xff]  ;;  %v3868_v6 = vpack.c.bf16 %v1137_v31, %v1133_v37  ;;  %v1173_v37 = vld [vmem:[%s8096_s2 + $0x180] sm:$0xff] }
 0x183   :  { %v3950_v32 = vpack.c.bf16 %v1132_v55, %v1128_v28  ;;  %v1168_v28 = vld [vmem:[%s8096_s2 + $0x158] sm:$0xff]  ;;  %v3882_v55 = vpack.c.bf16 %v1170_v22, %v1166_v5  ;;  %v1177_v31 = vld [vmem:[%s8096_s2 + $0x1a0] sm:$0xff]  ;;  %v1199_v5 = vld [vmem:[%s8096_s2 + $0x250] sm:$0xff] }
 0x184   :  { %3869 = vmatpush1.bf16.msra.mxu0 %v3868_v6  ;;  %v3970_v61 = vpack.c.bf16 %v1172_v48, %v1168_v28  ;;  %v3888_v6 = vpack.c.bf16 %v1177_v31, %v1173_v37  ;;  %v1206_v48 = vld [vmem:[%s8096_s2 + $0x288] sm:$0xff]  ;;  %v1216_v37 = vld [vmem:[%s8096_s2 + $0x2d8] sm:$0xff] }
 0x185   :  { %817 = vmatpush1.msra.mxu1 %v5530_v9  ;;  %v1135_v9 = vld [vmem:[%s8096_s2 + $0x50] sm:$0xff]  ;;  %3871 = vmatprep.subr.bf16.mxu0 %v3870_v47  ;;  %v3890_v47 = vpack.c.bf16 %v1186_v56, %v1182_v38 }
 0x186   :  { %3319 = vmatmul.mubr.msk.f32.vlgmr.msra.gmra.mrb[4].mxu1 %vm429_vm6, %v428_v2  ;;  %3951 = vmatprep.subr.bf16.mxu1 %v3950_v32  ;;  %v3956_v54 = vpack.c.bf16 %v1139_v1, %v1135_v9  ;;  %v3964_v2 = vpack.c.bf16 %v1155_v58, %v1151_v57  ;;  %v1169_v32 = vld [vmem:[%s8096_s2 + $0x160] sm:$0xff]  ;;  %v1175_v9 = vld [vmem:[%s8096_s2 + $0x190] sm:$0xff] }
 0x187   :  { %3953 = vmatpush1.bf16.msra.mxu1 %v3952_v40  ;;  %v3884_v39 = vpack.c.bf16 %v1169_v32, %v1165_v20  ;;  %v3972_v40 = vpack.c.bf16 %v1171_v0, %v1167_v15  ;;  %v1179_v1 = vld [vmem:[%s8096_s2 + $0x1b0] sm:$0xff]  ;;  %v1212_v32 = vld [vmem:[%s8096_s2 + $0x2b8] sm:$0xff]  ;;  %v1205_v15 = vld [vmem:[%s8096_s2 + $0x280] sm:$0xff] }
 0x188   :  { %3955 = vmatprep.subr.bf16.mxu1 %v3954_v60  ;;  %3873 = vmatpush1.bf16.msra.mxu0 %v3872_v7  ;;  %v3974_v60 = vpack.c.bf16 %v1180_v4, %v1176_v13  ;;  %v3892_v7 = vpack.c.bf16 %v1185_v59, %v1181_v53  ;;  %v1191_v57 = vld [vmem:[%s8096_s2 + $0x210] sm:$0xff]  ;;  %v3992_v13 = vpack.c.bf16 %v1211_v52, %v1207_v23  ;;  %v1218_v4 = vld [vmem:[%s8096_s2 + $0x2e8] sm:$0xff]  ;;  %v1224_v53 = vld [vmem:[%s8096_s2 + $0x318] sm:$0xff] }
 0x189   :  { %3875 = vmatprep.subr.bf16.mxu0 %v3874_v35  ;;  %v3894_v35 = vpack.c.bf16 %v1194_v29, %v1190_v24  ;;  %v1195_v58 = vld [vmem:[%s8096_s2 + $0x230] sm:$0xff]  ;;  %v1245_v23 = vld [vmem:[%s8096_s2 + $0x3c0] sm:$0xff] }
 0x18a   :  { %v1215_v38 = vld [vmem:[%s8096_s2 + $0x2d0] sm:$0xff]  ;;  %v1249_v52 = vld [vmem:[%s8096_s2 + $0x3e0] sm:$0xff] }
 0x18b   :  { %3957 = vmatpush1.bf16.msra.mxu1 %v3956_v54  ;;  %v3976_v54 = vpack.c.bf16 %v1179_v1, %v1175_v9  ;;  %v1217_v9 = vld [vmem:[%s8096_s2 + $0x2e0] sm:$0xff]  ;;  %v1219_v56 = vld [vmem:[%s8096_s2 + $0x2f0] sm:$0xff] }
 0x18c   :  { %3959 = vmatprep.subr.bf16.mxu1 %v3958_v62  ;;  %3877 = vmatpush1.bf16.msra.mxu0 %v3876_v51  ;;  %v3978_v62 = vpack.c.bf16 %v1188_v50, %v1184_v14  ;;  %v3896_v51 = vpack.c.bf16 %v1193_v42, %v1189_v41  ;;  %v3996_v14 = vpack.c.bf16 %v1219_v56, %v1215_v38  ;;  %v1226_v50 = vld [vmem:[%s8096_s2 + $0x328] sm:$0xff]  ;;  %v1223_v24 = vld [vmem:[%s8096_s2 + $0x310] sm:$0xff]  ;;  %v1232_v41 = vld [vmem:[%s8096_s2 + $0x358] sm:$0xff] }
 0x18d   :  { %3879 = vmatprep.subr.bf16.mxu0 %v3878_v18  ;;  %v1227_v29 = vld [vmem:[%s8096_s2 + $0x330] sm:$0xff]  ;;  %v1236_v42 = vld [vmem:[%s8096_s2 + $0x378] sm:$0xff] }
 0x18f   :  { %3961 = vmatpush1.bf16.msra.mxu1 %v3960_v17  ;;  %v3980_v17 = vpack.c.bf16 %v1187_v16, %v1183_v8  ;;  %v1225_v8 = vld [vmem:[%s8096_s2 + $0x320] sm:$0xff] }
 0x190   :  { %3963 = vmatprep.subr.bf16.mxu1 %v3962_v49  ;;  %3881 = vmatpush1.bf16.msra.mxu0 %v3880_v34  ;;  %v3982_v49 = vpack.c.bf16 %v1196_v36, %v1192_v30  ;;  %v1230_v30 = vld [vmem:[%s8096_s2 + $0x348] sm:$0xff] }
 0x191   :  { %3883 = vmatprep.subr.bf16.mxu0 %v3882_v55  ;;  %v1210_v55 = vld [vmem:[%s8096_s2 + $0x2a8] sm:$0xff] }
 0x192   :  { %v3902_v20 = vpack.c.bf16 %v1210_v55, %v1206_v48  ;;  %v1234_v36 = vld [vmem:[%s8096_s2 + $0x368] sm:$0xff]  ;;  %v1028_v55 = vlaneseq }
 0x193   :  { %3965 = vmatpush1.bf16.msra.mxu1 %v3964_v2  ;;  %v3984_v2 = vpack.c.bf16 %v1195_v58, %v1191_v57  ;;  %v1229_v57 = vld [vmem:[%s8096_s2 + $0x340] sm:$0xff] }
 0x194   :  { %3967 = vmatprep.subr.bf16.mxu1 %v3966_v33  ;;  %3885 = vmatpush1.bf16.msra.mxu0 %v3884_v39  ;;  %v1201_v33 = vld [vmem:[%s8096_s2 + $0x260] sm:$0xff] }
 0x195   :  { %3887 = vmatprep.subr.bf16.mxu0 %v3886_v27  ;;  %v3900_v44 = vpack.c.bf16 %v1201_v33, %v1197_v26  ;;  %v1209_v39 = vld [vmem:[%s8096_s2 + $0x2a0] sm:$0xff]  ;;  %v1214_v27 = vld [vmem:[%s8096_s2 + $0x2c8] sm:$0xff]  ;;  %v1240_v26 = vld [vmem:[%s8096_s2 + $0x398] sm:$0xff] }
 0x196   :  { %v3906_v31 = vpack.c.bf16 %v1218_v4, %v1214_v27  ;;  %v1233_v58 = vld [vmem:[%s8096_s2 + $0x360] sm:$0xff]  ;;  %v1244_v33 = vld [vmem:[%s8096_s2 + $0x3b8] sm:$0xff]  ;;  %v1247_v27 = vld [vmem:[%s8096_s2 + $0x3d0] sm:$0xff] }
 0x197   :  { %3969 = vmatpush1.bf16.msra.mxu1 %v3968_v21  ;;  %v1203_v21 = vld [vmem:[%s8096_s2 + $0x270] sm:$0xff]  ;;  %v3916_v3 = vpack.c.bf16 %v1233_v58, %v1229_v57 }
 0x198   :  { %3971 = vmatprep.subr.bf16.mxu1 %v3970_v61  ;;  %3889 = vmatpush1.bf16.msra.mxu0 %v3888_v6  ;;  %v3988_v28 = vpack.c.bf16 %v1203_v21, %v1199_v5  ;;  %v1208_v61 = vld [vmem:[%s8096_s2 + $0x298] sm:$0xff]  ;;  %v1213_v6 = vld [vmem:[%s8096_s2 + $0x2c0] sm:$0xff]  ;;  %v1239_v5 = vld [vmem:[%s8096_s2 + $0x390] sm:$0xff] }
 0x199   :  { %3891 = vmatprep.subr.bf16.mxu0 %v3890_v47  ;;  %v3990_v0 = vpack.c.bf16 %v1212_v32, %v1208_v61  ;;  %v1222_v47 = vld [vmem:[%s8096_s2 + $0x308] sm:$0xff]  ;;  %v1243_v21 = vld [vmem:[%s8096_s2 + $0x3b0] sm:$0xff] }
 0x19a   :  { %v3910_v59 = vpack.c.bf16 %v1226_v50, %v1222_v47  ;;  %v1250_v32 = vld [vmem:[%s8096_s2 + $0x3e8] sm:$0xff]  ;;  %v1251_v4 = vld [vmem:[%s8096_s2 + $0x3f0] sm:$0xff] }
 0x19b   :  { %3973 = vmatpush1.bf16.msra.mxu1 %v3972_v40  ;;  %v3904_v40 = vpack.c.bf16 %v1209_v39, %v1205_v15  ;;  %v1248_v15 = vld [vmem:[%s8096_s2 + $0x3d8] sm:$0xff]  ;;  %v4008_v39 = vpack.c.bf16 %v1243_v21, %v1239_v5  ;;  %v1254_v50 = vld [vmem:[%s8096_s2 + $0x408] sm:$0xff] }
 0x19c   :  { %3975 = vmatprep.subr.bf16.mxu1 %v3974_v60  ;;  %3893 = vmatpush1.bf16.msra.mxu0 %v3892_v7  ;;  %v1220_v60 = vld [vmem:[%s8096_s2 + $0x2f8] sm:$0xff]  ;;  %v1221_v7 = vld [vmem:[%s8096_s2 + $0x300] sm:$0xff] }
 0x19d   :  { %3895 = vmatprep.subr.bf16.mxu0 %v3894_v35  ;;  %v3994_v1 = vpack.c.bf16 %v1220_v60, %v1216_v37  ;;  %v4000_v35 = vpack.c.bf16 %v1227_v29, %v1223_v24  ;;  %v3924_v60 = vpack.c.bf16 %v1249_v52, %v1245_v23 }
 0x19f   :  { %3977 = vmatpush1.bf16.msra.mxu1 %v3976_v54  ;;  %v3908_v54 = vpack.c.bf16 %v1217_v9, %v1213_v6  ;;  %v4012_v6 = vpack.c.bf16 %v1251_v4, %v1247_v27 }
 0x1a0   :  { %3979 = vmatprep.subr.bf16.mxu1 %v3978_v62  ;;  %3897 = vmatpush1.bf16.msra.mxu0 %v3896_v51  ;;  %v1228_v62 = vld [vmem:[%s8096_s2 + $0x338] sm:$0xff]  ;;  %v4002_v51 = vpack.c.bf16 %v1236_v42, %v1232_v41 }
 0x1a1   :  { %3899 = vmatprep.subr.bf16.mxu0 %v3898_v19  ;;  %v3998_v16 = vpack.c.bf16 %v1228_v62, %v1224_v53  ;;  %v1258_v53 = vld [vmem:[%s8096_s2 + $0x428] sm:$0xff] }
 0x1a3   :  { %3981 = vmatpush1.bf16.msra.mxu1 %v3980_v17  ;;  %v3912_v17 = vpack.c.bf16 %v1225_v8, %v1221_v7  ;;  %v1260_v7 = vld [vmem:[%s8096_s2 + $0x438] sm:$0xff] }
 0x1a4   :  { %3983 = vmatprep.subr.bf16.mxu1 %v3982_v49  ;;  %3901 = vmatpush1.bf16.msra.mxu0 %v3900_v44  ;;  %v3914_v49 = vpack.c.bf16 %v1234_v36, %v1230_v30  ;;  %v1241_v44 = vld [vmem:[%s8096_s2 + $0x3a0] sm:$0xff] }
 0x1a5   :  { %3903 = vmatprep.subr.bf16.mxu0 %v3902_v20  ;;  %v1246_v20 = vld [vmem:[%s8096_s2 + $0x3c8] sm:$0xff] }
 0x1a7   :  { %3985 = vmatpush1.bf16.msra.mxu1 %v3984_v2  ;;  %v1231_v2 = vld [vmem:[%s8096_s2 + $0x350] sm:$0xff] }
 0x1a8   :  { %3987 = vmatprep.subr.bf16.mxu1 %v3986_v43  ;;  %3905 = vmatpush1.bf16.msra.mxu0 %v3904_v40  ;;  %v4004_v19 = vpack.c.bf16 %v1235_v10, %v1231_v2  ;;  %v4006_v43 = vpack.c.bf16 %v1244_v33, %v1240_v26  ;;  %v1252_v40 = vld [vmem:[%s8096_s2 + $0x3f8] sm:$0xff] }
 0x1a9   :  { %3907 = vmatprep.subr.bf16.mxu0 %v3906_v31  ;;  %v6014_v31 = vshrl.u32 %v1028_v55, 7 }
 0x1ab   :  { %3989 = vmatpush1.bf16.msra.mxu1 %v3988_v28  ;;  %v4794_v28 = vmov 1966171168   ;;  %8239 = vst [vmem:[#allocation8_spill] sm:$0xff] %v6014_v31 }
 0x1ac   :  { %3991 = vmatprep.subr.bf16.mxu1 %v3990_v0  ;;  %3909 = vmatpush1.bf16.msra.mxu0 %v3908_v54  ;;  %v1026_v48 = vunpack.c.l.s4 %v4794_v28  ;;  %v3922_v0 = vpack.c.bf16 %v1250_v32, %v1246_v20  ;;  %v1012_v32 = vld [vmem:[%s8101_s7] ss:$2 sm:$0x7] }
 0x1ad   :  { %3911 = vmatprep.subr.bf16.mxu0 %v3910_v59  ;;  %v1256_v59 = vld [vmem:[%s8096_s2 + $0x418] sm:$0xff] }
 0x1ae   :  { %v1027_v37 = vunpack.c.0.s8 %v1026_v48 }
 0x1af   :  { %3993 = vmatpush1.bf16.msra.mxu1 %v3992_v13  ;;  %v4010_v13 = vpack.c.bf16 %v1252_v40, %v1248_v15  ;;  %v6047_v40 = vsub.s32 2, %v6014_v31 }
 0x1b0   :  { %3995 = vmatprep.subr.bf16.mxu1 %v3994_v1  ;;  %3913 = vmatpush1.bf16.msra.mxu0 %v3912_v17  ;;  %v6018_v56 = vsub.s32 %v1027_v37, %v6014_v31 }
 0x1b1   :  { %3915 = vmatprep.subr.bf16.mxu0 %v3914_v49  ;;  %8243 = vst [vmem:[#allocation12_spill] sm:$0xff] %v6047_v40 }
 0x1b2   :  { %8240 = vst [vmem:[#allocation9_spill] sm:$0xff] %v6018_v56 }
 0x1b3   :  { %3997 = vmatpush1.bf16.msra.mxu1 %v3996_v14 }
 0x1b4   :  { %3999 = vmatprep.subr.bf16.mxu1 %v3998_v16  ;;  %3917 = vmatpush1.bf16.msra.mxu0 %v3916_v3  ;;  %v4014_v16 = vpack.c.bf16 %v1260_v7, %v1256_v59  ;;  %v1257_v59 = vld [vmem:[%s8096_s2 + $0x420] sm:$0xff]  ;;  %v1262_v7 = vld [vmem:[%s8096_s2 + $0x448] sm:$0xff] }
 0x1b7   :  { %4001 = vmatpush1.bf16.msra.mxu1 %v4000_v35 }
 0x1b8   :  { %4003 = vmatprep.subr.bf16.mxu1 %v4002_v51 }
 0x1bb   :  { %4005 = vmatpush1.bf16.msra.mxu1 %v4004_v19 }
 0x1bc   :  { %4007 = vmatprep.subr.bf16.mxu1 %v4006_v43 }
 0x1bf   :  { %4009 = vmatpush1.bf16.msra.mxu1 %v4008_v39  ;;  %v6041_v39 = vsub.s32 1, %v6014_v31 }
 0x1c0   :  { %4011 = vmatprep.subr.bf16.mxu1 %v4010_v13  ;;  %v3321_v13 = vld [vmem:[%s8101_s7 + $0x1] ss:$2 sm:$0x7] }
 0x1c1   :  { %8241 = vst [vmem:[#allocation10_spill] sm:$0xff] %v6041_v39 }
 0x1c3   :  { %4013 = vmatpush1.bf16.msra.mxu1 %v4012_v6 }
 0x1c4   :  { %4015 = vmatprep.subr.bf16.mxu1 %v4014_v16  ;;  %v1266_v16 = vld [vmem:[%s8096_s2 + $0x468] sm:$0xff] }
 0x1e4   :  { %v3390_v18 = vpop.f32.mrb[0].mxu1 }
 0x1e5   :  { %v3391_v34 = vpop.f32.mrb[1].mxu1 }
 0x1e6   :  { %v5868_v22 = vadd.f32 %v3391_v34, %v3390_v18  ;;  %v1242_v18 = vld [vmem:[%s8096_s2 + $0x3a8] sm:$0xff]  ;;  %v1237_v34 = vld [vmem:[%s8096_s2 + $0x380] sm:$0xff] }
 0x1e7   :  { %v3918_v25 = vpack.c.bf16 %v1242_v18, %v1238_v11  ;;  %v3920_v61 = vpack.c.bf16 %v1241_v44, %v1237_v34 }
 0x1e9   :  { %3919 = vmatprep.subr.bf16.mxu0 %v3918_v25 }
 0x1ea   :  { %3921 = vmatpush1.bf16.msra.mxu0 %v3920_v61 }
 0x1eb   :  { %3923 = vmatprep.subr.bf16.mxu0 %v3922_v0  ;;  %v6044_v0 = vsub.s32 0, %v6014_v31  ;;  %v1708_v31 = vld [vmem:[%s8099_s5 + $0x3a0] sm:$0xff] }
 0x1ed   :  { %8242 = vst [vmem:[#allocation11_spill] sm:$0xff] %v6044_v0 }
 0x1ee   :  { %3925 = vmatpush1.bf16.msra.mxu0 %v3924_v60 }
 0x1fe   :  { %v570_v9 = vpop.f32.mrb[4].mxu0  ;;  %v711_v1 = vpop.f32.mrb[2].mxu1 }
 0x1ff   :  { %v715_v54 = vmul.f32 0.5, %v570_v9  ;;  %v712_v38 = vadd.f32 %v5868_v22, %v711_v1  ;;  %v572_v14 = vpop.f32.mrb[5].mxu0  ;;  %v3511_v47 = vpop.f32.mrb[3].mxu1  ;;  %v3926_v22 = vpack.c.bf16 %v1258_v53, %v1254_v50  ;;  %v8244_v9 = vld [vmem:[#allocation18_spill] sm:$0xff]  ;;  %v1253_v53 = vld [vmem:[%s8096_s2 + $0x400] sm:$0xff] }
 0x200   :  { %v716_v62 = vmul.f32 0.5, %v572_v14 }
 0x201   :  { %v717_v8 = vmul.f32 0.5, %v712_v38  ;;  %3927 = vmatprep.subr.bf16.mxu0 %v3926_v22  ;;  %v1006_v10 = vmul.f32 %v715_v54, %v715_v54 }
 0x202   :  { %v1052_v17 = vcombine.low %v715_v54, %v716_v62  ;;  %v1007_v19 = vmul.f32 %v716_v62, %v716_v62 }
 0x203   :  { %v1066_v24 = vrot.slane %v717_v8, %v6018_v56  ;;  %v1008_v57 = vmul.f32 %v717_v8, %v717_v8 }
 0x204   :  { %v1059_v29 = vrot.slane %v1052_v17, %v6018_v56  ;;  %v1264_v17 = vld [vmem:[%s8096_s2 + $0x458] sm:$0xff] }
 0x206   :  { %v1067_v30 = vcombine.low %v1059_v29, %v1066_v24  ;;  %v1268_v24 = vld [vmem:[%s8096_s2 + $0x478] sm:$0xff] }
 0x208   :  { %v1074_v23 = vrot.slane %v1067_v30, %v6018_v56 }
 0x220   :  { %v3439_v35 = vpop.f32.mrb[6].mxu0 }
 0x221   :  { %v3440_v36 = vpop.f32.mrb[7].mxu0 }
 0x222   :  { %v3441_v41 = vadd.f32 %v3440_v36, %v3439_v35  ;;  %v3928_v35 = vpack.c.bf16 %v1257_v59, %v1253_v53  ;;  %v1287_v53 = vld [vmem:[%s8096_s2 + $0x510] sm:$0xff] }
 0x223   :  { %v1291_v59 = vld [vmem:[%s8096_s2 + $0x530] sm:$0xff] }
 0x23a   :  { %v999_v42 = vpop.f32.mrb[8].mxu0 }
 0x23b   :  { %v1000_v49 = vadd.f32 %v3441_v41, %v999_v42  ;;  %v3540_v51 = vpop.f32.mrb[9].mxu0  ;;  %v1261_v41 = vld [vmem:[%s8096_s2 + $0x440] sm:$0xff] }
 0x23c   :  { %v1265_v42 = vld [vmem:[%s8096_s2 + $0x460] sm:$0xff] }
 0x23d   :  { %v1005_v58 = vmul.f32 0.5, %v1000_v49 }
 0x23f   :  { %v1011_v2 = vsub.f32 %v1005_v58, %v1008_v57  ;;  %v3930_v57 = vpack.c.bf16 %v1266_v16, %v1262_v7  ;;  %v4018_v58 = vpack.c.bf16 %v1268_v24, %v1264_v17  ;;  %v4032_v16 = vpack.c.bf16 %v1291_v59, %v1287_v53  ;;  %v1293_v17 = vld [vmem:[%s8096_s2 + $0x540] sm:$0xff]  ;;  %v1621_v53 = vld [vmem:[%s8099_s5 + $0xe8] sm:$0xff]  ;;  %v1619_v59 = vld [vmem:[%s8099_s5 + $0xd8] sm:$0xff] }
 0x241   :  { %v1017_v25 = vadd.f32 1e-05, %v1011_v2  ;;  %v1263_v2 = vld [vmem:[%s8096_s2 + $0x450] sm:$0xff] }
 0x243   :  { %4717 = vrsqrt.f32 %v1017_v25  ;;  %v3932_v25 = vpack.c.bf16 %v1265_v42, %v1261_v41 }
 0x24d   :  { %v4718_v5 = vpop.eup %4717 }
 0x24e   :  { %v1038_v55 = vrot.slane %v4718_v5, %v6018_v56  ;;  %v1271_v5 = vld [vmem:[%s8096_s2 + $0x490] sm:$0xff] }
 0x259   :  { %v858_v3 = vpop.f32.mrb[4].mxu1 }
 0x25a   :  { %v1003_v11 = vmul.f32 0.5, %v858_v3  ;;  %v860_v18 = vpop.f32.mrb[5].mxu1  ;;  %v1267_v3 = vld [vmem:[%s8096_s2 + $0x470] sm:$0xff] }
 0x25b   :  { %v1004_v26 = vmul.f32 0.5, %v860_v18  ;;  %v1272_v18 = vld [vmem:[%s8096_s2 + $0x498] sm:$0xff] }
 0x25c   :  { %v1009_v33 = vsub.f32 %v1003_v11, %v1006_v10  ;;  %v1270_v10 = vld [vmem:[%s8096_s2 + $0x488] sm:$0xff] }
 0x25d   :  { %v1010_v34 = vsub.f32 %v1004_v26, %v1007_v19  ;;  %v1274_v11 = vld [vmem:[%s8096_s2 + $0x4a8] sm:$0xff]  ;;  %v1276_v19 = vld [vmem:[%s8096_s2 + $0x4b8] sm:$0xff]  ;;  %v4020_v26 = vpack.c.bf16 %v1267_v3, %v1263_v2  ;;  %v1301_v3 = vld [vmem:[%s8096_s2 + $0x580] sm:$0xff] }
 0x25e   :  { %v1015_v43 = vadd.f32 1e-05, %v1009_v33  ;;  %v1269_v33 = vld [vmem:[%s8096_s2 + $0x480] sm:$0xff]  ;;  %v1595_v2 = vld [vmem:[%s8099_s5 + $0x18] sm:$0xff] }
 0x25f   :  { %v1016_v44 = vadd.f32 1e-05, %v1010_v34  ;;  %v1273_v34 = vld [vmem:[%s8096_s2 + $0x4a0] sm:$0xff] }
 0x260   :  { %4719 = vrsqrt.f32 %v1015_v43  ;;  %v3934_v43 = vpack.c.bf16 %v1274_v11, %v1270_v10  ;;  %v1303_v10 = vld [vmem:[%s8096_s2 + $0x590] sm:$0xff]  ;;  %v1599_v11 = vld [vmem:[%s8099_s5 + $0x38] sm:$0xff] }
 0x261   :  { %4721 = vrsqrt.f32 %v1016_v44  ;;  %v4022_v44 = vpack.c.bf16 %v1276_v19, %v1272_v18  ;;  %v1592_v18 = vld [vmem:[%s8099_s5] sm:$0xff] }
 0x262   :  { %v1596_v19 = vld [vmem:[%s8099_s5 + $0x20] sm:$0xff] }
 0x26a   :  { %v4720_v21 = vpop.eup %4719 }
 0x26b   :  { %v4722_v28 = vpop.eup %4721 }
 0x26c   :  { %v1024_v48 = vcombine.low %v4720_v21, %v4722_v28  ;;  %v1275_v21 = vld [vmem:[%s8096_s2 + $0x4b0] sm:$0xff]  ;;  %v1278_v28 = vld [vmem:[%s8096_s2 + $0x4c8] sm:$0xff] }
 0x26e   :  { %v1031_v61 = vrot.slane %v1024_v48, %v6018_v56  ;;  %v1282_v48 = vld [vmem:[%s8096_s2 + $0x4e8] sm:$0xff] }
 0x270   :  { %v1039_v20 = vcombine.low %v1031_v61, %v1038_v55  ;;  %v1280_v55 = vld [vmem:[%s8096_s2 + $0x4d8] sm:$0xff] }
 0x271   :  { %v1284_v61 = vld [vmem:[%s8096_s2 + $0x4f8] sm:$0xff] }
 0x272   :  { %v1046_v15 = vrot.slane %v1039_v20, %v6018_v56  ;;  %v3936_v20 = vpack.c.bf16 %v1273_v34, %v1269_v33  ;;  %v1598_v33 = vld [vmem:[%s8099_s5 + $0x30] sm:$0xff]  ;;  %v1601_v34 = vld [vmem:[%s8099_s5 + $0x48] sm:$0xff] }
 0x274   :  { %v1048_v52 = vmul.f32 %v1046_v15, %v1012_v32  ;;  %v4024_v32 = vpack.c.bf16 %v1275_v21, %v1271_v5  ;;  %v1277_v15 = vld [vmem:[%s8096_s2 + $0x4c0] sm:$0xff]  ;;  %v1607_v5 = vld [vmem:[%s8099_s5 + $0x78] sm:$0xff] }
 0x276   :  { %v1076_v27 = vmul.f32 %v1074_v23, %v1048_v52  ;;  %v1086_v4 = vrot.slane %v1048_v52, %v6041_v39  ;;  %v1082_v37 = vrot.slane %v1048_v52, %v6044_v0  ;;  %v1090_v60 = vrot.slane %v1048_v52, %v6047_v40  ;;  %v1281_v23 = vld [vmem:[%s8096_s2 + $0x4e0] sm:$0xff] }
 0x277   :  { %v3938_v52 = vpack.c.bf16 %v1282_v48, %v1278_v28  ;;  %v6250_v28 = vpack.c.bf16 %v1599_v11, %v1595_v2  ;;  %v6252_v48 = vpack.c.bf16 %v1596_v19, %v1592_v18  ;;  %v1633_v11 = vld [vmem:[%s8099_s5 + $0x148] sm:$0xff]  ;;  %v1635_v19 = vld [vmem:[%s8099_s5 + $0x158] sm:$0xff] }
 0x278   :  { %v1077_v6 = vsub.f32 %v3321_v13, %v1076_v27  ;;  %v1095_v1 = vmul.f32 %v1086_v4, %v8244_v9  ;;  %v1094_v54 = vmul.f32 %v1082_v37, %v5344_v46  ;;  %v1096_v38 = vmul.f32 %v1090_v60, %v5456_v12  ;;  %v1255_v46 = vld [vmem:[%s8096_s2 + $0x410] sm:$0xff]  ;;  %v1286_v37 = vld [vmem:[%s8096_s2 + $0x508] sm:$0xff]  ;;  %v1292_v9 = vld [vmem:[%s8096_s2 + $0x538] sm:$0xff] }
 0x279   :  { %v1259_v12 = vld [vmem:[%s8096_s2 + $0x430] sm:$0xff]  ;;  %v4026_v13 = vpack.c.bf16 %v1284_v61, %v1280_v55  ;;  %v1290_v60 = vld [vmem:[%s8096_s2 + $0x528] sm:$0xff]  ;;  %v1600_v61 = vld [vmem:[%s8099_s5 + $0x40] sm:$0xff] }
 0x27a   :  { %v1105_v14 = vrot.slane %v1077_v6, %v6041_v39  ;;  %v1101_v47 = vrot.slane %v1077_v6, %v6044_v0  ;;  %v1109_v50 = vrot.slane %v1077_v6, %v6047_v40  ;;  %v4016_v36 = vpack.c.bf16 %v1259_v12, %v1255_v46  ;;  %v1279_v27 = vld [vmem:[%s8096_s2 + $0x4d0] sm:$0xff]  ;;  %v1288_v6 = vld [vmem:[%s8096_s2 + $0x518] sm:$0xff]  ;;  %v1637_v18 = vld [vmem:[%s8099_s5 + $0x168] sm:$0xff] }
 0x27b   :  { %v1283_v4 = vld [vmem:[%s8096_s2 + $0x4f0] sm:$0xff]  ;;  %v1296_v46 = vld [vmem:[%s8096_s2 + $0x558] sm:$0xff] }
 0x27c   :  { %v1114_v62 = vadd.f32 %v1105_v14, %v1095_v1  ;;  %v1113_v22 = vadd.f32 %v1101_v47, %v1094_v54  ;;  %v6077_v8 = vadd.f32 %v1109_v50, %v1096_v38  ;;  %v3940_v1 = vpack.c.bf16 %v1281_v23, %v1277_v15  ;;  %v1285_v38 = vld [vmem:[%s8096_s2 + $0x500] sm:$0xff]  ;;  %v1300_v12 = vld [vmem:[%s8096_s2 + $0x578] sm:$0xff] }
 0x27d   :  { %v4028_v54 = vpack.c.bf16 %v1283_v4, %v1279_v27  ;;  %v1289_v14 = vld [vmem:[%s8096_s2 + $0x520] sm:$0xff]  ;;  %v3942_v47 = vpack.c.bf16 %v1290_v60, %v1286_v37  ;;  %v4030_v50 = vpack.c.bf16 %v1292_v9, %v1288_v6  ;;  %v1609_v27 = vld [vmem:[%s8099_s5 + $0x88] sm:$0xff]  ;;  %v1611_v4 = vld [vmem:[%s8099_s5 + $0x98] sm:$0xff] }
 0x27e   :  { %vm1117_vm7 = vcmp.ge.f32.partialorder %v1114_v62, 0.0  ;;  %v1120_v29 = vmul.f32 0.01, %v1114_v62  ;;  %vm1116_vm8 = vcmp.ge.f32.partialorder %v1113_v22, 0.0  ;;  %v1119_v30 = vmul.f32 0.01, %v1113_v22 }
 0x27f   :  { %v3944_v7 = vpack.c.bf16 %v1289_v14, %v1285_v38  ;;  %vm1118_vm9 = vcmp.ge.f32.partialorder %v6077_v8, 0.0  ;;  %v1615_v37 = vld [vmem:[%s8099_s5 + $0xb8] sm:$0xff]  ;;  %v1608_v9 = vld [vmem:[%s8099_s5 + $0x80] sm:$0xff]  ;;  %v1610_v14 = vld [vmem:[%s8099_s5 + $0x90] sm:$0xff] }
 0x280   :  { %v1123_v49 = vsel %vm1117_vm7, %v1114_v62, %v1120_v29  ;;  %v1122_v51 = vsel %vm1116_vm8, %v1113_v22, %v1119_v30  ;;  %v1294_v62 = vld [vmem:[%s8096_s2 + $0x548] sm:$0xff]  ;;  %v4034_v29 = vpack.c.bf16 %v1300_v12, %v1296_v46  ;;  %v1297_v30 = vld [vmem:[%s8096_s2 + $0x560] sm:$0xff]  ;;  %v6305_v38 = vpack.c.bf16 %v1615_v37, %v1611_v4 }
 0x281   :  { %1372 = vmatprep.mubr.f32.mxu0 %v1123_v49  ;;  %1514 = vmatprep.mubr.f32.mxu1 %v1123_v49  ;;  %v1298_v22 = vld [vmem:[%s8096_s2 + $0x568] sm:$0xff]  ;;  %v3948_v41 = vpack.c.bf16 %v1297_v30, %v1293_v17  ;;  %v1616_v12 = vld [vmem:[%s8099_s5 + $0xc0] sm:$0xff] }
 0x282   :  { %1373 = vmatmul.mubr.f32.vlgmr.msra.gmra.mrb[10].mxu0 %v1122_v51  ;;  %1515 = vmatmul.mubr.f32.vlgmr.msra.gmra.mrb[6].mxu1 %v1122_v51  ;;  %v3946_v24 = vpack.c.bf16 %v1298_v22, %v1294_v62  ;;  %v1302_v49 = vld [vmem:[%s8096_s2 + $0x588] sm:$0xff]  ;;  %v1304_v51 = vld [vmem:[%s8096_s2 + $0x598] sm:$0xff]  ;;  %v1640_v37 = vld [vmem:[%s8099_s5 + $0x180] sm:$0xff] }
 0x283   :  { %3929 = vmatpush1.bf16.msra.mxu0 %v3928_v35  ;;  %4017 = vmatpush1.bf16.msra.mxu1 %v4016_v36  ;;  %v1295_v35 = vld [vmem:[%s8096_s2 + $0x550] sm:$0xff]  ;;  %v1623_v62 = vld [vmem:[%s8099_s5 + $0xf8] sm:$0xff]  ;;  %v1625_v30 = vld [vmem:[%s8099_s5 + $0x108] sm:$0xff] }
 0x284   :  { %3931 = vmatprep.subr.bf16.mxu0 %v3930_v57  ;;  %4019 = vmatprep.subr.bf16.mxu1 %v4018_v58  ;;  %v1299_v36 = vld [vmem:[%s8096_s2 + $0x570] sm:$0xff]  ;;  %v1593_v57 = vld [vmem:[%s8099_s5 + $0x8] sm:$0xff]  ;;  %v6341_v17 = vpack.c.bf16 %v1623_v62, %v1619_v59  ;;  %v1651_v62 = vld [vmem:[%s8099_s5 + $0x1d8] sm:$0xff] }
 0x285   :  { %1443 = vmatprep.mubr.f32.mxu0 %v8216_v45  ;;  %1585 = vmatprep.mubr.f32.mxu1 %v8216_v45  ;;  %v4036_v42 = vpack.c.bf16 %v1299_v36, %v1295_v35  ;;  %v1597_v58 = vld [vmem:[%s8099_s5 + $0x28] sm:$0xff]  ;;  %v1627_v36 = vld [vmem:[%s8099_s5 + $0x118] sm:$0xff] }
 0x286   :  { %v6248_v21 = vpack.c.bf16 %v1597_v58, %v1593_v57  ;;  %v1629_v35 = vld [vmem:[%s8099_s5 + $0x128] sm:$0xff]  ;;  %v1628_v57 = vld [vmem:[%s8099_s5 + $0x120] sm:$0xff] }
 0x287   :  { %3933 = vmatpush1.bf16.msra.mxu0 %v3932_v25  ;;  %4021 = vmatpush1.bf16.msra.mxu1 %v4020_v26  ;;  %v1121_v25 = vmul.f32 0.01, %v6077_v8  ;;  %v1594_v26 = vld [vmem:[%s8099_s5 + $0x10] sm:$0xff]  ;;  %v6375_v58 = vpack.c.bf16 %v1629_v35, %v1625_v30  ;;  %v1653_v59 = vld [vmem:[%s8099_s5 + $0x1e8] sm:$0xff]  ;;  %v1652_v30 = vld [vmem:[%s8099_s5 + $0x1e0] sm:$0xff] }
 0x288   :  { %3935 = vmatprep.subr.bf16.mxu0 %v3934_v43  ;;  %4023 = vmatprep.subr.bf16.mxu1 %v4022_v44  ;;  %v1605_v43 = vld [vmem:[%s8099_s5 + $0x68] sm:$0xff]  ;;  %v1603_v44 = vld [vmem:[%s8099_s5 + $0x58] sm:$0xff]  ;;  %v6254_v55 = vpack.c.bf16 %v1598_v33, %v1594_v26 }
 0x289   :  { %v6263_v15 = vpack.c.bf16 %v1605_v43, %v1601_v34  ;;  %v6265_v23 = vpack.c.bf16 %v1607_v5, %v1603_v44  ;;  %v1632_v34 = vld [vmem:[%s8099_s5 + $0x140] sm:$0xff]  ;;  %v6411_v44 = vpack.c.bf16 %v1637_v18, %v1633_v11  ;;  %v1663_v11 = vld [vmem:[%s8099_s5 + $0x238] sm:$0xff] }
 0x28a   :  { %v1636_v43 = vld [vmem:[%s8099_s5 + $0x160] sm:$0xff] }
 0x28b   :  { %3937 = vmatpush1.bf16.msra.mxu0 %v3936_v20  ;;  %4025 = vmatpush1.bf16.msra.mxu1 %v4024_v32  ;;  %v1604_v20 = vld [vmem:[%s8099_s5 + $0x60] sm:$0xff]  ;;  %v1124_v32 = vsel %vm1118_vm9, %v6077_v8, %v1121_v25  ;;  %v1613_v8 = vld [vmem:[%s8099_s5 + $0xa8] sm:$0xff]  ;;  %v1639_v25 = vld [vmem:[%s8099_s5 + $0x178] sm:$0xff] }
 0x28c   :  { %3939 = vmatprep.subr.bf16.mxu0 %v3938_v52  ;;  %4027 = vmatprep.subr.bf16.mxu1 %v4026_v13  ;;  %v1602_v52 = vld [vmem:[%s8099_s5 + $0x50] sm:$0xff]  ;;  %v6291_v60 = vpack.c.bf16 %v1604_v20, %v1600_v61  ;;  %v6413_v5 = vpack.c.bf16 %v1639_v25, %v1635_v19  ;;  %v1656_v25 = vld [vmem:[%s8099_s5 + $0x200] sm:$0xff] }
 0x28d   :  { %v1606_v13 = vld [vmem:[%s8099_s5 + $0x70] sm:$0xff] }
 0x28e   :  { %v6293_v6 = vpack.c.bf16 %v1606_v13, %v1602_v52  ;;  %v1634_v61 = vld [vmem:[%s8099_s5 + $0x150] sm:$0xff]  ;;  %v1645_v52 = vld [vmem:[%s8099_s5 + $0x1a8] sm:$0xff]  ;;  %v1643_v13 = vld [vmem:[%s8099_s5 + $0x198] sm:$0xff] }
 0x28f   :  { %3941 = vmatpush1.bf16.msra.mxu0 %v3940_v1  ;;  %4029 = vmatpush1.bf16.msra.mxu1 %v4028_v54  ;;  %v1612_v1 = vld [vmem:[%s8099_s5 + $0xa0] sm:$0xff]  ;;  %v6303_v54 = vpack.c.bf16 %v1613_v8, %v1609_v27  ;;  %v1638_v20 = vld [vmem:[%s8099_s5 + $0x170] sm:$0xff]  ;;  %v1647_v27 = vld [vmem:[%s8099_s5 + $0x1b8] sm:$0xff]  ;;  %v6435_v8 = vpack.c.bf16 %v1636_v43, %v1632_v34 }
 0x290   :  { %3943 = vmatprep.subr.bf16.mxu0 %v3942_v47  ;;  %4031 = vmatprep.subr.bf16.mxu1 %v4030_v50  ;;  %v1614_v47 = vld [vmem:[%s8099_s5 + $0xb0] sm:$0xff]  ;;  %v1617_v50 = vld [vmem:[%s8099_s5 + $0xc8] sm:$0xff]  ;;  %v6327_v22 = vpack.c.bf16 %v1612_v1, %v1608_v9  ;;  %v6437_v4 = vpack.c.bf16 %v1638_v20, %v1634_v61  ;;  %v1644_v9 = vld [vmem:[%s8099_s5 + $0x1a0] sm:$0xff] }
 0x291   :  { %v6329_v46 = vpack.c.bf16 %v1614_v47, %v1610_v14  ;;  %v6449_v14 = vpack.c.bf16 %v1647_v27, %v1643_v13  ;;  %v1642_v47 = vld [vmem:[%s8099_s5 + $0x190] sm:$0xff]  ;;  %v1660_v34 = vld [vmem:[%s8099_s5 + $0x220] sm:$0xff]  ;;  %v1669_v13 = vld [vmem:[%s8099_s5 + $0x268] sm:$0xff] }
 0x292   :  { %v1658_v20 = vld [vmem:[%s8099_s5 + $0x210] sm:$0xff]  ;;  %v1667_v27 = vld [vmem:[%s8099_s5 + $0x258] sm:$0xff] }
 0x293   :  { %3945 = vmatpush1.bf16.msra.mxu0 %v3944_v7  ;;  %4033 = vmatpush1.bf16.msra.mxu1 %v4032_v16  ;;  %v1620_v7 = vld [vmem:[%s8099_s5 + $0xe0] sm:$0xff]  ;;  %v6339_v16 = vpack.c.bf16 %v1621_v53, %v1617_v50  ;;  %v1646_v50 = vld [vmem:[%s8099_s5 + $0x1b0] sm:$0xff]  ;;  %v1649_v53 = vld [vmem:[%s8099_s5 + $0x1c8] sm:$0xff] }
 0x294   :  { %3947 = vmatprep.subr.bf16.mxu0 %v3946_v24  ;;  %4035 = vmatprep.subr.bf16.mxu1 %v4034_v29  ;;  %v1618_v24 = vld [vmem:[%s8099_s5 + $0xd0] sm:$0xff]  ;;  %v6483_v35 = vpack.c.bf16 %v1653_v59, %v1649_v53  ;;  %v1668_v53 = vld [vmem:[%s8099_s5 + $0x260] sm:$0xff] }
 0x295   :  { %v1622_v29 = vld [vmem:[%s8099_s5 + $0xf0] sm:$0xff] }
 0x297   :  { %3949 = vmatpush1.bf16.msra.mxu0 %v3948_v41  ;;  %4037 = vmatpush1.bf16.msra.mxu1 %v4036_v42  ;;  %v1631_v41 = vld [vmem:[%s8099_s5 + $0x138] sm:$0xff]  ;;  %v6363_v42 = vpack.c.bf16 %v1620_v7, %v1616_v12  ;;  %v6471_v7 = vpack.c.bf16 %v1644_v9, %v1640_v37  ;;  %v6543_v9 = vpack.c.bf16 %v1660_v34, %v1656_v25  ;;  %v1676_v25 = vld [vmem:[%s8099_s5 + $0x2a0] sm:$0xff] }
 0x298   :  { %1403 = vmatprep.subr.mxu0 %v1302_v49  ;;  %1545 = vmatprep.subr.mxu1 %v1304_v51  ;;  %v6365_v49 = vpack.c.bf16 %v1622_v29, %v1618_v24  ;;  %v1624_v51 = vld [vmem:[%s8099_s5 + $0x100] sm:$0xff]  ;;  %v6377_v2 = vpack.c.bf16 %v1631_v41, %v1627_v36  ;;  %v1655_v12 = vld [vmem:[%s8099_s5 + $0x1f8] sm:$0xff]  ;;  %v6473_v24 = vpack.c.bf16 %v1646_v50, %v1642_v47  ;;  %v1650_v41 = vld [vmem:[%s8099_s5 + $0x1d0] sm:$0xff] }
 0x299   :  { %v6399_v26 = vpack.c.bf16 %v1628_v57, %v1624_v51  ;;  %v1648_v29 = vld [vmem:[%s8099_s5 + $0x1c0] sm:$0xff]  ;;  %v6485_v36 = vpack.c.bf16 %v1655_v12, %v1651_v62  ;;  %v1654_v51 = vld [vmem:[%s8099_s5 + $0x1f0] sm:$0xff]  ;;  %v1657_v57 = vld [vmem:[%s8099_s5 + $0x208] sm:$0xff] }
 0x29a   :  { %v6507_v18 = vpack.c.bf16 %v1652_v30, %v1648_v29  ;;  %v6509_v19 = vpack.c.bf16 %v1654_v51, %v1650_v41  ;;  %v1671_v37 = vld [vmem:[%s8099_s5 + $0x278] sm:$0xff]  ;;  %v1664_v50 = vld [vmem:[%s8099_s5 + $0x240] sm:$0xff]  ;;  %v1666_v12 = vld [vmem:[%s8099_s5 + $0x250] sm:$0xff] }
 0x29b   :  { %1404 = vmatpush1.msra.mxu0 %v1301_v3  ;;  %1546 = vmatpush1.msra.mxu1 %v1303_v10  ;;  %v1626_v3 = vld [vmem:[%s8099_s5 + $0x110] sm:$0xff]  ;;  %v6557_v62 = vpack.c.bf16 %v1671_v37, %v1667_v27  ;;  %v1673_v30 = vld [vmem:[%s8099_s5 + $0x288] sm:$0xff]  ;;  %v1675_v51 = vld [vmem:[%s8099_s5 + $0x298] sm:$0xff] }
 0x29c   :  { %3322 = vmatmul.mubr.msk.f32.vlgmr.msra.gmra.mrb[10].mxu0 %vm429_vm6, %v1124_v32  ;;  %3323 = vmatmul.mubr.msk.f32.vlgmr.msra.gmra.mrb[6].mxu1 %vm429_vm6, %v1124_v32  ;;  %v1630_v10 = vld [vmem:[%s8099_s5 + $0x130] sm:$0xff]  ;;  %v1641_v32 = vld [vmem:[%s8099_s5 + $0x188] sm:$0xff]  ;;  %v1683_v37 = vld [vmem:[%s8099_s5 + $0x2d8] sm:$0xff]  ;;  %vm3284_vm6 = vcmask 25600  }
 0x29d   :  { %4039 = vmatprep.subr.bf16.mxu0 %v6248_v21  ;;  %4143 = vmatprep.subr.bf16.mxu1 %v6250_v28  ;;  %v6401_v33 = vpack.c.bf16 %v1630_v10, %v1626_v3  ;;  %v6447_v1 = vpack.c.bf16 %v1645_v52, %v1641_v32  ;;  %v1661_v3 = vld [vmem:[%s8099_s5 + $0x228] sm:$0xff]  ;;  %v1659_v10 = vld [vmem:[%s8099_s5 + $0x218] sm:$0xff]  ;;  %v1662_v32 = vld [vmem:[%s8099_s5 + $0x230] sm:$0xff] }
 0x29e   :  { %4041 = vmatpush1.bf16.msra.mxu0 %v6252_v48  ;;  %4145 = vmatpush1.bf16.msra.mxu1 %v6254_v55  ;;  %v6519_v43 = vpack.c.bf16 %v1661_v3, %v1657_v57  ;;  %v6521_v61 = vpack.c.bf16 %v1663_v11, %v1659_v10  ;;  %v1665_v52 = vld [vmem:[%s8099_s5 + $0x248] sm:$0xff]  ;;  %v6545_v47 = vpack.c.bf16 %v1662_v32, %v1658_v20  ;;  %v1670_v29 = vld [vmem:[%s8099_s5 + $0x270] sm:$0xff]  ;;  %v1679_v57 = vld [vmem:[%s8099_s5 + $0x2b8] sm:$0xff] }
 0x29f   :  { %4043 = vmatprep.subr.bf16.mxu0 %v6263_v15  ;;  %4147 = vmatprep.subr.bf16.mxu1 %v6265_v23  ;;  %v6555_v59 = vpack.c.bf16 %v1669_v13, %v1665_v52  ;;  %v1677_v41 = vld [vmem:[%s8099_s5 + $0x2a8] sm:$0xff]  ;;  %v6579_v3 = vpack.c.bf16 %v1668_v53, %v1664_v50  ;;  %v6581_v10 = vpack.c.bf16 %v1670_v29, %v1666_v12  ;;  %v1672_v11 = vld [vmem:[%s8099_s5 + $0x280] sm:$0xff]  ;;  %v1674_v32 = vld [vmem:[%s8099_s5 + $0x290] sm:$0xff] }
 0x2a0   :  { %v6591_v34 = vpack.c.bf16 %v1677_v41, %v1673_v30  ;;  %v6593_v20 = vpack.c.bf16 %v1679_v57, %v1675_v51  ;;  %v1678_v52 = vld [vmem:[%s8099_s5 + $0x2b0] sm:$0xff]  ;;  %v1681_v13 = vld [vmem:[%s8099_s5 + $0x2c8] sm:$0xff]  ;;  %v1687_v50 = vld [vmem:[%s8099_s5 + $0x2f8] sm:$0xff]  ;;  %v6615_v53 = vpack.c.bf16 %v1676_v25, %v1672_v11 }
 0x2a1   :  { %v1685_v27 = vld [vmem:[%s8099_s5 + $0x2e8] sm:$0xff]  ;;  %v6617_v12 = vpack.c.bf16 %v1678_v52, %v1674_v32  ;;  %v1680_v29 = vld [vmem:[%s8099_s5 + $0x2c0] sm:$0xff]  ;;  %v6629_v51 = vpack.c.bf16 %v1687_v50, %v1683_v37  ;;  %v1682_v57 = vld [vmem:[%s8099_s5 + $0x2d0] sm:$0xff] }
 0x2a2   :  { %4045 = vmatpush1.bf16.msra.mxu0 %v6291_v60  ;;  %4149 = vmatpush1.bf16.msra.mxu1 %v6293_v6  ;;  %8245 = vst [vmem:[#allocation13_spill] sm:$0xff] %v6591_v34  ;;  %8246 = vst [vmem:[#allocation14_spill] sm:$0xff] %v6593_v20  ;;  %v1684_v30 = vld [vmem:[%s8099_s5 + $0x2e0] sm:$0xff]  ;;  %v6627_v41 = vpack.c.bf16 %v1685_v27, %v1681_v13  ;;  %v1686_v11 = vld [vmem:[%s8099_s5 + $0x2f0] sm:$0xff] }
 0x2a3   :  { %4047 = vmatprep.subr.bf16.mxu0 %v6303_v54  ;;  %4151 = vmatprep.subr.bf16.mxu1 %v6305_v38  ;;  %8247 = vst [vmem:[#allocation15_spill] sm:$0xff] %v6615_v53  ;;  %8248 = vst [vmem:[#allocation16_spill] sm:$0xff] %v6617_v12  ;;  %v1689_v25 = vld [vmem:[%s8099_s5 + $0x308] sm:$0xff]  ;;  %v1691_v52 = vld [vmem:[%s8099_s5 + $0x318] sm:$0xff]  ;;  %v6651_v27 = vpack.c.bf16 %v1684_v30, %v1680_v29  ;;  %v6653_v37 = vpack.c.bf16 %v1686_v11, %v1682_v57 }
 0x2a4   :  { %8249 = vst [vmem:[#allocation17_spill] sm:$0xff] %v6627_v41  ;;  %8250 = vst [vmem:[#allocation19_spill] sm:$0xff] %v6629_v51  ;;  %v1693_v32 = vld [vmem:[%s8099_s5 + $0x328] sm:$0xff]  ;;  %v1695_v13 = vld [vmem:[%s8099_s5 + $0x338] sm:$0xff] }
 0x2a5   :  { %8251 = vst [vmem:[#allocation20_spill] sm:$0xff] %v6651_v27  ;;  %8252 = vst [vmem:[#allocation21_spill] sm:$0xff] %v6653_v37  ;;  %v6657_v50 = vpack.c.bf16 %v1693_v32, %v1689_v25  ;;  %v6659_v45 = vpack.c.bf16 %v1695_v13, %v1691_v52  ;;  %v1688_v29 = vld [vmem:[%s8099_s5 + $0x300] sm:$0xff]  ;;  %v1690_v57 = vld [vmem:[%s8099_s5 + $0x310] sm:$0xff] }
 0x2a6   :  { %4049 = vmatpush1.bf16.msra.mxu0 %v6327_v22  ;;  %4153 = vmatpush1.bf16.msra.mxu1 %v6329_v46  ;;  %v1692_v30 = vld [vmem:[%s8099_s5 + $0x320] sm:$0xff]  ;;  %v1694_v25 = vld [vmem:[%s8099_s5 + $0x330] sm:$0xff]  ;;  %v1697_v52 = vld [vmem:[%s8099_s5 + $0x348] sm:$0xff] }
 0x2a7   :  { %4051 = vmatprep.subr.bf16.mxu0 %v6339_v16  ;;  %4155 = vmatprep.subr.bf16.mxu1 %v6341_v17  ;;  %8253 = vst [vmem:[#allocation22_spill] sm:$0xff] %v6657_v50  ;;  %8254 = vst [vmem:[#allocation23_spill] sm:$0xff] %v6659_v45  ;;  %v6674_v11 = vpack.c.bf16 %v1692_v30, %v1688_v29  ;;  %v6679_v32 = vpack.c.bf16 %v1694_v25, %v1690_v57  ;;  %v1701_v13 = vld [vmem:[%s8099_s5 + $0x368] sm:$0xff]  ;;  %v1699_v29 = vld [vmem:[%s8099_s5 + $0x358] sm:$0xff] }
 0x2a8   :  { %v6692_v30 = vpack.c.bf16 %v1701_v13, %v1697_v52  ;;  %v1703_v57 = vld [vmem:[%s8099_s5 + $0x378] sm:$0xff]  ;;  %v1696_v25 = vld [vmem:[%s8099_s5 + $0x340] sm:$0xff]  ;;  %v1698_v52 = vld [vmem:[%s8099_s5 + $0x350] sm:$0xff] }
 0x2a9   :  { %8255 = vst [vmem:[#allocation24_spill] sm:$0xff] %v6674_v11  ;;  %8256 = vst [vmem:[#allocation25_spill] sm:$0xff] %v6679_v32  ;;  %v6703_v40 = vpack.c.bf16 %v1703_v57, %v1699_v29  ;;  %v6705_v0 = vpack.c.bf16 %v1700_v63, %v1696_v25  ;;  %v1702_v13 = vld [vmem:[%s8099_s5 + $0x370] sm:$0xff]  ;;  %v1705_v63 = vld [vmem:[%s8099_s5 + $0x388] sm:$0xff] }
 0x2aa   :  { %4053 = vmatpush1.bf16.msra.mxu0 %v6363_v42  ;;  %4157 = vmatpush1.bf16.msra.mxu1 %v6365_v49  ;;  %8257 = vst [vmem:[#allocation26_spill] sm:$0xff] %v6692_v30  ;;  %v6714_v39 = vpack.c.bf16 %v1702_v13, %v1698_v52  ;;  %v1709_v29 = vld [vmem:[%s8099_s5 + $0x3a8] sm:$0xff]  ;;  %v1707_v57 = vld [vmem:[%s8099_s5 + $0x398] sm:$0xff]  ;;  %v1704_v13 = vld [vmem:[%s8099_s5 + $0x380] sm:$0xff] }
 0x2ab   :  { %4055 = vmatprep.subr.bf16.mxu0 %v6375_v58  ;;  %4159 = vmatprep.subr.bf16.mxu1 %v6377_v2  ;;  %8258 = vst [vmem:[#allocation18_spill] sm:$0xff] %v6703_v40  ;;  %8259 = vst [vmem:[#allocation27_spill] sm:$0xff] %v6705_v0  ;;  %v6728_v25 = vpack.c.bf16 %v1709_v29, %v1705_v63  ;;  %v1711_v52 = vld [vmem:[%s8099_s5 + $0x3b8] sm:$0xff]  ;;  %v1706_v63 = vld [vmem:[%s8099_s5 + $0x390] sm:$0xff] }
 0x2ac   :  { %8260 = vst [vmem:[#allocation28_spill] sm:$0xff] %v6714_v39  ;;  %v6739_v56 = vpack.c.bf16 %v1711_v52, %v1707_v57  ;;  %v1710_v29 = vld [vmem:[%s8099_s5 + $0x3b0] sm:$0xff]  ;;  %v1717_v57 = vld [vmem:[%s8099_s5 + $0x3e8] sm:$0xff]  ;;  %v1715_v52 = vld [vmem:[%s8099_s5 + $0x3d8] sm:$0xff] }
 0x2ad   :  { %8261 = vst [vmem:[#allocation29_spill] sm:$0xff] %v6728_v25 }
 0x2ae   :  { %4057 = vmatpush1.bf16.msra.mxu0 %v6399_v26  ;;  %4161 = vmatpush1.bf16.msra.mxu1 %v6401_v33  ;;  %8262 = vst [vmem:[#allocation30_spill] sm:$0xff] %v6739_v56 }
 0x2af   :  { %4059 = vmatprep.subr.bf16.mxu0 %v6411_v44  ;;  %4163 = vmatprep.subr.bf16.mxu1 %v6413_v5 }
 0x2b2   :  { %4061 = vmatpush1.bf16.msra.mxu0 %v6435_v8  ;;  %4165 = vmatpush1.bf16.msra.mxu1 %v6437_v4 }
 0x2b3   :  { %4063 = vmatprep.subr.bf16.mxu0 %v6447_v1  ;;  %4167 = vmatprep.subr.bf16.mxu1 %v6449_v14 }
 0x2b6   :  { %4065 = vmatpush1.bf16.msra.mxu0 %v6471_v7  ;;  %4169 = vmatpush1.bf16.msra.mxu1 %v6473_v24 }
 0x2b7   :  { %4067 = vmatprep.subr.bf16.mxu0 %v6483_v35  ;;  %4171 = vmatprep.subr.bf16.mxu1 %v6485_v36 }
 0x2ba   :  { %4069 = vmatpush1.bf16.msra.mxu0 %v6507_v18  ;;  %4173 = vmatpush1.bf16.msra.mxu1 %v6509_v19 }
 0x2bb   :  { %4071 = vmatprep.subr.bf16.mxu0 %v6519_v43  ;;  %4175 = vmatprep.subr.bf16.mxu1 %v6521_v61 }
 0x2be   :  { %4073 = vmatpush1.bf16.msra.mxu0 %v6543_v9  ;;  %4177 = vmatpush1.bf16.msra.mxu1 %v6545_v47 }
 0x2bf   :  { %4075 = vmatprep.subr.bf16.mxu0 %v6555_v59  ;;  %4179 = vmatprep.subr.bf16.mxu1 %v6557_v62 }
 0x2c2   :  { %4077 = vmatpush1.bf16.msra.mxu0 %v6579_v3  ;;  %4181 = vmatpush1.bf16.msra.mxu1 %v6581_v10 }
 0x2c3   :  { %4079 = vmatprep.subr.bf16.mxu0 %v6591_v34  ;;  %4183 = vmatprep.subr.bf16.mxu1 %v6593_v20  ;;  %v1730_v34 = vld [vmem:[%s8099_s5 + $0x450] sm:$0xff] }
 0x2c6   :  { %4081 = vmatpush1.bf16.msra.mxu0 %v6615_v53  ;;  %4185 = vmatpush1.bf16.msra.mxu1 %v6617_v12  ;;  %v1720_v12 = vld [vmem:[%s8099_s5 + $0x400] sm:$0xff] }
 0x2c7   :  { %4083 = vmatprep.subr.bf16.mxu0 %v6627_v41  ;;  %4187 = vmatprep.subr.bf16.mxu1 %v6629_v51 }
 0x2ca   :  { %4085 = vmatpush1.bf16.msra.mxu0 %v6651_v27  ;;  %4189 = vmatpush1.bf16.msra.mxu1 %v6653_v37 }
 0x2cb   :  { %4087 = vmatprep.subr.bf16.mxu0 %v6657_v50  ;;  %4191 = vmatprep.subr.bf16.mxu1 %v6659_v45 }
 0x2ce   :  { %4089 = vmatpush1.bf16.msra.mxu0 %v6674_v11  ;;  %4193 = vmatpush1.bf16.msra.mxu1 %v6679_v32 }
 0x2cf   :  { %4091 = vmatprep.subr.bf16.mxu0 %v6692_v30  ;;  %4195 = vmatprep.subr.bf16.mxu1 %v6703_v40  ;;  %v1721_v40 = vld [vmem:[%s8099_s5 + $0x408] sm:$0xff] }
 0x2d2   :  { %4093 = vmatpush1.bf16.msra.mxu0 %v6705_v0  ;;  %4197 = vmatpush1.bf16.msra.mxu1 %v6714_v39  ;;  %v6741_v0 = vpack.c.bf16 %v1708_v31, %v1704_v13  ;;  %v6750_v39 = vpack.c.bf16 %v1710_v29, %v1706_v63  ;;  %v1713_v31 = vld [vmem:[%s8099_s5 + $0x3c8] sm:$0xff]  ;;  %v1719_v63 = vld [vmem:[%s8099_s5 + $0x3f8] sm:$0xff]  ;;  %v1712_v29 = vld [vmem:[%s8099_s5 + $0x3c0] sm:$0xff] }
 0x2d3   :  { %4095 = vmatprep.subr.bf16.mxu0 %v6728_v25  ;;  %4199 = vmatprep.subr.bf16.mxu1 %v6739_v56  ;;  %v6764_v13 = vpack.c.bf16 %v1717_v57, %v1713_v31  ;;  %v6775_v56 = vpack.c.bf16 %v1719_v63, %v1715_v52  ;;  %v1714_v31 = vld [vmem:[%s8099_s5 + $0x3d0] sm:$0xff]  ;;  %v1723_v52 = vld [vmem:[%s8099_s5 + $0x418] sm:$0xff] }
 0x2d4   :  { %8263 = vst [vmem:[#allocation31_spill] sm:$0xff] %v6741_v0  ;;  %8264 = vst [vmem:[#allocation32_spill] sm:$0xff] %v6750_v39  ;;  %v1718_v57 = vld [vmem:[%s8099_s5 + $0x3f0] sm:$0xff] }
 0x2d5   :  { %8265 = vst [vmem:[#allocation33_spill] sm:$0xff] %v6764_v13  ;;  %8266 = vst [vmem:[#allocation34_spill] sm:$0xff] %v6775_v56 }
 0x2d6   :  { %4097 = vmatpush1.bf16.msra.mxu0 %v6741_v0  ;;  %4201 = vmatpush1.bf16.msra.mxu1 %v6750_v39  ;;  %v1716_v0 = vld [vmem:[%s8099_s5 + $0x3e0] sm:$0xff]  ;;  %v6786_v39 = vpack.c.bf16 %v1718_v57, %v1714_v31 }
 0x2d7   :  { %v6777_v25 = vpack.c.bf16 %v1716_v0, %v1712_v29  ;;  %4099 = vmatprep.subr.bf16.mxu0 %v6764_v13  ;;  %v1725_v0 = vld [vmem:[%s8099_s5 + $0x428] sm:$0xff]  ;;  %4203 = vmatprep.subr.bf16.mxu1 %v6775_v56  ;;  %v1727_v29 = vld [vmem:[%s8099_s5 + $0x438] sm:$0xff] }
 0x2d8   :  { %8268 = vst [vmem:[#allocation36_spill] sm:$0xff] %v6786_v39  ;;  %v6799_v63 = vpack.c.bf16 %v1725_v0, %v1721_v40  ;;  %v6805_v31 = vpack.c.bf16 %v1727_v29, %v1723_v52 }
 0x2d9   :  { %8267 = vst [vmem:[#allocation35_spill] sm:$0xff] %v6777_v25 }
 0x2da   :  { %4101 = vmatpush1.bf16.msra.mxu0 %v6777_v25  ;;  %8269 = vst [vmem:[#allocation37_spill] sm:$0xff] %v6799_v63  ;;  %4205 = vmatpush1.bf16.msra.mxu1 %v6786_v39  ;;  %8270 = vst [vmem:[#allocation38_spill] sm:$0xff] %v6805_v31 }
 0x2db   :  { %4103 = vmatprep.subr.bf16.mxu0 %v6799_v63  ;;  %4207 = vmatprep.subr.bf16.mxu1 %v6805_v31 }
 0x36f   :  { %v6809_v57 = vpop.f32.mrb[10].mxu0  ;;  %v6811_v13 = vpop.f32.mrb[6].mxu1 }
 0x370   :  { %8271 = vst [vmem:[#allocation39_spill] sm:$0xff] %v6811_v13  ;;  %v1804_v40 = vsel %vm97_vm0, %v6809_v57, 0.0  ;;  %v6815_v0 = vpop.f32.mrb[11].mxu0  ;;  %v6817_v25 = vpop.f32.mrb[7].mxu1 }
 0x371   :  { %8272 = vst [vmem:[#allocation40_spill] sm:$0xff] %v6815_v0  ;;  %8273 = vst [vmem:[#allocation41_spill] sm:$0xff] %v6817_v25  ;;  %v1805_v56 = vrot.slane %v1804_v40, 4  ;;  %v1811_v52 = vsel %vm97_vm0, %v6815_v0, 0.0  ;;  %v1826_v63 = vsel %vm1825_vm10, %v6817_v25, 0.0  ;;  %v1836_v32 = vmul.f32 %v6817_v25, %v6817_v25  ;;  %v1728_v25 = vld [vmem:[%s8099_s5 + $0x440] sm:$0xff] }
 0x372   :  { %v1812_v29 = vrot.slane %v1811_v52, 4  ;;  %v1827_v30 = vrot.slane %v1826_v63, 4 }
 0x373   :  { %v1806_v31 = vadd.f32 %v1805_v56, %v1804_v40  ;;  %v6824_v37 = vsel %vm1825_vm10, %v1836_v32, 0.0  ;;  %v1724_v56 = vld [vmem:[%s8099_s5 + $0x420] sm:$0xff]  ;;  %v1722_v40 = vld [vmem:[%s8099_s5 + $0x410] sm:$0xff] }
 0x374   :  { %v1813_v39 = vadd.f32 %v1812_v29, %v1811_v52  ;;  %v1828_v50 = vadd.f32 %v1827_v30, %v1826_v63  ;;  %8274 = vst [vmem:[#allocation42_spill] sm:$0xff] %v6824_v37  ;;  %v1726_v32 = vld [vmem:[%s8099_s5 + $0x430] sm:$0xff]  ;;  %v1731_v63 = vld [vmem:[%s8099_s5 + $0x458] sm:$0xff]  ;;  %v1732_v37 = vld [vmem:[%s8099_s5 + $0x460] sm:$0xff] }
 0x375   :  { %v1807_v11 = vrot.slane %v1806_v31, 2 }
 0x376   :  { %v1814_v45 = vrot.slane %v1813_v39, 2  ;;  %v1829_v51 = vrot.slane %v1828_v50, 2 }
 0x377   :  { %v1808_v27 = vadd.f32 %v1807_v11, %v1806_v31  ;;  %v1735_v31 = vld [vmem:[%s8099_s5 + $0x478] sm:$0xff] }
 0x378   :  { %v1815_v41 = vadd.f32 %v1814_v45, %v1813_v39  ;;  %v1830_v11 = vadd.f32 %v1829_v51, %v1828_v50  ;;  %v1729_v45 = vld [vmem:[%s8099_s5 + $0x448] sm:$0xff]  ;;  %v6850_v51 = vpack.c.bf16 %v1724_v56, %v1720_v12  ;;  %v6852_v50 = vpack.c.bf16 %v1726_v32, %v1722_v40  ;;  %v1734_v12 = vld [vmem:[%s8099_s5 + $0x470] sm:$0xff]  ;;  %v1743_v32 = vld [vmem:[%s8099_s5 + $0x4b8] sm:$0xff] }
 0x379   :  { %v1809_v53 = vrot.slane %v1808_v27, 1  ;;  %v1733_v39 = vld [vmem:[%s8099_s5 + $0x468] sm:$0xff]  ;;  %v6871_v40 = vpack.c.bf16 %v1735_v31, %v1731_v63  ;;  %v1736_v63 = vld [vmem:[%s8099_s5 + $0x480] sm:$0xff] }
 0x37a   :  { %v1816_v30 = vrot.slane %v1815_v41, 1  ;;  %v1831_v52 = vrot.slane %v1830_v11, 1  ;;  %8275 = vst [vmem:[#allocation43_spill] sm:$0xff] %v6852_v50  ;;  %v6869_v56 = vpack.c.bf16 %v1733_v39, %v1729_v45  ;;  %v6884_v45 = vpack.c.bf16 %v1732_v37, %v1728_v25  ;;  %v1740_v31 = vld [vmem:[%s8099_s5 + $0x4a0] sm:$0xff]  ;;  %v1742_v37 = vld [vmem:[%s8099_s5 + $0x4b0] sm:$0xff]  ;;  %v1745_v25 = vld [vmem:[%s8099_s5 + $0x4c8] sm:$0xff] }
 0x37b   :  { %v1810_v20 = vadd.f32 %v1809_v53, %v1808_v27  ;;  %8277 = vst [vmem:[#allocation45_spill] sm:$0xff] %v6871_v40  ;;  %v1741_v53 = vld [vmem:[%s8099_s5 + $0x4a8] sm:$0xff]  ;;  %v1739_v27 = vld [vmem:[%s8099_s5 + $0x498] sm:$0xff]  ;;  %v6886_v39 = vpack.c.bf16 %v1734_v12, %v1730_v34  ;;  %v1738_v34 = vld [vmem:[%s8099_s5 + $0x490] sm:$0xff] }
 0x37c   :  { %v1817_v29 = vadd.f32 %v1816_v30, %v1815_v41  ;;  %v1737_v41 = vld [vmem:[%s8099_s5 + $0x488] sm:$0xff]  ;;  %8276 = vst [vmem:[#allocation44_spill] sm:$0xff] %v6869_v56  ;;  %v1832_v30 = vadd.f32 %v1831_v52, %v1830_v11  ;;  %8278 = vst [vmem:[#allocation46_spill] sm:$0xff] %v6884_v45  ;;  %v6898_v11 = vpack.c.bf16 %v1743_v32, %v1739_v27  ;;  %v1751_v12 = vld [vmem:[%s8099_s5 + $0x4f8] sm:$0xff] }
 0x37d   :  { %8279 = vst [vmem:[#allocation47_spill] sm:$0xff] %v6886_v39  ;;  %v1749_v52 = vld [vmem:[%s8099_s5 + $0x4e8] sm:$0xff]  ;;  %v1744_v27 = vld [vmem:[%s8099_s5 + $0x4c0] sm:$0xff] }
 0x37e   :  { %1946 = vmatprep.mubr.f32.mxu0 %v1817_v29  ;;  %2088 = vmatprep.mubr.f32.mxu1 %v1817_v29  ;;  %8281 = vst [vmem:[#allocation49_spill] sm:$0xff] %v6898_v11  ;;  %v1747_v29 = vld [vmem:[%s8099_s5 + $0x4d8] sm:$0xff]  ;;  %v1748_v32 = vld [vmem:[%s8099_s5 + $0x4e0] sm:$0xff] }
 0x37f   :  { %1947 = vmatmul.mubr.f32.vlgmr.msra.gmra.mrb[12].mxu0 %v1810_v20  ;;  %2089 = vmatmul.mubr.f32.vlgmr.msra.gmra.mrb[8].mxu1 %v1810_v20  ;;  %v6896_v20 = vpack.c.bf16 %v1741_v53, %v1737_v41  ;;  %v6922_v41 = vpack.c.bf16 %v1740_v31, %v1736_v63  ;;  %v6924_v53 = vpack.c.bf16 %v1742_v37, %v1738_v34  ;;  %v1746_v63 = vld [vmem:[%s8099_s5 + $0x4d0] sm:$0xff]  ;;  %v1753_v34 = vld [vmem:[%s8099_s5 + $0x508] sm:$0xff] }
 0x380   :  { %4105 = vmatpush1.bf16.msra.mxu0 %v6850_v51  ;;  %4209 = vmatpush1.bf16.msra.mxu1 %v6852_v50  ;;  %v1750_v31 = vld [vmem:[%s8099_s5 + $0x4f0] sm:$0xff]  ;;  %v1757_v37 = vld [vmem:[%s8099_s5 + $0x528] sm:$0xff] }
 0x381   :  { %3326 = vmatprep.mubr.msk.f32.mxu0 %vm1865_vm11, %v1832_v30  ;;  %3329 = vmatprep.mubr.msk.f32.mxu1 %vm1865_vm11, %v1832_v30  ;;  %8280 = vst [vmem:[#allocation48_spill] sm:$0xff] %v6896_v20  ;;  %8282 = vst [vmem:[#allocation50_spill] sm:$0xff] %v6922_v41  ;;  %v6934_v30 = vpack.c.bf16 %v1749_v52, %v1745_v25  ;;  %v1755_v25 = vld [vmem:[%s8099_s5 + $0x518] sm:$0xff] }
 0x382   :  { %4107 = vmatprep.subr.bf16.mxu0 %v6869_v56  ;;  %4211 = vmatprep.subr.bf16.mxu1 %v6871_v40  ;;  %8283 = vst [vmem:[#allocation51_spill] sm:$0xff] %v6924_v53  ;;  %v1759_v52 = vld [vmem:[%s8099_s5 + $0x538] sm:$0xff]  ;;  %v1788_v56 = vld [vmem:[%s8099_s5 + $0x620] sm:$0xff] }
 0x383   :  { %8284 = vst [vmem:[#allocation52_spill] sm:$0xff] %v6934_v30 }
 0x384   :  { %4109 = vmatpush1.bf16.msra.mxu0 %v6884_v45  ;;  %4213 = vmatpush1.bf16.msra.mxu1 %v6886_v39  ;;  %v6936_v45 = vpack.c.bf16 %v1751_v12, %v1747_v29  ;;  %v6958_v29 = vpack.c.bf16 %v1748_v32, %v1744_v27  ;;  %v6960_v12 = vpack.c.bf16 %v1750_v31, %v1746_v63  ;;  %v1754_v27 = vld [vmem:[%s8099_s5 + $0x510] sm:$0xff]  ;;  %v1761_v63 = vld [vmem:[%s8099_s5 + $0x548] sm:$0xff] }
 0x385   :  { %4111 = vmatprep.subr.bf16.mxu0 %v6896_v20  ;;  %4215 = vmatprep.subr.bf16.mxu1 %v6898_v11  ;;  %v1752_v11 = vld [vmem:[%s8099_s5 + $0x500] sm:$0xff]  ;;  %v6970_v39 = vpack.c.bf16 %v1757_v37, %v1753_v34  ;;  %v1758_v32 = vld [vmem:[%s8099_s5 + $0x530] sm:$0xff]  ;;  %v1765_v31 = vld [vmem:[%s8099_s5 + $0x568] sm:$0xff] }
 0x386   :  { %8285 = vst [vmem:[#allocation53_spill] sm:$0xff] %v6936_v45  ;;  %8286 = vst [vmem:[#allocation54_spill] sm:$0xff] %v6958_v29  ;;  %v1756_v20 = vld [vmem:[%s8099_s5 + $0x520] sm:$0xff]  ;;  %v1763_v34 = vld [vmem:[%s8099_s5 + $0x558] sm:$0xff] }
 0x387   :  { %8287 = vst [vmem:[#allocation55_spill] sm:$0xff] %v6960_v12  ;;  %8288 = vst [vmem:[#allocation56_spill] sm:$0xff] %v6970_v39  ;;  %v1767_v37 = vld [vmem:[%s8099_s5 + $0x578] sm:$0xff] }
 0x388   :  { %4113 = vmatpush1.bf16.msra.mxu0 %v6922_v41  ;;  %4217 = vmatpush1.bf16.msra.mxu1 %v6924_v53  ;;  %v6972_v41 = vpack.c.bf16 %v1759_v52, %v1755_v25  ;;  %v6994_v25 = vpack.c.bf16 %v1756_v20, %v1752_v11  ;;  %v6996_v52 = vpack.c.bf16 %v1758_v32, %v1754_v27  ;;  %v1762_v20 = vld [vmem:[%s8099_s5 + $0x550] sm:$0xff]  ;;  %v1769_v27 = vld [vmem:[%s8099_s5 + $0x588] sm:$0xff] }
 0x389   :  { %4115 = vmatprep.subr.bf16.mxu0 %v6934_v30  ;;  %4219 = vmatprep.subr.bf16.mxu1 %v6936_v45  ;;  %v1760_v45 = vld [vmem:[%s8099_s5 + $0x540] sm:$0xff]  ;;  %v7006_v53 = vpack.c.bf16 %v1765_v31, %v1761_v63  ;;  %v1766_v11 = vld [vmem:[%s8099_s5 + $0x570] sm:$0xff]  ;;  %v1834_v32 = vmul.f32 %v6815_v0, %v6815_v0  ;;  %v1773_v63 = vld [vmem:[%s8099_s5 + $0x5a8] sm:$0xff] }
 0x38a   :  { %8289 = vst [vmem:[#allocation57_spill] sm:$0xff] %v6972_v41  ;;  %8290 = vst [vmem:[#allocation58_spill] sm:$0xff] %v6994_v25  ;;  %v1764_v30 = vld [vmem:[%s8099_s5 + $0x560] sm:$0xff]  ;;  %v1771_v31 = vld [vmem:[%s8099_s5 + $0x598] sm:$0xff] }
 0x38b   :  { %8291 = vst [vmem:[#allocation59_spill] sm:$0xff] %v6996_v52  ;;  %8292 = vst [vmem:[#allocation60_spill] sm:$0xff] %v7006_v53  ;;  %v7034_v0 = vpack.c.bf16 %v1764_v30, %v1760_v45  ;;  %v1770_v45 = vld [vmem:[%s8099_s5 + $0x590] sm:$0xff] }
 0x38c   :  { %4117 = vmatpush1.bf16.msra.mxu0 %v6958_v29  ;;  %4221 = vmatpush1.bf16.msra.mxu1 %v6960_v12  ;;  %v7008_v29 = vpack.c.bf16 %v1767_v37, %v1763_v34  ;;  %v1775_v34 = vld [vmem:[%s8099_s5 + $0x5b8] sm:$0xff]  ;;  %v1818_v37 = vsel %vm97_vm0, %v6811_v13, 0.0  ;;  %v1772_v12 = vld [vmem:[%s8099_s5 + $0x5a0] sm:$0xff]  ;;  %v7046_v13 = vpack.c.bf16 %v1773_v63, %v1769_v27  ;;  %v1774_v30 = vld [vmem:[%s8099_s5 + $0x5b0] sm:$0xff] }
 0x38d   :  { %4119 = vmatprep.subr.bf16.mxu0 %v6970_v39  ;;  %4223 = vmatprep.subr.bf16.mxu1 %v6972_v41  ;;  %8294 = vst [vmem:[#allocation62_spill] sm:$0xff] %v7034_v0  ;;  %v7036_v41 = vpack.c.bf16 %v1766_v11, %v1762_v20  ;;  %v1768_v39 = vld [vmem:[%s8099_s5 + $0x580] sm:$0xff]  ;;  %v1777_v20 = vld [vmem:[%s8099_s5 + $0x5c8] sm:$0xff]  ;;  %v1844_v11 = vsel %vm97_vm0, %v1834_v32, 0.0  ;;  %v1779_v63 = vld [vmem:[%s8099_s5 + $0x5d8] sm:$0xff]  ;;  %v7073_v32 = vpack.c.bf16 %v1774_v30, %v1770_v45 }
 0x38e   :  { %8293 = vst [vmem:[#allocation61_spill] sm:$0xff] %v7008_v29  ;;  %8296 = vst [vmem:[#allocation64_spill] sm:$0xff] %v7046_v13  ;;  %v1781_v27 = vld [vmem:[%s8099_s5 + $0x5e8] sm:$0xff]  ;;  %v1845_v40 = vrot.slane %v1844_v11, 4 }
 0x38f   :  { %8295 = vst [vmem:[#allocation63_spill] sm:$0xff] %v7036_v41  ;;  %v1785_v45 = vld [vmem:[%s8099_s5 + $0x608] sm:$0xff] }
 0x390   :  { %4121 = vmatpush1.bf16.msra.mxu0 %v6994_v25  ;;  %4225 = vmatpush1.bf16.msra.mxu1 %v6996_v52  ;;  %v7048_v25 = vpack.c.bf16 %v1775_v34, %v1771_v31  ;;  %v1783_v31 = vld [vmem:[%s8099_s5 + $0x5f8] sm:$0xff]  ;;  %v1819_v34 = vrot.slane %v1818_v37, 4  ;;  %v1780_v52 = vld [vmem:[%s8099_s5 + $0x5e0] sm:$0xff]  ;;  %v1789_v30 = vld [vmem:[%s8099_s5 + $0x628] sm:$0xff]  ;;  %v1846_v50 = vadd.f32 %v1845_v40, %v1844_v11 }
 0x391   :  { %4123 = vmatprep.subr.bf16.mxu0 %v7006_v53  ;;  %4227 = vmatprep.subr.bf16.mxu1 %v7008_v29  ;;  %v7071_v29 = vpack.c.bf16 %v1772_v12, %v1768_v39  ;;  %v1776_v53 = vld [vmem:[%s8099_s5 + $0x5c0] sm:$0xff]  ;;  %v1778_v39 = vld [vmem:[%s8099_s5 + $0x5d0] sm:$0xff]  ;;  %v1793_v40 = vld [vmem:[%s8099_s5 + $0x648] sm:$0xff] }
 0x392   :  { %8297 = vst [vmem:[#allocation65_spill] sm:$0xff] %v7048_v25  ;;  %v1782_v12 = vld [vmem:[%s8099_s5 + $0x5f0] sm:$0xff]  ;;  %v1797_v11 = vld [vmem:[%s8099_s5 + $0x668] sm:$0xff] }
 0x394   :  { %4125 = vmatpush1.bf16.msra.mxu0 %v7034_v0  ;;  %4229 = vmatpush1.bf16.msra.mxu1 %v7036_v41  ;;  %v7083_v0 = vpack.c.bf16 %v1781_v27, %v1777_v20  ;;  %v7085_v41 = vpack.c.bf16 %v1783_v31, %v1779_v63  ;;  %v1787_v20 = vld [vmem:[%s8099_s5 + $0x618] sm:$0xff]  ;;  %v1820_v63 = vadd.f32 %v1819_v34, %v1818_v37 }
 0x395   :  { %4127 = vmatprep.subr.bf16.mxu0 %v7046_v13  ;;  %4231 = vmatprep.subr.bf16.mxu1 %v7048_v25  ;;  %v1791_v27 = vld [vmem:[%s8099_s5 + $0x638] sm:$0xff]  ;;  %v7107_v31 = vpack.c.bf16 %v1780_v52, %v1776_v53  ;;  %v7109_v25 = vpack.c.bf16 %v1782_v12, %v1778_v39  ;;  %v1784_v13 = vld [vmem:[%s8099_s5 + $0x600] sm:$0xff]  ;;  %v7119_v37 = vpack.c.bf16 %v1789_v30, %v1785_v45  ;;  %v1786_v53 = vld [vmem:[%s8099_s5 + $0x610] sm:$0xff] }
 0x396   :  { %8298 = vst [vmem:[#allocation66_spill] sm:$0xff] %v7083_v0  ;;  %8299 = vst [vmem:[#allocation67_spill] sm:$0xff] %v7085_v41  ;;  %v7121_v34 = vpack.c.bf16 %v1791_v27, %v1787_v20  ;;  %v1790_v52 = vld [vmem:[%s8099_s5 + $0x630] sm:$0xff]  ;;  %v1795_v39 = vld [vmem:[%s8099_s5 + $0x658] sm:$0xff]  ;;  %v1821_v45 = vrot.slane %v1820_v63, 2  ;;  %v7143_v30 = vpack.c.bf16 %v1788_v56, %v1784_v13 }
 0x397   :  { %8300 = vst [vmem:[#allocation68_spill] sm:$0xff] %v7109_v25  ;;  %v1799_v12 = vld [vmem:[%s8099_s5 + $0x678] sm:$0xff]  ;;  %v7145_v20 = vpack.c.bf16 %v1790_v52, %v1786_v53  ;;  %v1792_v27 = vld [vmem:[%s8099_s5 + $0x640] sm:$0xff]  ;;  %v1794_v13 = vld [vmem:[%s8099_s5 + $0x650] sm:$0xff]  ;;  %v1847_v53 = vrot.slane %v1846_v50, 2 }
 0x398   :  { %4129 = vmatpush1.bf16.msra.mxu0 %v7071_v29  ;;  %4233 = vmatpush1.bf16.msra.mxu1 %v7073_v32  ;;  %v1798_v56 = vld [vmem:[%s8099_s5 + $0x670] sm:$0xff]  ;;  %v1822_v52 = vadd.f32 %v1821_v45, %v1820_v63  ;;  %v7181_v63 = vld [vmem:[%s8099_s5 + $0x698] sm:$0xf] }
 0x399   :  { %4131 = vmatprep.subr.bf16.mxu0 %v7083_v0  ;;  %4235 = vmatprep.subr.bf16.mxu1 %v7085_v41  ;;  %v7152_v41 = vpack.c.bf16 %v1797_v11, %v1793_v40  ;;  %v7154_v0 = vpack.c.bf16 %v1799_v12, %v1795_v39  ;;  %v7169_v11 = vpack.c.bf16 %v1798_v56, %v1794_v13  ;;  %v7176_v12 = vld [vmem:[%s8099_s5 + $0x688] sm:$0xf]  ;;  %v7197_v45 = vld [vmem:[%s8099_s5 + $0x690] sm:$0xf] }
 0x39a   :  { %v1848_v39 = vadd.f32 %v1847_v53, %v1846_v50  ;;  %v7192_v50 = vld [vmem:[%s8099_s5 + $0x680] sm:$0xf] }
 0x39c   :  { %4133 = vmatpush1.bf16.msra.mxu0 %v7107_v31  ;;  %4237 = vmatpush1.bf16.msra.mxu1 %v7109_v25  ;;  %v1796_v25 = vld [vmem:[%s8099_s5 + $0x660] sm:$0xff] }
 0x39d   :  { %4135 = vmatprep.subr.bf16.mxu0 %v7119_v37  ;;  %4239 = vmatprep.subr.bf16.mxu1 %v7121_v34  ;;  %v7167_v40 = vpack.c.bf16 %v1796_v25, %v1792_v27  ;;  %v1823_v25 = vrot.slane %v1822_v52, 1  ;;  %v1849_v27 = vrot.slane %v1848_v39, 1 }
 0x39f   :  { %v1824_v13 = vadd.f32 %v1823_v25, %v1822_v52  ;;  %v1850_v56 = vadd.f32 %v1849_v27, %v1848_v39  ;;  %v8328_v52 = vld [vmem:[#allocation43_spill] sm:$0xff]  ;;  %v8329_v39 = vld [vmem:[#allocation44_spill] sm:$0xff]  ;;  %v8330_v25 = vld [vmem:[#allocation45_spill] sm:$0xff] }
 0x3a0   :  { %4137 = vmatpush1.bf16.msra.mxu0 %v7143_v30  ;;  %4241 = vmatpush1.bf16.msra.mxu1 %v7145_v20  ;;  %v8331_v27 = vld [vmem:[#allocation46_spill] sm:$0xff] }
 0x3a1   :  { %4139 = vmatprep.subr.bf16.mxu0 %v7152_v41  ;;  %4243 = vmatprep.subr.bf16.mxu1 %v7154_v0 }
 0x3a4   :  { %4141 = vmatpush1.bf16.msra.mxu0 %v7167_v40  ;;  %4245 = vmatpush1.bf16.msra.mxu1 %v7169_v11 }
 0x3a5   :  { %3324 = vmatprep.subr.msk.mxu0 %vm1869_vm12, %v7176_v12  ;;  %3327 = vmatprep.subr.msk.mxu1 %vm1869_vm12, %v7181_v63 }
 0x3a8   :  { %3325 = vmatpush1.msk.msra.mxu0 %vm1869_vm12, %v7192_v50  ;;  %3328 = vmatpush1.msk.msra.mxu1 %vm1869_vm12, %v7197_v45 }
 0x3a9   :  { %2018 = vmatmul.mubr.f32.vlgmr.msra.gmra.mrb[12].mxu0 %v1824_v13  ;;  %2160 = vmatmul.mubr.f32.vlgmr.msra.gmra.mrb[8].mxu1 %v1824_v13  ;;  %v8332_v13 = vld [vmem:[#allocation47_spill] sm:$0xff] }
 0x3aa   :  { %4247 = vmatprep.subr.bf16.mxu0 %v6248_v21  ;;  %4351 = vmatprep.subr.bf16.mxu1 %v6250_v28  ;;  %v1833_v21 = vmul.f32 %v6809_v57, %v6809_v57  ;;  %v8301_v28 = vld [vmem:[#allocation13_spill] sm:$0xff] }
 0x3ab   :  { %4249 = vmatpush1.bf16.msra.mxu0 %v6252_v48  ;;  %2237 = vmatprep.mubr.f32.mxu0 %v1850_v56 }
 0x3ac   :  { %4353 = vmatpush1.bf16.msra.mxu1 %v6254_v55  ;;  %2379 = vmatprep.mubr.f32.mxu1 %v1850_v56  ;;  %v1837_v48 = vsel %vm97_vm0, %v1833_v21, 0.0  ;;  %v8302_v55 = vld [vmem:[#allocation14_spill] sm:$0xff]  ;;  %v8333_v56 = vld [vmem:[#allocation48_spill] sm:$0xff]  ;;  %v8334_v21 = vld [vmem:[#allocation49_spill] sm:$0xff] }
 0x3ad   :  { %4251 = vmatprep.subr.bf16.mxu0 %v6263_v15  ;;  %4355 = vmatprep.subr.bf16.mxu1 %v6265_v23  ;;  %v8303_v15 = vld [vmem:[#allocation15_spill] sm:$0xff]  ;;  %v1838_v23 = vrot.slane %v1837_v48, 4 }
 0x3af   :  { %4253 = vmatpush1.bf16.msra.mxu0 %v6291_v60  ;;  %v8304_v60 = vld [vmem:[#allocation16_spill] sm:$0xff] }
 0x3b0   :  { %4357 = vmatpush1.bf16.msra.mxu1 %v6293_v6  ;;  %4255 = vmatprep.subr.bf16.mxu0 %v6303_v54  ;;  %v8305_v6 = vld [vmem:[#allocation17_spill] sm:$0xff]  ;;  %v8306_v54 = vld [vmem:[#allocation19_spill] sm:$0xff] }
 0x3b1   :  { %4359 = vmatprep.subr.bf16.mxu1 %v6305_v38  ;;  %v8307_v38 = vld [vmem:[#allocation42_spill] sm:$0xff] }
 0x3b3   :  { %4257 = vmatpush1.bf16.msra.mxu0 %v6327_v22  ;;  %v1859_v22 = vrot.slane %v8307_v38, 4 }
 0x3b4   :  { %4361 = vmatpush1.bf16.msra.mxu1 %v6329_v46  ;;  %4259 = vmatprep.subr.bf16.mxu0 %v6339_v16  ;;  %v8308_v46 = vld [vmem:[#allocation20_spill] sm:$0xff]  ;;  %v1839_v16 = vadd.f32 %v1838_v23, %v1837_v48 }
 0x3b5   :  { %4363 = vmatprep.subr.bf16.mxu1 %v6341_v17  ;;  %v8309_v17 = vld [vmem:[#allocation21_spill] sm:$0xff]  ;;  %v8337_v48 = vld [vmem:[#allocation52_spill] sm:$0xff] }
 0x3b7   :  { %4261 = vmatpush1.bf16.msra.mxu0 %v6363_v42  ;;  %v8310_v42 = vld [vmem:[#allocation22_spill] sm:$0xff] }
 0x3b8   :  { %4365 = vmatpush1.bf16.msra.mxu1 %v6365_v49  ;;  %4263 = vmatprep.subr.bf16.mxu0 %v6375_v58  ;;  %v8311_v49 = vld [vmem:[#allocation23_spill] sm:$0xff]  ;;  %v1860_v58 = vadd.f32 %v1859_v22, %v8307_v38  ;;  %v8343_v38 = vld [vmem:[#allocation57_spill] sm:$0xff] }
 0x3b9   :  { %4367 = vmatprep.subr.bf16.mxu1 %v6377_v2  ;;  %v8312_v2 = vld [vmem:[#allocation24_spill] sm:$0xff] }
 0x3bb   :  { %4265 = vmatpush1.bf16.msra.mxu0 %v6399_v26  ;;  %v1840_v26 = vrot.slane %v1839_v16, 2 }
 0x3bc   :  { %4369 = vmatpush1.bf16.msra.mxu1 %v6401_v33  ;;  %4267 = vmatprep.subr.bf16.mxu0 %v6411_v44  ;;  %v8313_v33 = vld [vmem:[#allocation25_spill] sm:$0xff]  ;;  %v8314_v44 = vld [vmem:[#allocation26_spill] sm:$0xff] }
 0x3bd   :  { %4371 = vmatprep.subr.bf16.mxu1 %v6413_v5  ;;  %v8315_v5 = vld [vmem:[#allocation18_spill] sm:$0xff] }
 0x3bf   :  { %4269 = vmatpush1.bf16.msra.mxu0 %v6435_v8  ;;  %v1861_v8 = vrot.slane %v1860_v58, 2 }
 0x3c0   :  { %4373 = vmatpush1.bf16.msra.mxu1 %v6437_v4  ;;  %4271 = vmatprep.subr.bf16.mxu0 %v6447_v1  ;;  %v8316_v4 = vld [vmem:[#allocation27_spill] sm:$0xff]  ;;  %v1841_v1 = vadd.f32 %v1840_v26, %v1839_v16  ;;  %v8350_v26 = vld [vmem:[#allocation64_spill] sm:$0xff] }
 0x3c1   :  { %4375 = vmatprep.subr.bf16.mxu1 %v6449_v14  ;;  %v8317_v14 = vld [vmem:[#allocation28_spill] sm:$0xff]  ;;  %v8345_v16 = vld [vmem:[#allocation59_spill] sm:$0xff] }
 0x3c3   :  { %4273 = vmatpush1.bf16.msra.mxu0 %v6471_v7  ;;  %v8318_v7 = vld [vmem:[#allocation29_spill] sm:$0xff] }
 0x3c4   :  { %4377 = vmatpush1.bf16.msra.mxu1 %v6473_v24  ;;  %4275 = vmatprep.subr.bf16.mxu0 %v6483_v35  ;;  %v8319_v24 = vld [vmem:[#allocation30_spill] sm:$0xff]  ;;  %v1862_v35 = vadd.f32 %v1861_v8, %v1860_v58  ;;  %v8353_v8 = vld [vmem:[#allocation67_spill] sm:$0xff] }
 0x3c5   :  { %4379 = vmatprep.subr.bf16.mxu1 %v6485_v36  ;;  %v8320_v36 = vld [vmem:[#allocation31_spill] sm:$0xff]  ;;  %v8348_v58 = vld [vmem:[#allocation62_spill] sm:$0xff] }
 0x3c7   :  { %4277 = vmatpush1.bf16.msra.mxu0 %v6507_v18  ;;  %v8321_v18 = vld [vmem:[#allocation32_spill] sm:$0xff] }
 0x3c8   :  { %4381 = vmatpush1.bf16.msra.mxu1 %v6509_v19  ;;  %4279 = vmatprep.subr.bf16.mxu0 %v6519_v43  ;;  %v8322_v19 = vld [vmem:[#allocation33_spill] sm:$0xff]  ;;  %v1842_v43 = vrot.slane %v1841_v1, 1 }
 0x3c9   :  { %4383 = vmatprep.subr.bf16.mxu1 %v6521_v61  ;;  %v8323_v61 = vld [vmem:[#allocation34_spill] sm:$0xff] }
 0x3cb   :  { %4281 = vmatpush1.bf16.msra.mxu0 %v6543_v9  ;;  %v1863_v9 = vrot.slane %v1862_v35, 1 }
 0x3cc   :  { %4385 = vmatpush1.bf16.msra.mxu1 %v6545_v47  ;;  %4283 = vmatprep.subr.bf16.mxu0 %v6555_v59  ;;  %v8324_v47 = vld [vmem:[#allocation35_spill] sm:$0xff]  ;;  %v8325_v59 = vld [vmem:[#allocation36_spill] sm:$0xff] }
 0x3cd   :  { %4387 = vmatprep.subr.bf16.mxu1 %v6557_v62  ;;  %v1843_v62 = vadd.f32 %v1842_v43, %v1841_v1  ;;  %v1864_v53 = vadd.f32 %v1863_v9, %v1862_v35  ;;  %v8354_v1 = vld [vmem:[#allocation68_spill] sm:$0xff] }
 0x3ce   :  { %v2615_v9 = vld [vmem:[%s8097_s3 + $0x60] sm:$0xff] }
 0x3cf   :  { %4285 = vmatpush1.bf16.msra.mxu0 %v6579_v3  ;;  %v8326_v3 = vld [vmem:[#allocation37_spill] sm:$0xff] }
 0x3d0   :  { %4389 = vmatpush1.bf16.msra.mxu1 %v6581_v10  ;;  %4287 = vmatprep.subr.bf16.mxu0 %v8301_v28  ;;  %v8327_v10 = vld [vmem:[#allocation38_spill] sm:$0xff] }
 0x3d1   :  { %4391 = vmatprep.subr.bf16.mxu1 %v8302_v55  ;;  %v8335_v28 = vld [vmem:[#allocation50_spill] sm:$0xff]  ;;  %v8338_v55 = vld [vmem:[#allocation53_spill] sm:$0xff] }
 0x3d3   :  { %4289 = vmatpush1.bf16.msra.mxu0 %v8303_v15  ;;  %v8339_v15 = vld [vmem:[#allocation39_spill] sm:$0xff] }
 0x3d4   :  { %4393 = vmatpush1.bf16.msra.mxu1 %v8304_v60  ;;  %4291 = vmatprep.subr.bf16.mxu0 %v8305_v6  ;;  %v1835_v23 = vmul.f32 %v8339_v15, %v8339_v15  ;;  %v8340_v60 = vld [vmem:[#allocation54_spill] sm:$0xff]  ;;  %v8341_v6 = vld [vmem:[#allocation55_spill] sm:$0xff] }
 0x3d5   :  { %4395 = vmatprep.subr.bf16.mxu1 %v8306_v54  ;;  %v8342_v54 = vld [vmem:[#allocation56_spill] sm:$0xff] }
 0x3d6   :  { %v1851_v22 = vsel %vm97_vm0, %v1835_v23, 0.0  ;;  %v2627_v23 = vld [vmem:[%s8097_s3 + $0xc0] sm:$0xff] }
 0x3d7   :  { %4293 = vmatpush1.bf16.msra.mxu0 %v8308_v46  ;;  %v8344_v46 = vld [vmem:[#allocation58_spill] sm:$0xff] }
 0x3d8   :  { %4397 = vmatpush1.bf16.msra.mxu1 %v8309_v17  ;;  %4295 = vmatprep.subr.bf16.mxu0 %v8310_v42  ;;  %v8346_v17 = vld [vmem:[#allocation60_spill] sm:$0xff]  ;;  %v8347_v42 = vld [vmem:[#allocation61_spill] sm:$0xff] }
 0x3d9   :  { %4399 = vmatprep.subr.bf16.mxu1 %v8311_v49  ;;  %v1852_v49 = vrot.slane %v1851_v22, 4 }
 0x3db   :  { %4297 = vmatpush1.bf16.msra.mxu0 %v8312_v2  ;;  %v8349_v2 = vld [vmem:[#allocation63_spill] sm:$0xff] }
 0x3dc   :  { %4401 = vmatpush1.bf16.msra.mxu1 %v8313_v33  ;;  %4299 = vmatprep.subr.bf16.mxu0 %v8314_v44  ;;  %v8351_v33 = vld [vmem:[#allocation65_spill] sm:$0xff]  ;;  %v1853_v44 = vadd.f32 %v1852_v49, %v1851_v22  ;;  %v2638_v49 = vld [vmem:[%s8097_s3 + $0x118] sm:$0xff] }
 0x3dd   :  { %4403 = vmatprep.subr.bf16.mxu1 %v8315_v5  ;;  %v8352_v5 = vld [vmem:[#allocation66_spill] sm:$0xff] }
 0x3df   :  { %4301 = vmatpush1.bf16.msra.mxu0 %v8316_v4  ;;  %v1854_v4 = vrot.slane %v1853_v44, 2 }
 0x3e0   :  { %4405 = vmatpush1.bf16.msra.mxu1 %v8317_v14  ;;  %4303 = vmatprep.subr.bf16.mxu0 %v8318_v7  ;;  %v2609_v7 = vld [vmem:[%s8097_s3 + $0x30] sm:$0xff] }
 0x3e1   :  { %4407 = vmatprep.subr.bf16.mxu1 %v8319_v24  ;;  %v1855_v14 = vadd.f32 %v1854_v4, %v1853_v44  ;;  %v2640_v44 = vld [vmem:[%s8097_s3 + $0x128] sm:$0xff]  ;;  %v2639_v4 = vld [vmem:[%s8097_s3 + $0x120] sm:$0xff] }
 0x3e3   :  { %4305 = vmatpush1.bf16.msra.mxu0 %v8320_v36  ;;  %v2611_v36 = vld [vmem:[%s8097_s3 + $0x40] sm:$0xff] }
 0x3e4   :  { %4409 = vmatpush1.bf16.msra.mxu1 %v8321_v18  ;;  %4307 = vmatprep.subr.bf16.mxu0 %v8322_v19  ;;  %v2616_v18 = vld [vmem:[%s8097_s3 + $0x68] sm:$0xff]  ;;  %v2618_v19 = vld [vmem:[%s8097_s3 + $0x78] sm:$0xff] }
 0x3e5   :  { %4411 = vmatprep.subr.bf16.mxu1 %v8323_v61  ;;  %v4466_v61 = vpack.c.bf16 %v2618_v19, %v2616_v18  ;;  %v2652_v19 = vld [vmem:[%s8097_s3 + $0x188] sm:$0xff] }
 0x3e7   :  { %4309 = vmatpush1.bf16.msra.mxu0 %v8324_v47  ;;  %v2617_v47 = vld [vmem:[%s8097_s3 + $0x70] sm:$0xff] }
 0x3e8   :  { %4413 = vmatpush1.bf16.msra.mxu1 %v8325_v59  ;;  %4311 = vmatprep.subr.bf16.mxu0 %v8326_v3  ;;  %v2620_v59 = vld [vmem:[%s8097_s3 + $0x88] sm:$0xff]  ;;  %v4468_v3 = vpack.c.bf16 %v2617_v47, %v2615_v9  ;;  %v2653_v9 = vld [vmem:[%s8097_s3 + $0x190] sm:$0xff] }
 0x3e9   :  { %4415 = vmatprep.subr.bf16.mxu1 %v8327_v10 }
 0x3ea   :  { %2238 = vmatmul.mubr.f32.vlgmr.msra.gmra.mrb[14].mxu0 %v1843_v62 }
 0x3eb   :  { %2380 = vmatmul.mubr.f32.vlgmr.msra.gmra.mrb[10].mxu1 %v1843_v62  ;;  %4313 = vmatpush1.bf16.msra.mxu0 %v6850_v51  ;;  %v8336_v51 = vld [vmem:[#allocation51_spill] sm:$0xff] }
 0x3ec   :  { %3332 = vmatprep.mubr.msk.f32.mxu0 %vm1865_vm11, %v1864_v53  ;;  %4417 = vmatpush1.bf16.msra.mxu1 %v8328_v52  ;;  %v2622_v62 = vld [vmem:[%s8097_s3 + $0x98] sm:$0xff]  ;;  %v2621_v52 = vld [vmem:[%s8097_s3 + $0x90] sm:$0xff] }
 0x3ed   :  { %3335 = vmatprep.mubr.msk.f32.mxu1 %vm1865_vm11, %v1864_v53  ;;  %4315 = vmatprep.subr.bf16.mxu0 %v8329_v39  ;;  %v4470_v10 = vpack.c.bf16 %v2622_v62, %v2620_v59  ;;  %v2619_v53 = vld [vmem:[%s8097_s3 + $0x80] sm:$0xff]  ;;  %v2624_v39 = vld [vmem:[%s8097_s3 + $0xa8] sm:$0xff] }
 0x3ee   :  { %4419 = vmatprep.subr.bf16.mxu1 %v8330_v25  ;;  %v2626_v25 = vld [vmem:[%s8097_s3 + $0xb8] sm:$0xff] }
 0x3ef   :  { %4317 = vmatpush1.bf16.msra.mxu0 %v8331_v27  ;;  %v4472_v27 = vpack.c.bf16 %v2621_v52, %v2619_v53 }
 0x3f0   :  { %4421 = vmatpush1.bf16.msra.mxu1 %v8332_v13  ;;  %4319 = vmatprep.subr.bf16.mxu0 %v8333_v56  ;;  %v4474_v13 = vpack.c.bf16 %v2626_v25, %v2624_v39  ;;  %v2623_v56 = vld [vmem:[%s8097_s3 + $0xa0] sm:$0xff]  ;;  %v2656_v39 = vld [vmem:[%s8097_s3 + $0x1a8] sm:$0xff]  ;;  %v2658_v25 = vld [vmem:[%s8097_s3 + $0x1b8] sm:$0xff] }
 0x3f1   :  { %4423 = vmatprep.subr.bf16.mxu1 %v8334_v21  ;;  %v2625_v21 = vld [vmem:[%s8097_s3 + $0xb0] sm:$0xff] }
 0x3f3   :  { %4321 = vmatpush1.bf16.msra.mxu0 %v8335_v28  ;;  %v4476_v28 = vpack.c.bf16 %v2625_v21, %v2623_v56  ;;  %v2657_v56 = vld [vmem:[%s8097_s3 + $0x1b0] sm:$0xff] }
 0x3f4   :  { %4425 = vmatpush1.bf16.msra.mxu1 %v8336_v51  ;;  %4323 = vmatprep.subr.bf16.mxu0 %v8337_v48  ;;  %v2628_v51 = vld [vmem:[%s8097_s3 + $0xc8] sm:$0xff]  ;;  %v2630_v48 = vld [vmem:[%s8097_s3 + $0xd8] sm:$0xff] }
 0x3f5   :  { %4427 = vmatprep.subr.bf16.mxu1 %v8338_v55  ;;  %v4478_v55 = vpack.c.bf16 %v2630_v48, %v2628_v51  ;;  %v2660_v51 = vld [vmem:[%s8097_s3 + $0x1c8] sm:$0xff]  ;;  %v2662_v48 = vld [vmem:[%s8097_s3 + $0x1d8] sm:$0xff] }
 0x3f7   :  { %4325 = vmatpush1.bf16.msra.mxu0 %v8340_v60  ;;  %v2629_v60 = vld [vmem:[%s8097_s3 + $0xd0] sm:$0xff] }
 0x3f8   :  { %4429 = vmatpush1.bf16.msra.mxu1 %v8341_v6  ;;  %4327 = vmatprep.subr.bf16.mxu0 %v8342_v54  ;;  %v4480_v6 = vpack.c.bf16 %v2629_v60, %v2627_v23  ;;  %v2632_v54 = vld [vmem:[%s8097_s3 + $0xe8] sm:$0xff]  ;;  %v2659_v23 = vld [vmem:[%s8097_s3 + $0x1c0] sm:$0xff]  ;;  %v2661_v60 = vld [vmem:[%s8097_s3 + $0x1d0] sm:$0xff] }
 0x3f9   :  { %4431 = vmatprep.subr.bf16.mxu1 %v8343_v38  ;;  %v2634_v38 = vld [vmem:[%s8097_s3 + $0xf8] sm:$0xff] }
 0x3fa   :  { %v4482_v22 = vpack.c.bf16 %v2634_v38, %v2632_v54  ;;  %v2666_v54 = vld [vmem:[%s8097_s3 + $0x1f8] sm:$0xff]  ;;  %v4512_v38 = vpack.c.bf16 %v2661_v60, %v2659_v23 }
 0x3fb   :  { %4329 = vmatpush1.bf16.msra.mxu0 %v8344_v46  ;;  %v2631_v46 = vld [vmem:[%s8097_s3 + $0xe0] sm:$0xff]  ;;  %v2891_v23 = vld [vmem:[%s8100_s6 + $0xf8] sm:$0xff] }
 0x3fc   :  { %4433 = vmatpush1.bf16.msra.mxu1 %v8345_v16  ;;  %4331 = vmatprep.subr.bf16.mxu0 %v8346_v17  ;;  %v2633_v16 = vld [vmem:[%s8097_s3 + $0xf0] sm:$0xff] }
 0x3fd   :  { %4435 = vmatprep.subr.bf16.mxu1 %v8347_v42  ;;  %v4484_v17 = vpack.c.bf16 %v2633_v16, %v2631_v46  ;;  %v2636_v42 = vld [vmem:[%s8097_s3 + $0x108] sm:$0xff]  ;;  %v2663_v46 = vld [vmem:[%s8097_s3 + $0x1e0] sm:$0xff]  ;;  %v2665_v16 = vld [vmem:[%s8097_s3 + $0x1f0] sm:$0xff] }
 0x3ff   :  { %4333 = vmatpush1.bf16.msra.mxu0 %v8348_v58  ;;  %v4486_v58 = vpack.c.bf16 %v2638_v49, %v2636_v42  ;;  %v2668_v42 = vld [vmem:[%s8097_s3 + $0x208] sm:$0xff]  ;;  %v2670_v49 = vld [vmem:[%s8097_s3 + $0x218] sm:$0xff] }
 0x400   :  { %4437 = vmatpush1.bf16.msra.mxu1 %v8349_v2  ;;  %4335 = vmatprep.subr.bf16.mxu0 %v8350_v26  ;;  %v2635_v2 = vld [vmem:[%s8097_s3 + $0x100] sm:$0xff]  ;;  %v2637_v26 = vld [vmem:[%s8097_s3 + $0x110] sm:$0xff] }
 0x401   :  { %4439 = vmatprep.subr.bf16.mxu1 %v8351_v33  ;;  %v4488_v33 = vpack.c.bf16 %v2637_v26, %v2635_v2  ;;  %v2861_v2 = vld [vmem:[%s8100_s6 + $0x8] sm:$0xff]  ;;  %v2863_v26 = vld [vmem:[%s8100_s6 + $0x18] sm:$0xff] }
 0x403   :  { %4337 = vmatpush1.bf16.msra.mxu0 %v7071_v29  ;;  %v1856_v29 = vrot.slane %v1855_v14, 1 }
 0x404   :  { %4441 = vmatpush1.bf16.msra.mxu1 %v7073_v32  ;;  %4339 = vmatprep.subr.bf16.mxu0 %v8352_v5  ;;  %v2604_v32 = vld [vmem:[%s8097_s3 + $0x8] sm:$0xff]  ;;  %v2642_v5 = vld [vmem:[%s8097_s3 + $0x138] sm:$0xff] }
 0x405   :  { %4443 = vmatprep.subr.bf16.mxu1 %v8353_v8  ;;  %v4490_v8 = vpack.c.bf16 %v2642_v5, %v2640_v44  ;;  %v7552_v44 = vpack.c.bf16 %v2863_v26, %v2861_v2  ;;  %v2862_v5 = vld [vmem:[%s8100_s6 + $0x10] sm:$0xff] }
 0x407   :  { %4341 = vmatpush1.bf16.msra.mxu0 %v7107_v31  ;;  %v2606_v31 = vld [vmem:[%s8097_s3 + $0x18] sm:$0xff] }
 0x408   :  { %4445 = vmatpush1.bf16.msra.mxu1 %v8354_v1  ;;  %4343 = vmatprep.subr.bf16.mxu0 %v7119_v37  ;;  %v2603_v37 = vld [vmem:[%s8097_s3] sm:$0xff]  ;;  %v2641_v1 = vld [vmem:[%s8097_s3 + $0x130] sm:$0xff] }
 0x409   :  { %4447 = vmatprep.subr.bf16.mxu1 %v7121_v34  ;;  %v2610_v34 = vld [vmem:[%s8097_s3 + $0x38] sm:$0xff] }
 0x40b   :  { %4345 = vmatpush1.bf16.msra.mxu0 %v7143_v30  ;;  %v4454_v30 = vpack.c.bf16 %v2606_v31, %v2604_v32  ;;  %v2646_v32 = vld [vmem:[%s8097_s3 + $0x158] sm:$0xff] }
 0x40c   :  { %4449 = vmatpush1.bf16.msra.mxu1 %v7145_v20  ;;  %4347 = vmatprep.subr.bf16.mxu0 %v7152_v41  ;;  %v2605_v41 = vld [vmem:[%s8097_s3 + $0x10] sm:$0xff]  ;;  %v1857_v20 = vadd.f32 %v1856_v29, %v1855_v14  ;;  %v4492_v14 = vpack.c.bf16 %v2641_v1, %v2639_v4  ;;  %v2644_v29 = vld [vmem:[%s8097_s3 + $0x148] sm:$0xff]  ;;  %v2867_v4 = vld [vmem:[%s8100_s6 + $0x38] sm:$0xff] }
 0x40d   :  { %4451 = vmatprep.subr.bf16.mxu1 %v7154_v0  ;;  %v2608_v0 = vld [vmem:[%s8097_s3 + $0x28] sm:$0xff]  ;;  %v4494_v31 = vpack.c.bf16 %v2646_v32, %v2644_v29  ;;  %v2864_v29 = vld [vmem:[%s8100_s6 + $0x20] sm:$0xff]  ;;  %v2866_v32 = vld [vmem:[%s8100_s6 + $0x30] sm:$0xff] }
 0x40f   :  { %4349 = vmatpush1.bf16.msra.mxu0 %v7167_v40  ;;  %v4456_v40 = vpack.c.bf16 %v2605_v41, %v2603_v37  ;;  %v2643_v37 = vld [vmem:[%s8097_s3 + $0x140] sm:$0xff]  ;;  %v2645_v41 = vld [vmem:[%s8097_s3 + $0x150] sm:$0xff] }
 0x410   :  { %4453 = vmatpush1.bf16.msra.mxu1 %v7169_v11  ;;  %3330 = vmatprep.subr.msk.mxu0 %vm1869_vm12, %v7176_v12  ;;  %v4458_v11 = vpack.c.bf16 %v2610_v34, %v2608_v0  ;;  %v2607_v12 = vld [vmem:[%s8097_s3 + $0x20] sm:$0xff]  ;;  %v4496_v0 = vpack.c.bf16 %v2645_v41, %v2643_v37  ;;  %v2648_v34 = vld [vmem:[%s8097_s3 + $0x168] sm:$0xff]  ;;  %v2871_v37 = vld [vmem:[%s8100_s6 + $0x58] sm:$0xff]  ;;  %v7581_v41 = vpack.c.bf16 %v2866_v32, %v2864_v29 }
 0x411   :  { %3333 = vmatprep.subr.msk.mxu1 %vm1869_vm12, %v7181_v63  ;;  %v2612_v63 = vld [vmem:[%s8097_s3 + $0x48] sm:$0xff]  ;;  %v4460_v24 = vpack.c.bf16 %v2609_v7, %v2607_v12 }
 0x413   :  { %3331 = vmatpush1.msk.msra.mxu0 %vm1869_vm12, %v7192_v50  ;;  %v2614_v50 = vld [vmem:[%s8097_s3 + $0x58] sm:$0xff] }
 0x414   :  { %3334 = vmatpush1.msk.msra.mxu1 %vm1869_vm12, %v7197_v45  ;;  %2309 = vmatmul.mubr.f32.vlgmr.msra.gmra.mrb[14].mxu0 %v1857_v20  ;;  %v4462_v35 = vpack.c.bf16 %v2614_v50, %v2612_v63  ;;  %v2613_v45 = vld [vmem:[%s8097_s3 + $0x50] sm:$0xff] }
 0x415   :  { %2451 = vmatmul.mubr.f32.vlgmr.msra.gmra.mrb[10].mxu1 %v1857_v20  ;;  %4455 = vmatprep.subr.bf16.mxu0 %v4454_v30  ;;  %v4464_v43 = vpack.c.bf16 %v2613_v45, %v2611_v36  ;;  %v2650_v30 = vld [vmem:[%s8097_s3 + $0x178] sm:$0xff] }
 0x416   :  { %4457 = vmatpush1.bf16.msra.mxu0 %v4456_v40  ;;  %v4498_v20 = vpack.c.bf16 %v2650_v30, %v2648_v34  ;;  %v2647_v40 = vld [vmem:[%s8097_s3 + $0x160] sm:$0xff]  ;;  %4559 = vmatprep.subr.bf16.mxu1 %v7552_v44  ;;  %v2870_v30 = vld [vmem:[%s8100_s6 + $0x50] sm:$0xff] }
 0x417   :  { %4459 = vmatprep.subr.bf16.mxu0 %v4458_v11  ;;  %v2649_v11 = vld [vmem:[%s8097_s3 + $0x170] sm:$0xff]  ;;  %v2868_v34 = vld [vmem:[%s8100_s6 + $0x40] sm:$0xff] }
 0x418   :  { %v4500_v63 = vpack.c.bf16 %v2649_v11, %v2647_v40  ;;  %v2875_v40 = vld [vmem:[%s8100_s6 + $0x78] sm:$0xff]  ;;  %v7599_v11 = vpack.c.bf16 %v2870_v30, %v2868_v34 }
 0x41a   :  { %4461 = vmatpush1.bf16.msra.mxu0 %v4460_v24 }
 0x41b   :  { %4463 = vmatprep.subr.bf16.mxu0 %v4462_v35 }
 0x41e   :  { %4465 = vmatpush1.bf16.msra.mxu0 %v4464_v43  ;;  %v2654_v43 = vld [vmem:[%s8097_s3 + $0x198] sm:$0xff] }
 0x41f   :  { %4467 = vmatprep.subr.bf16.mxu0 %v4466_v61  ;;  %v2651_v61 = vld [vmem:[%s8097_s3 + $0x180] sm:$0xff]  ;;  %v4502_v62 = vpack.c.bf16 %v2654_v43, %v2652_v19 }
 0x422   :  { %4469 = vmatpush1.bf16.msra.mxu0 %v4468_v3  ;;  %v4504_v3 = vpack.c.bf16 %v2653_v9, %v2651_v61  ;;  %v2876_v61 = vld [vmem:[%s8100_s6 + $0x80] sm:$0xff]  ;;  %v2878_v9 = vld [vmem:[%s8100_s6 + $0x90] sm:$0xff] }
 0x423   :  { %4471 = vmatprep.subr.bf16.mxu0 %v4470_v10  ;;  %v8355_v10 = vld [vmem:[#allocation9_spill] sm:$0xff] }
 0x426   :  { %4473 = vmatpush1.bf16.msra.mxu0 %v4472_v27  ;;  %v4506_v27 = vpack.c.bf16 %v2658_v25, %v2656_v39  ;;  %v2880_v39 = vld [vmem:[%s8100_s6 + $0xa0] sm:$0xff]  ;;  %v2882_v25 = vld [vmem:[%s8100_s6 + $0xb0] sm:$0xff] }
 0x427   :  { %4475 = vmatprep.subr.bf16.mxu0 %v4474_v13  ;;  %v2655_v13 = vld [vmem:[%s8097_s3 + $0x1a0] sm:$0xff] }
 0x42a   :  { %4477 = vmatpush1.bf16.msra.mxu0 %v4476_v28  ;;  %v4508_v28 = vpack.c.bf16 %v2657_v56, %v2655_v13  ;;  %v2887_v13 = vld [vmem:[%s8100_s6 + $0xd8] sm:$0xff]  ;;  %v7653_v56 = vpack.c.bf16 %v2882_v25, %v2880_v39 }
 0x42b   :  { %4479 = vmatprep.subr.bf16.mxu0 %v4478_v55  ;;  %v4510_v55 = vpack.c.bf16 %v2662_v48, %v2660_v51  ;;  %v2884_v51 = vld [vmem:[%s8100_s6 + $0xc0] sm:$0xff]  ;;  %v2886_v48 = vld [vmem:[%s8100_s6 + $0xd0] sm:$0xff] }
 0x42c   :  { %v7671_v60 = vpack.c.bf16 %v2886_v48, %v2884_v51  ;;  %v8356_v48 = vld [vmem:[#allocation8_spill] sm:$0xff] }
 0x42e   :  { %4481 = vmatpush1.bf16.msra.mxu0 %v4480_v6  ;;  %v2664_v6 = vld [vmem:[%s8097_s3 + $0x1e8] sm:$0xff] }
 0x42f   :  { %4483 = vmatprep.subr.bf16.mxu0 %v4482_v22  ;;  %v4514_v22 = vpack.c.bf16 %v2666_v54, %v2664_v6  ;;  %v2888_v54 = vld [vmem:[%s8100_s6 + $0xe0] sm:$0xff] }
 0x432   :  { %4485 = vmatpush1.bf16.msra.mxu0 %v4484_v17  ;;  %v4516_v17 = vpack.c.bf16 %v2665_v16, %v2663_v46  ;;  %v2895_v46 = vld [vmem:[%s8100_s6 + $0x118] sm:$0xff] }
 0x433   :  { %4487 = vmatprep.subr.bf16.mxu0 %v4486_v58  ;;  %v4518_v58 = vpack.c.bf16 %v2670_v49, %v2668_v42  ;;  %v2892_v42 = vld [vmem:[%s8100_s6 + $0x100] sm:$0xff]  ;;  %v2894_v49 = vld [vmem:[%s8100_s6 + $0x110] sm:$0xff] }
 0x436   :  { %4489 = vmatpush1.bf16.msra.mxu0 %v4488_v33  ;;  %v2860_v33 = vld [vmem:[%s8100_s6] sm:$0xff] }
 0x437   :  { %4491 = vmatprep.subr.bf16.mxu0 %v4490_v8  ;;  %v2865_v8 = vld [vmem:[%s8100_s6 + $0x28] sm:$0xff]  ;;  %v7563_v1 = vpack.c.bf16 %v2862_v5, %v2860_v33 }
 0x439   :  { %4561 = vmatpush1.bf16.msra.mxu1 %v7563_v1 }
 0x43a   :  { %4493 = vmatpush1.bf16.msra.mxu0 %v4492_v14  ;;  %v7565_v14 = vpack.c.bf16 %v2867_v4, %v2865_v8 }
 0x43b   :  { %4495 = vmatprep.subr.bf16.mxu0 %v4494_v31  ;;  %v2869_v31 = vld [vmem:[%s8100_s6 + $0x48] sm:$0xff] }
 0x43c   :  { %4563 = vmatprep.subr.bf16.mxu1 %v7565_v14 }
 0x43d   :  { %4565 = vmatpush1.bf16.msra.mxu1 %v7581_v41 }
 0x43e   :  { %4497 = vmatpush1.bf16.msra.mxu0 %v4496_v0  ;;  %v7584_v0 = vpack.c.bf16 %v2871_v37, %v2869_v31 }
 0x43f   :  { %4499 = vmatprep.subr.bf16.mxu0 %v4498_v20  ;;  %v2873_v20 = vld [vmem:[%s8100_s6 + $0x68] sm:$0xff] }
 0x440   :  { %4567 = vmatprep.subr.bf16.mxu1 %v7584_v0 }
 0x441   :  { %4569 = vmatpush1.bf16.msra.mxu1 %v7599_v11 }
 0x442   :  { %4501 = vmatpush1.bf16.msra.mxu0 %v4500_v63  ;;  %v2874_v63 = vld [vmem:[%s8100_s6 + $0x70] sm:$0xff] }
 0x443   :  { %4503 = vmatprep.subr.bf16.mxu0 %v4502_v62  ;;  %v7635_v62 = vpack.c.bf16 %v2878_v9, %v2876_v61 }
 0x446   :  { %4505 = vmatpush1.bf16.msra.mxu0 %v4504_v3 }
 0x447   :  { %4507 = vmatprep.subr.bf16.mxu0 %v4506_v27  ;;  %v2885_v27 = vld [vmem:[%s8100_s6 + $0xc8] sm:$0xff] }
 0x44a   :  { %4509 = vmatpush1.bf16.msra.mxu0 %v4508_v28  ;;  %v7656_v28 = vpack.c.bf16 %v2887_v13, %v2885_v27  ;;  %v2469_v13 = vld [vmem:[%s8102_s8] ss:$2 sm:$0xf] }
 0x44b   :  { %4511 = vmatprep.subr.bf16.mxu0 %v4510_v55  ;;  %v2889_v55 = vld [vmem:[%s8100_s6 + $0xe8] sm:$0xff] }
 0x44c   :  { %v7674_v6 = vpack.c.bf16 %v2891_v23, %v2889_v55  ;;  %v2556_v55 = vsub.s32 3, %v8356_v48 }
 0x44e   :  { %4513 = vmatpush1.bf16.msra.mxu0 %v4512_v38  ;;  %v2890_v38 = vld [vmem:[%s8100_s6 + $0xf0] sm:$0xff] }
 0x44f   :  { %4515 = vmatprep.subr.bf16.mxu0 %v4514_v22  ;;  %v2893_v22 = vld [vmem:[%s8100_s6 + $0x108] sm:$0xff]  ;;  %v7689_v16 = vpack.c.bf16 %v2890_v38, %v2888_v54  ;;  %v3336_v38 = vld [vmem:[%s8102_s8 + $0x1] ss:$2 sm:$0xf] }
 0x452   :  { %4517 = vmatpush1.bf16.msra.mxu0 %v4516_v17  ;;  %v7692_v17 = vpack.c.bf16 %v2895_v46, %v2893_v22  ;;  %v8357_v46 = vld [vmem:[#allocation10_spill] sm:$0xff] }
 0x453   :  { %4519 = vmatprep.subr.bf16.mxu0 %v4518_v58  ;;  %v7701_v58 = vpack.c.bf16 %v2894_v49, %v2892_v42  ;;  %v8358_v49 = vld [vmem:[#allocation11_spill] sm:$0xff] }
 0x47c   :  { %v2019_v12 = vpop.f32.mrb[12].mxu0  ;;  %v2161_v7 = vpop.f32.mrb[8].mxu1 }
 0x47d   :  { %v7469_v50 = vmul.f32 0.5, %v2019_v12  ;;  %v7471_v24 = vmul.f32 0.5, %v2161_v7  ;;  %v2021_v35 = vpop.f32.mrb[13].mxu0  ;;  %v2163_v36 = vpop.f32.mrb[9].mxu1  ;;  %v7602_v12 = vpack.c.bf16 %v2875_v40, %v2873_v20  ;;  %v2872_v7 = vld [vmem:[%s8100_s6 + $0x60] sm:$0xff] }
 0x47e   :  { %v7473_v45 = vmul.f32 0.5, %v2021_v35  ;;  %v7475_v18 = vmul.f32 0.5, %v2163_v36  ;;  %v2877_v35 = vld [vmem:[%s8100_s6 + $0x88] sm:$0xff]  ;;  %v2879_v36 = vld [vmem:[%s8100_s6 + $0x98] sm:$0xff]  ;;  %v7617_v19 = vpack.c.bf16 %v2874_v63, %v2872_v7 }
 0x47f   :  { %4571 = vmatprep.subr.bf16.mxu1 %v7602_v12  ;;  %v7620_v43 = vpack.c.bf16 %v2879_v36, %v2877_v35  ;;  %v2461_v26 = vmul.f32 %v7469_v50, %v7469_v50  ;;  %v2463_v4 = vmul.f32 %v7471_v24, %v7471_v24 }
 0x480   :  { %v2514_v47 = vcombine.low %v7469_v50, %v7473_v45  ;;  %v2515_v59 = vcombine.low %v7471_v24, %v7475_v18  ;;  %4573 = vmatpush1.bf16.msra.mxu1 %v7617_v19  ;;  %v2462_v29 = vmul.f32 %v7473_v45, %v7473_v45  ;;  %v2464_v34 = vmul.f32 %v7475_v18, %v7475_v18 }
 0x481   :  { %4575 = vmatprep.subr.bf16.mxu1 %v7620_v43 }
 0x482   :  { %v7494_v53 = vrot.slane %v2514_v47, %v8355_v10  ;;  %v7497_v52 = vrot.slane %v2515_v59, %v8355_v10  ;;  %v2881_v47 = vld [vmem:[%s8100_s6 + $0xa8] sm:$0xff]  ;;  %v2883_v59 = vld [vmem:[%s8100_s6 + $0xb8] sm:$0xff] }
 0x483   :  { %v7638_v3 = vpack.c.bf16 %v2883_v59, %v2881_v47 }
 0x484   :  { %v2530_v21 = vcombine.low %v7494_v53, %v7497_v52  ;;  %4577 = vmatpush1.bf16.msra.mxu1 %v7635_v62  ;;  %v8361_v53 = vld [vmem:[#allocation41_spill] sm:$0xff] }
 0x485   :  { %4579 = vmatprep.subr.bf16.mxu1 %v7638_v3 }
 0x486   :  { %v2537_v23 = vrot.slane %v2530_v21, %v8355_v10 }
 0x488   :  { %4581 = vmatpush1.bf16.msra.mxu1 %v7653_v56 }
 0x489   :  { %4583 = vmatprep.subr.bf16.mxu1 %v7656_v28 }
 0x48c   :  { %4585 = vmatpush1.bf16.msra.mxu1 %v7671_v60 }
 0x48d   :  { %4587 = vmatprep.subr.bf16.mxu1 %v7674_v6 }
 0x490   :  { %4589 = vmatpush1.bf16.msra.mxu1 %v7689_v16 }
 0x491   :  { %4591 = vmatprep.subr.bf16.mxu1 %v7692_v17 }
 0x494   :  { %4593 = vmatpush1.bf16.msra.mxu1 %v7701_v58 }
 0x4e7   :  { %v2310_v2 = vpop.f32.mrb[14].mxu0 }
 0x4e8   :  { %v2457_v33 = vmul.f32 0.5, %v2310_v2  ;;  %v2452_v5 = vpop.f32.mrb[10].mxu1  ;;  %v2312_v8 = vpop.f32.mrb[15].mxu0 }
 0x4e9   :  { %v2459_v32 = vmul.f32 0.5, %v2452_v5  ;;  %v2458_v31 = vmul.f32 0.5, %v2312_v8  ;;  %v2454_v37 = vpop.f32.mrb[11].mxu1 }
 0x4ea   :  { %v2465_v30 = vsub.f32 %v2457_v33, %v2461_v26  ;;  %v2460_v20 = vmul.f32 0.5, %v2454_v37  ;;  %v8359_v33 = vld [vmem:[#allocation12_spill] sm:$0xff] }
 0x4eb   :  { %v2467_v40 = vsub.f32 %v2459_v32, %v2463_v4  ;;  %v2466_v7 = vsub.f32 %v2458_v31, %v2462_v29  ;;  %v8360_v4 = vld [vmem:[#allocation40_spill] sm:$0xff] }
 0x4ec   :  { %v2472_v50 = vadd.f32 1e-05, %v2465_v30  ;;  %v2468_v63 = vsub.f32 %v2460_v20, %v2464_v34 }
 0x4ed   :  { %v2474_v35 = vadd.f32 1e-05, %v2467_v40  ;;  %v2473_v36 = vadd.f32 1e-05, %v2466_v7  ;;  %v2667_v7 = vld [vmem:[%s8097_s3 + $0x200] sm:$0xff] }
 0x4ee   :  { %4723 = vrsqrt.f32 %v2472_v50  ;;  %v2475_v61 = vadd.f32 1e-05, %v2468_v63 }
 0x4ef   :  { %4725 = vrsqrt.f32 %v2474_v35  ;;  %v2674_v35 = vld [vmem:[%s8097_s3 + $0x238] sm:$0xff] }
 0x4f0   :  { %4727 = vrsqrt.f32 %v2473_v36 }
 0x4f1   :  { %4729 = vrsqrt.f32 %v2475_v61 }
 0x4f8   :  { %v4724_v24 = vpop.eup %4723 }
 0x4f9   :  { %v4726_v45 = vpop.eup %4725 }
 0x4fa   :  { %v4728_v9 = vpop.eup %4727 }
 0x4fb   :  { %v4730_v47 = vpop.eup %4729  ;;  %v2484_v59 = vcombine.low %v4724_v24, %v4728_v9 }
 0x4fc   :  { %v2485_v39 = vcombine.low %v4726_v45, %v4730_v47 }
 0x4fd   :  { %v2492_v18 = vrot.slane %v2484_v59, %v8355_v10 }
 0x4fe   :  { %v2499_v25 = vrot.slane %v2485_v39, %v8355_v10  ;;  %v2671_v39 = vld [vmem:[%s8097_s3 + $0x220] sm:$0xff] }
 0x500   :  { %v2500_v27 = vcombine.low %v2492_v18, %v2499_v25  ;;  %v2673_v18 = vld [vmem:[%s8097_s3 + $0x230] sm:$0xff]  ;;  %v2676_v25 = vld [vmem:[%s8097_s3 + $0x248] sm:$0xff] }
 0x502   :  { %v2507_v51 = vrot.slane %v2500_v27, %v8355_v10  ;;  %v2678_v27 = vld [vmem:[%s8097_s3 + $0x258] sm:$0xff] }
 0x503   :  { %v4526_v48 = vpack.c.bf16 %v2678_v27, %v2676_v25  ;;  %v2701_v25 = vld [vmem:[%s8097_s3 + $0x310] sm:$0xff]  ;;  %v2704_v27 = vld [vmem:[%s8097_s3 + $0x328] sm:$0xff] }
 0x504   :  { %v2509_v54 = vmul.f32 %v2507_v51, %v2469_v13  ;;  %v4524_v51 = vpack.c.bf16 %v2673_v18, %v2671_v39  ;;  %v2699_v18 = vld [vmem:[%s8097_s3 + $0x300] sm:$0xff] }
 0x506   :  { %v2539_v22 = vmul.f32 %v2537_v23, %v2509_v54  ;;  %v2549_v42 = vrot.slane %v2509_v54, %v8357_v46  ;;  %v2545_v2 = vrot.slane %v2509_v54, %v8358_v49  ;;  %v2557_v26 = vrot.slane %v2509_v54, %v2556_v55  ;;  %v2677_v23 = vld [vmem:[%s8097_s3 + $0x250] sm:$0xff] }
 0x507   :  { %v2553_v5 = vrot.slane %v2509_v54, %v8359_v33  ;;  %v2680_v54 = vld [vmem:[%s8097_s3 + $0x268] sm:$0xff] }
 0x508   :  { %v2540_v8 = vsub.f32 %v3336_v38, %v2539_v22  ;;  %v2563_v29 = vmul.f32 %v2549_v42, %v8360_v4  ;;  %v2562_v32 = vmul.f32 %v2545_v2, %v6809_v57  ;;  %v2565_v52 = vmul.f32 %v2557_v26, %v8361_v53  ;;  %v2669_v57 = vld [vmem:[%s8097_s3 + $0x210] sm:$0xff]  ;;  %v2682_v38 = vld [vmem:[%s8097_s3 + $0x278] sm:$0xff]  ;;  %v2679_v2 = vld [vmem:[%s8097_s3 + $0x260] sm:$0xff] }
 0x509   :  { %v2564_v21 = vmul.f32 %v2553_v5, %v8339_v15  ;;  %v2672_v15 = vld [vmem:[%s8097_s3 + $0x228] sm:$0xff]  ;;  %v4520_v24 = vpack.c.bf16 %v2669_v57, %v2667_v7  ;;  %v4530_v42 = vpack.c.bf16 %v2682_v38, %v2680_v54  ;;  %v2681_v26 = vld [vmem:[%s8097_s3 + $0x270] sm:$0xff]  ;;  %v2686_v5 = vld [vmem:[%s8097_s3 + $0x298] sm:$0xff] }
 0x50a   :  { %v2574_v31 = vrot.slane %v2540_v8, %v8357_v46  ;;  %v2570_v37 = vrot.slane %v2540_v8, %v8358_v49  ;;  %v2582_v34 = vrot.slane %v2540_v8, %v2556_v55  ;;  %v2578_v30 = vrot.slane %v2540_v8, %v8359_v33  ;;  %v2675_v55 = vld [vmem:[%s8097_s3 + $0x240] sm:$0xff]  ;;  %v2684_v33 = vld [vmem:[%s8097_s3 + $0x288] sm:$0xff] }
 0x50b   :  { %v4522_v59 = vpack.c.bf16 %v2674_v35, %v2672_v15  ;;  %v4528_v22 = vpack.c.bf16 %v2677_v23, %v2675_v55  ;;  %v4532_v8 = vpack.c.bf16 %v2681_v26, %v2679_v2  ;;  %v4534_v4 = vpack.c.bf16 %v2686_v5, %v2684_v33  ;;  %v2688_v53 = vld [vmem:[%s8097_s3 + $0x2a8] sm:$0xff]  ;;  %v2691_v57 = vld [vmem:[%s8097_s3 + $0x2c0] sm:$0xff]  ;;  %v2698_v35 = vld [vmem:[%s8097_s3 + $0x2f8] sm:$0xff] }
 0x50c   :  { %v2588_v20 = vadd.f32 %v2574_v31, %v2563_v29  ;;  %v2587_v40 = vadd.f32 %v2570_v37, %v2562_v32  ;;  %v2590_v50 = vadd.f32 %v2582_v34, %v2565_v52  ;;  %v7743_v63 = vadd.f32 %v2578_v30, %v2564_v21  ;;  %v2683_v29 = vld [vmem:[%s8097_s3 + $0x280] sm:$0xff]  ;;  %v2685_v32 = vld [vmem:[%s8097_s3 + $0x290] sm:$0xff]  ;;  %v2690_v52 = vld [vmem:[%s8097_s3 + $0x2b8] sm:$0xff] }
 0x50d   :  { %v4536_v21 = vpack.c.bf16 %v2685_v32, %v2683_v29  ;;  %v4538_v31 = vpack.c.bf16 %v2690_v52, %v2688_v53  ;;  %v2687_v37 = vld [vmem:[%s8097_s3 + $0x2a0] sm:$0xff]  ;;  %v2689_v34 = vld [vmem:[%s8097_s3 + $0x2b0] sm:$0xff]  ;;  %v2692_v30 = vld [vmem:[%s8097_s3 + $0x2c8] sm:$0xff] }
 0x50e   :  { %vm2592_vm13 = vcmp.ge.f32.partialorder %v2588_v20, 0.0  ;;  %v2596_v36 = vmul.f32 0.01, %v2588_v20  ;;  %vm2591_vm14 = vcmp.ge.f32.partialorder %v2587_v40, 0.0  ;;  %v2595_v61 = vmul.f32 0.01, %v2587_v40 }
 0x50f   :  { %vm2594_vm15 = vcmp.ge.f32.partialorder %v2590_v50, 0.0  ;;  %v2598_v45 = vmul.f32 0.01, %v2590_v50  ;;  %v2696_v15 = vld [vmem:[%s8097_s3 + $0x2e8] sm:$0xff]  ;;  %v2703_v55 = vld [vmem:[%s8097_s3 + $0x320] sm:$0xff]  ;;  %v2705_v23 = vld [vmem:[%s8097_s3 + $0x330] sm:$0xff] }
 0x510   :  { %v2600_v9 = vsel %vm2592_vm13, %v2588_v20, %v2596_v36  ;;  %v2599_v47 = vsel %vm2591_vm14, %v2587_v40, %v2595_v61  ;;  %v2694_v20 = vld [vmem:[%s8097_s3 + $0x2d8] sm:$0xff]  ;;  %v4540_v40 = vpack.c.bf16 %v2689_v34, %v2687_v37  ;;  %v4546_v61 = vpack.c.bf16 %v2698_v35, %v2696_v15  ;;  %v2708_v38 = vld [vmem:[%s8097_s3 + $0x348] sm:$0xf]  ;;  %v2900_v52 = vld [vmem:[%s8100_s6 + $0x140] sm:$0xff] }
 0x511   :  { %2782 = vmatprep.mubr.f32.mxu0 %v2600_v9  ;;  %v2602_v13 = vsel %vm2594_vm15, %v2590_v50, %v2598_v45  ;;  %v4542_v7 = vpack.c.bf16 %v2694_v20, %v2692_v30  ;;  %v2693_v50 = vld [vmem:[%s8097_s3 + $0x2d0] sm:$0xff]  ;;  %v2700_v9 = vld [vmem:[%s8097_s3 + $0x308] sm:$0xff]  ;;  %v4556_v54 = vpack.c.bf16 %v2705_v23, %v2703_v55  ;;  %vm2593_vm1 = vcmp.ge.f32.partialorder %v7743_v63, 0.0  ;;  %v2899_v33 = vld [vmem:[%s8100_s6 + $0x138] sm:$0xff] }
 0x512   :  { %2783 = vmatmul.mubr.f32.vlgmr.msra.gmra.mrb[16].mxu0 %v2599_v47  ;;  %v4544_v36 = vpack.c.bf16 %v2693_v50, %v2691_v57  ;;  %v2697_v45 = vld [vmem:[%s8097_s3 + $0x2f0] sm:$0xff]  ;;  %v2702_v47 = vld [vmem:[%s8097_s3 + $0x318] sm:$0xff]  ;;  %v2897_v26 = vld [vmem:[%s8100_s6 + $0x128] sm:$0xff] }
 0x513   :  { %4521 = vmatpush1.bf16.msra.mxu0 %v4520_v24  ;;  %3339 = vmatprep.mubr.msk.f32.mxu0 %vm1865_vm11, %v2602_v13  ;;  %v2695_v24 = vld [vmem:[%s8097_s3 + $0x2e0] sm:$0xff]  ;;  %v4550_v39 = vpack.c.bf16 %v2702_v47, %v2700_v9  ;;  %v2706_v13 = vld [vmem:[%s8097_s3 + $0x338] sm:$0xff]  ;;  %v7871_v5 = vpack.c.bf16 %v2899_v33, %v2897_v26  ;;  %v2901_v29 = vld [vmem:[%s8100_s6 + $0x148] sm:$0xff] }
 0x514   :  { %4523 = vmatprep.subr.bf16.mxu0 %v4522_v59  ;;  %v4548_v59 = vpack.c.bf16 %v2697_v45, %v2695_v24  ;;  %v2903_v32 = vld [vmem:[%s8100_s6 + $0x158] sm:$0xff]  ;;  %v2905_v37 = vld [vmem:[%s8100_s6 + $0x168] sm:$0xff]  ;;  %v2904_v20 = vld [vmem:[%s8100_s6 + $0x160] sm:$0xff] }
 0x515   :  { %4595 = vmatprep.subr.bf16.mxu1 %v7871_v5  ;;  %v7889_v53 = vpack.c.bf16 %v2903_v32, %v2901_v29  ;;  %v2907_v34 = vld [vmem:[%s8100_s6 + $0x178] sm:$0xff]  ;;  %v7922_v57 = vld [vmem:[%s8100_s6 + $0x188] sm:$0xff]  ;;  %v7928_v50 = vld [vmem:[%s8100_s6 + $0x180] sm:$0xff] }
 0x516   :  { %v7907_v30 = vpack.c.bf16 %v2907_v34, %v2905_v37  ;;  %v3182_v33 = vld [vmem:[%s8104_s10 + $0x30] sm:$0xff] }
 0x517   :  { %4525 = vmatpush1.bf16.msra.mxu0 %v4524_v51  ;;  %v4552_v51 = vpack.c.bf16 %v2701_v25, %v2699_v18  ;;  %v3186_v32 = vld [vmem:[%s8104_s10 + $0x50] sm:$0xff] }
 0x518   :  { %4527 = vmatprep.subr.bf16.mxu0 %v4526_v48  ;;  %v4554_v48 = vpack.c.bf16 %v2706_v13, %v2704_v27  ;;  %v3190_v34 = vld [vmem:[%s8104_s10 + $0x70] sm:$0xff] }
 0x51b   :  { %4529 = vmatpush1.bf16.msra.mxu0 %v4528_v22  ;;  %v2597_v22 = vmul.f32 0.01, %v7743_v63 }
 0x51c   :  { %4531 = vmatprep.subr.bf16.mxu0 %v4530_v42  ;;  %v2707_v42 = vld [vmem:[%s8097_s3 + $0x340] sm:$0xf] }
 0x51d   :  { %v2601_v2 = vsel %vm2593_vm1, %v7743_v63, %v2597_v22 }
 0x51f   :  { %4533 = vmatpush1.bf16.msra.mxu0 %v4532_v8  ;;  %v2896_v8 = vld [vmem:[%s8100_s6 + $0x120] sm:$0xff] }
 0x520   :  { %4535 = vmatprep.subr.bf16.mxu0 %v4534_v4  ;;  %v2898_v4 = vld [vmem:[%s8100_s6 + $0x130] sm:$0xff] }
 0x521   :  { %v7879_v63 = vpack.c.bf16 %v2898_v4, %v2896_v8  ;;  %v3184_v4 = vld [vmem:[%s8104_s10 + $0x40] sm:$0xff] }
 0x523   :  { %4537 = vmatpush1.bf16.msra.mxu0 %v4536_v21  ;;  %4597 = vmatpush1.bf16.msra.mxu1 %v7879_v63  ;;  %v2902_v21 = vld [vmem:[%s8100_s6 + $0x150] sm:$0xff] }
 0x524   :  { %4539 = vmatprep.subr.bf16.mxu0 %v4538_v31  ;;  %v7897_v31 = vpack.c.bf16 %v2902_v21, %v2900_v52  ;;  %4599 = vmatprep.subr.bf16.mxu1 %v7889_v53  ;;  %v3188_v21 = vld [vmem:[%s8104_s10 + $0x60] sm:$0xff] }
 0x527   :  { %4541 = vmatpush1.bf16.msra.mxu0 %v4540_v40  ;;  %4601 = vmatpush1.bf16.msra.mxu1 %v7897_v31  ;;  %v2906_v40 = vld [vmem:[%s8100_s6 + $0x170] sm:$0xff] }
 0x528   :  { %4543 = vmatprep.subr.bf16.mxu0 %v4542_v7  ;;  %v7915_v7 = vpack.c.bf16 %v2906_v40, %v2904_v20  ;;  %4603 = vmatprep.subr.bf16.mxu1 %v7907_v30  ;;  %v3192_v40 = vld [vmem:[%s8104_s10 + $0x80] sm:$0xff] }
 0x52b   :  { %4545 = vmatpush1.bf16.msra.mxu0 %v4544_v36  ;;  %4605 = vmatpush1.bf16.msra.mxu1 %v7915_v7 }
 0x52c   :  { %4547 = vmatprep.subr.bf16.mxu0 %v4546_v61  ;;  %2993 = vmatprep.subr.mxu1 %v7922_v57 }
 0x52f   :  { %4549 = vmatpush1.bf16.msra.mxu0 %v4548_v59  ;;  %2994 = vmatpush1.msra.mxu1 %v7928_v50 }
 0x530   :  { %4551 = vmatprep.subr.bf16.mxu0 %v4550_v39  ;;  %4607 = vmatprep.subr.bf16.mxu1 %v7552_v44 }
 0x533   :  { %4553 = vmatpush1.bf16.msra.mxu0 %v4552_v51 }
 0x534   :  { %4555 = vmatprep.subr.bf16.mxu0 %v4554_v48 }
 0x537   :  { %4557 = vmatpush1.bf16.msra.mxu0 %v4556_v54 }
 0x538   :  { %3337 = vmatprep.subr.msk.mxu0 %vm1869_vm12, %v2708_v38 }
 0x53b   :  { %3338 = vmatpush1.msk.msra.mxu0 %vm1869_vm12, %v2707_v42 }
 0x53c   :  { %2854 = vmatmul.mubr.f32.vlgmr.msra.gmra.mrb[16].mxu0 %v2601_v2 }
 0x60f   :  { %v7932_v15 = vpop.f32.mrb[16].mxu0 }
 0x610   :  { %v2910_v35 = vsel %vm97_vm0, %v7932_v15, 0.0  ;;  %v7936_v36 = vpop.f32.mrb[17].mxu0 }
 0x611   :  { %v2911_v61 = vrot.slane %v2910_v35, 4  ;;  %v2918_v24 = vsel %vm2917_vm2, %v7936_v36, 0.0  ;;  %v2926_v45 = vmul.f32 %v7936_v36, %v7936_v36 }
 0x612   :  { %v2919_v9 = vrot.slane %v2918_v24, 4 }
 0x613   :  { %v2912_v47 = vadd.f32 %v2911_v61, %v2910_v35  ;;  %v2934_v59 = vsel %vm2917_vm2, %v2926_v45, 0.0  ;;  %v3195_v35 = vld [vmem:[%s8104_s10 + $0x98] sm:$0xff]  ;;  %v3197_v45 = vld [vmem:[%s8104_s10 + $0xa8] sm:$0xff] }
 0x614   :  { %v2920_v39 = vadd.f32 %v2919_v9, %v2918_v24  ;;  %v2935_v18 = vrot.slane %v2934_v59, 4  ;;  %v3196_v24 = vld [vmem:[%s8104_s10 + $0xa0] sm:$0xff] }
 0x615   :  { %v2913_v44 = vrot.slane %v2912_v47, 2  ;;  %v4685_v9 = vpack.c.bf16 %v3197_v45, %v3196_v24 }
 0x616   :  { %v2921_v25 = vrot.slane %v2920_v39, 2  ;;  %v2936_v27 = vadd.f32 %v2935_v18, %v2934_v59  ;;  %v3199_v59 = vld [vmem:[%s8104_s10 + $0xb8] sm:$0xff]  ;;  %v8363_v18 = vmov 0.0  }
 0x617   :  { %v2914_v13 = vadd.f32 %v2913_v44, %v2912_v47  ;;  %v3198_v47 = vld [vmem:[%s8104_s10 + $0xb0] sm:$0xff]  ;;  %v3200_v44 = vld [vmem:[%s8104_s10 + $0xc0] sm:$0xff] }
 0x618   :  { %v2922_v51 = vadd.f32 %v2921_v25, %v2920_v39  ;;  %v2937_v48 = vrot.slane %v2936_v27, 2  ;;  %v4688_v39 = vpack.c.bf16 %v3199_v59, %v3198_v47 }
 0x619   :  { %v2915_v55 = vrot.slane %v2914_v13, 1 }
 0x61a   :  { %v2923_v23 = vrot.slane %v2922_v51, 1  ;;  %v2938_v54 = vadd.f32 %v2937_v48, %v2936_v27 }
 0x61b   :  { %v2916_v42 = vadd.f32 %v2915_v55, %v2914_v13 }
 0x61c   :  { %v2924_v38 = vadd.f32 %v2923_v23, %v2922_v51  ;;  %v2939_v22 = vrot.slane %v2938_v54, 1 }
 0x61e   :  { %3340 = vmatprep.mubr.msk.f32.mxu1 %vm2941_vm3, %v2924_v38  ;;  %v2940_v2 = vadd.f32 %v2939_v22, %v2938_v54 }
 0x61f   :  { %3010 = vmatmul.mubr.f32.vlgmr.msra.gmra.mrb[12].mxu1 %v2916_v42 }
 0x620   :  { %4609 = vmatpush1.bf16.msra.mxu1 %v7563_v1  ;;  %3341 = vmatprep.mubr.msk.f32.mxu1 %vm2941_vm3, %v2940_v2  ;;  %v2925_v1 = vmul.f32 %v7932_v15, %v7932_v15 }
 0x621   :  { %4611 = vmatprep.subr.bf16.mxu1 %v7565_v14 }
 0x622   :  { %v2927_v14 = vsel %vm97_vm0, %v2925_v1, 0.0 }
 0x624   :  { %4613 = vmatpush1.bf16.msra.mxu1 %v7581_v41  ;;  %v2928_v41 = vrot.slane %v2927_v14, 4 }
 0x625   :  { %4615 = vmatprep.subr.bf16.mxu1 %v7584_v0 }
 0x626   :  { %v2929_v0 = vadd.f32 %v2928_v41, %v2927_v14 }
 0x628   :  { %4617 = vmatpush1.bf16.msra.mxu1 %v7599_v11  ;;  %v2930_v11 = vrot.slane %v2929_v0, 2 }
 0x629   :  { %4619 = vmatprep.subr.bf16.mxu1 %v7602_v12 }
 0x62a   :  { %v2931_v12 = vadd.f32 %v2930_v11, %v2929_v0 }
 0x62c   :  { %4621 = vmatpush1.bf16.msra.mxu1 %v7617_v19  ;;  %v2932_v19 = vrot.slane %v2931_v12, 1 }
 0x62d   :  { %4623 = vmatprep.subr.bf16.mxu1 %v7620_v43 }
 0x62e   :  { %v2933_v43 = vadd.f32 %v2932_v19, %v2931_v12 }
 0x630   :  { %4625 = vmatpush1.bf16.msra.mxu1 %v7635_v62  ;;  %v8362_v62 = vmov 0.0|0.0  }
 0x631   :  { %4627 = vmatprep.subr.bf16.mxu1 %v7638_v3  ;;  %v3176_v3 = vld [vmem:[%s8104_s10] sm:$0xff] }
 0x634   :  { %4629 = vmatpush1.bf16.msra.mxu1 %v7653_v56  ;;  %v3177_v56 = vld [vmem:[%s8104_s10 + $0x8] sm:$0xff] }
 0x635   :  { %4631 = vmatprep.subr.bf16.mxu1 %v7656_v28  ;;  %v3178_v28 = vld [vmem:[%s8104_s10 + $0x10] sm:$0xff] }
 0x638   :  { %4633 = vmatpush1.bf16.msra.mxu1 %v7671_v60  ;;  %v4655_v60 = vpack.c.bf16 %v3177_v56, %v3176_v3 }
 0x639   :  { %4635 = vmatprep.subr.bf16.mxu1 %v7674_v6  ;;  %v3179_v6 = vld [vmem:[%s8104_s10 + $0x18] sm:$0xff] }
 0x63c   :  { %4637 = vmatpush1.bf16.msra.mxu1 %v7689_v16  ;;  %v4658_v16 = vpack.c.bf16 %v3179_v6, %v3178_v28 }
 0x63d   :  { %4639 = vmatprep.subr.bf16.mxu1 %v7692_v17  ;;  %v3180_v17 = vld [vmem:[%s8104_s10 + $0x20] sm:$0xff] }
 0x640   :  { %4641 = vmatpush1.bf16.msra.mxu1 %v7701_v58  ;;  %v3181_v58 = vld [vmem:[%s8104_s10 + $0x28] sm:$0xff] }
 0x641   :  { %4643 = vmatprep.subr.bf16.mxu1 %v7871_v5  ;;  %v4661_v26 = vpack.c.bf16 %v3181_v58, %v3180_v17  ;;  %v3183_v5 = vld [vmem:[%s8104_s10 + $0x38] sm:$0xff] }
 0x642   :  { %v4664_v8 = vpack.c.bf16 %v3183_v5, %v3182_v33 }
 0x644   :  { %4645 = vmatpush1.bf16.msra.mxu1 %v7879_v63  ;;  %v3185_v63 = vld [vmem:[%s8104_s10 + $0x48] sm:$0xff] }
 0x645   :  { %4647 = vmatprep.subr.bf16.mxu1 %v7889_v53  ;;  %v4667_v29 = vpack.c.bf16 %v3185_v63, %v3184_v4  ;;  %v3187_v53 = vld [vmem:[%s8104_s10 + $0x58] sm:$0xff] }
 0x646   :  { %v4670_v52 = vpack.c.bf16 %v3187_v53, %v3186_v32 }
 0x648   :  { %4649 = vmatpush1.bf16.msra.mxu1 %v7897_v31  ;;  %v3189_v31 = vld [vmem:[%s8104_s10 + $0x68] sm:$0xff] }
 0x649   :  { %4651 = vmatprep.subr.bf16.mxu1 %v7907_v30  ;;  %v4673_v37 = vpack.c.bf16 %v3189_v31, %v3188_v21  ;;  %v3191_v30 = vld [vmem:[%s8104_s10 + $0x78] sm:$0xff] }
 0x64a   :  { %v4676_v20 = vpack.c.bf16 %v3191_v30, %v3190_v34 }
 0x64c   :  { %4653 = vmatpush1.bf16.msra.mxu1 %v7915_v7  ;;  %v3193_v7 = vld [vmem:[%s8104_s10 + $0x88] sm:$0xff] }
 0x64d   :  { %3069 = vmatprep.subr.mxu1 %v7922_v57  ;;  %v4679_v57 = vpack.c.bf16 %v3193_v7, %v3192_v40 }
 0x650   :  { %3070 = vmatpush1.msra.mxu1 %v7928_v50  ;;  %v3194_v50 = vld [vmem:[%s8104_s10 + $0x90] sm:$0xff] }
 0x651   :  { %3086 = vmatmul.mubr.f32.vlgmr.msra.gmra.mrb[14].mxu1 %v2933_v43  ;;  %4654 = vmatprep.subr.bf16.mxu1 %v8362_v62  ;;  %v4682_v61 = vpack.c.bf16 %v3195_v35, %v3194_v50 }
 0x652   :  { %4656 = vmatpush1.bf16.msra.mxu1 %v4655_v60  ;;  %v3342_v60 = vld [vmem:[%s8103_s9 + $0x1] ss:$2 sm:$0x3] }
 0x653   :  { %4657 = vmatprep.subr.bf16.mxu1 %v8362_v62 }
 0x656   :  { %4659 = vmatpush1.bf16.msra.mxu1 %v4658_v16 }
 0x657   :  { %4660 = vmatprep.subr.bf16.mxu1 %v8362_v62 }
 0x65a   :  { %4662 = vmatpush1.bf16.msra.mxu1 %v4661_v26 }
 0x65b   :  { %4663 = vmatprep.subr.bf16.mxu1 %v8362_v62 }
 0x65e   :  { %4665 = vmatpush1.bf16.msra.mxu1 %v4664_v8 }
 0x65f   :  { %4666 = vmatprep.subr.bf16.mxu1 %v8362_v62 }
 0x662   :  { %4668 = vmatpush1.bf16.msra.mxu1 %v4667_v29 }
 0x663   :  { %4669 = vmatprep.subr.bf16.mxu1 %v8362_v62 }
 0x666   :  { %4671 = vmatpush1.bf16.msra.mxu1 %v4670_v52 }
 0x667   :  { %4672 = vmatprep.subr.bf16.mxu1 %v8362_v62 }
 0x66a   :  { %4674 = vmatpush1.bf16.msra.mxu1 %v4673_v37 }
 0x66b   :  { %4675 = vmatprep.subr.bf16.mxu1 %v8362_v62 }
 0x66e   :  { %4677 = vmatpush1.bf16.msra.mxu1 %v4676_v20 }
 0x66f   :  { %4678 = vmatprep.subr.bf16.mxu1 %v8362_v62 }
 0x672   :  { %4680 = vmatpush1.bf16.msra.mxu1 %v4679_v57 }
 0x673   :  { %4681 = vmatprep.subr.bf16.mxu1 %v8362_v62 }
 0x676   :  { %4683 = vmatpush1.bf16.msra.mxu1 %v4682_v61 }
 0x677   :  { %4684 = vmatprep.subr.bf16.mxu1 %v8362_v62 }
 0x67a   :  { %4686 = vmatpush1.bf16.msra.mxu1 %v4685_v9 }
 0x67b   :  { %4687 = vmatprep.subr.bf16.mxu1 %v8362_v62  ;;  %v3098_v62 = vld [vmem:[%s8103_s9] ss:$2 sm:$0x3] }
 0x67e   :  { %4689 = vmatpush1.bf16.msra.mxu1 %v4688_v39 }
 0x67f   :  { %3259 = vmatprep.subr.mxu1 %v8363_v18 }
 0x682   :  { %3260 = vmatpush1.msra.mxu1 %v3200_v44 }
 0x6f2   :  { %v3011_v25 = vpop.f32.mrb[12].mxu1 }
 0x6f3   :  { %v3016_v27 = vmul.f32 0.5, %v3011_v25  ;;  %v3013_v13 = vpop.f32.mrb[13].mxu1 }
 0x6f4   :  { %v3017_v51 = vmul.f32 0.5, %v3013_v13 }
 0x6f5   :  { %v3094_v23 = vmul.f32 %v3016_v27, %v3016_v27 }
 0x6f6   :  { %v3126_v48 = vcombine.low %v3016_v27, %v3017_v51  ;;  %v3095_v22 = vmul.f32 %v3017_v51, %v3017_v51 }
 0x6f8   :  { %v3133_v19 = vrot.slane %v3126_v48, %v8355_v10 }
 0x6fa   :  { %v3140_v56 = vrot.slane %v3133_v19, %v8355_v10 }
 0x724   :  { %v3087_v55 = vpop.f32.mrb[14].mxu1 }
 0x725   :  { %v3092_v54 = vmul.f32 0.5, %v3087_v55  ;;  %v3089_v38 = vpop.f32.mrb[15].mxu1 }
 0x726   :  { %v3093_v42 = vmul.f32 0.5, %v3089_v38 }
 0x727   :  { %v3096_v2 = vsub.f32 %v3092_v54, %v3094_v23 }
 0x728   :  { %v3097_v1 = vsub.f32 %v3093_v42, %v3095_v22 }
 0x729   :  { %v3101_v14 = vadd.f32 1e-05, %v3096_v2 }
 0x72a   :  { %v3102_v41 = vadd.f32 1e-05, %v3097_v1 }
 0x72b   :  { %4731 = vrsqrt.f32 %v3101_v14 }
 0x72c   :  { %4733 = vrsqrt.f32 %v3102_v41 }
 0x735   :  { %v4732_v0 = vpop.eup %4731 }
 0x736   :  { %v4734_v11 = vpop.eup %4733 }
 0x737   :  { %v3107_v12 = vcombine.low %v4732_v0, %v4734_v11 }
 0x739   :  { %v3114_v43 = vrot.slane %v3107_v12, %v8355_v10 }
 0x73b   :  { %v3121_v3 = vrot.slane %v3114_v43, %v8355_v10 }
 0x73d   :  { %v3123_v28 = vmul.f32 %v3121_v3, %v3098_v62 }
 0x73f   :  { %v3142_v6 = vmul.f32 %v3140_v56, %v3123_v28  ;;  %v3152_v16 = vrot.slane %v3123_v28, %v8357_v46  ;;  %v3148_v17 = vrot.slane %v3123_v28, %v8358_v49 }
 0x741   :  { %v3143_v58 = vsub.f32 %v3342_v60, %v3142_v6  ;;  %v3156_v26 = vmul.f32 %v3152_v16, %v7936_v36  ;;  %v3155_v33 = vmul.f32 %v3148_v17, %v7932_v15  ;;  %v3343_v36 = vld [vmem:[%s8105_s11] ss:$0 sm:$0xff]  ;;  %s4795_s11 = smov [#allocation5]  }
 0x742   :  { %s3303_s6 = sshll.u32 %s4795_s11, 4  ;;  %s3304_s6 = int_to_ptr.vmem [resolvable:$true] %s3303_s6 }
 0x743   :  { %v3165_v5 = vrot.slane %v3143_v58, %v8357_v46  ;;  %v3161_v8 = vrot.slane %v3143_v58, %v8358_v49  ;;  %s4761_s17 = scalar_lea.vmem %s3304_s6, 32  ;;  %p4766_p9 = scmp.lt.s32.totalorder %s3304_s6, %s3304_s6 }
 0x744   :  { %p4762_p8 = scmp.ne.s32.totalorder %s3304_s6, %s4761_s17  ;;  %p4767_p10 = scmp.lt.s32.totalorder %s4761_s17, %s4761_s17 }
 0x745   :  { %v3169_v10 = vadd.f32 %v3165_v5, %v3156_v26  ;;  %v3168_v4 = vadd.f32 %v3161_v8, %v3155_v33 }
 0x746   :  { %p4768_p11 = por %p4767_p10, %p4766_p9 }
 0x747   :  { %vm3171_vm0 = vcmp.ge.f32.partialorder %v3169_v10, 0.0  ;;  %v3173_v63 = vmul.f32 0.01, %v3169_v10  ;;  %vm3170_vm4 = vcmp.ge.f32.partialorder %v3168_v4, 0.0  ;;  %v3172_v29 = vmul.f32 0.01, %v3168_v4 }
 0x748   :  { %p4769_p12 = pnand %p4768_p11, %p4762_p8 }
 0x749   :  { %v3175_v32 = vsel %vm3171_vm0, %v3169_v10, %v3173_v63  ;;  %v3174_v53 = vsel %vm3170_vm4, %v3168_v4, %v3172_v29 }
 0x74a   :  { %3344 = vmatprep.mubr.msk.f32.mxu1 %vm2941_vm3, %v3175_v32 }
 0x74b   :  { %3276 = vmatmul.mubr.f32.vlgmr.msra.gmra.mrb[16].mxu1 %v3174_v53 }
 0x81e   :  { %v3277_v15 = vpop.f32.mrb[16].mxu1 }
 0x81f   :  { %v3278_v52 = vadd.f32 %v3343_v36, %v3277_v15  ;;  %v3279_v46 = vpop.f32.mrb[17].mxu1 }
 0x821   :  { %v3282_v21 = vmul.f32 0.01, %v3278_v52  ;;  %vm3281_vm5 = vcmp.ge.f32.partialorder %v3278_v52, 0.0 }
 0x823   :  { %v3283_v49 = vsel %vm3281_vm5, %v3278_v52, %v3282_v21 }
 0x824   :  { %v3285_v31 = vsel %vm3284_vm6, %v3283_v49, -inf }
 0x825   :  { %3286 = vmax.xlane.f32.xlu0 %v3285_v31 }
 0x8b2   :  { %v3287_v37 = vpop.xlane.xlu0 %3286 }
 0x8b3   :  { %v3288_v34 = vsub.f32 %v3283_v49, %v3287_v37 }
 0x8b5   :  { %v3289_v30 = vmul.f32 1.442695, %v3288_v34 }
 0x8b7   :  { %4735 = vpow2.f32 %v3289_v30 }
 0x8c1   :  { %v4736_v20 = vpop.eup %4735 }
 0x8c2   :  { %v3291_v40 = vsel %vm3284_vm6, %v4736_v20, 0.0 }
 0x8c3   :  { %3292 = vadd.xlane.f32.xlu0 %v3291_v40 }
 0x950   :  { %v3293_v7 = vpop.xlane.xlu0 %3292 }
 0x951   :  { %4737 = vrcp.f32 %v3293_v7 }
 0x95b   :  { %v4738_v57 = vpop.eup %4737 }
 0x95c   :  { %v3295_v50 = vmul.f32 %v4738_v57, %v4736_v20 }
 0x95e   :  { %3296 = vst.msk [vmem:[#allocation5] sm:$0x3] %vm3284_vm6, %v3295_v50 }
 0x95f   :  { %4772 = shalt.err (!%p4769_p12)
}
 0x960   :  { %s4773_s19 = scalar_lea.hbm %s8106_s12, 32 }
 0x961   :  { %p4774_p13 = scmp.ne.s32.totalorder %s8106_s12, %s4773_s19  ;;  %p4777_p0 = scmp.lt.u32.totalorder %s4773_s19, %s8106_s12 }
 0x963   :  { %p4779_p1 = pnand %p4777_p0, %p4774_p13 }
 0x965   :  { %4782 = shalt.err (!%p4779_p1)
}
 0x966   :  { %3306 = dma.vmem_to_hbm [thread:$0]  %s3304_s6, 32, %s8106_s12, [#allocation4]  }
 0x967   :  { %4785 = dma.done.wait [#allocation4], 32  }
 0x968   :  { %4786 = vsyncadd [#allocation4], 4294967264 }
 0x969   :  { %3310 = vsyncpa [#allocation3], 1 }
 0x96a   :  { %3311 = vsyncpa [#allocation4], 1 }

</bundles_post_ra>
